<compile_context>
chip_gen: v5e
topology: v5e:2x2
jax: 0.10.0
libtpu: 0.0.40
codegen_flags: <defaults>
</compile_context>

<pallas_src>
import functools

import jax
import jax.numpy as jnp
import numpy as np
from jax import lax
from jax.experimental import pallas as pl
from jax.experimental.pallas import tpu as pltpu

LANE = 128


def _round_up(v, m):
    return ((v + m - 1) // m) * m


# ----------------------------- Pallas kernel --------------------------------

def fused_multigraph_kernel(a_ref, x_ref, wred_ref, bred_ref,
                            w_ref, b_ref, gamma_ref, beta_ref,
                            wcls_ref, bcls_ref, out_ref, xcat_ref,
                            *, num_graphs, num_layers, h_real, eps=1e-5):
    """Single grid step: all graphs' dim-reduction + L x (GCN, LN, relu,
    residual) chains interleaved, plus one fused K = G*HP classifier matmul.

    a_ref     : (G, NP, NP)     f32  normalized dense adjacency (zero pad rows/cols)
    x_ref     : (G, NP, DP)     bf16 node features (zero pad rows/lanes)
    wred_ref  : (G, DP, HP)     bf16 dim-reduction weight (zero-padded)
    bred_ref  : (G, 1, HP)      f32  dim-reduction bias (zero pad lanes)
    w_ref     : (G, L, HP, HP)  bf16 GCN weights;  b_ref (G, L, 1, HP) f32 biases
    gamma/beta: (G, L, 1, HP)   f32  LN params (zero pad lanes)
    wcls_ref  : (G*HP, CP)      bf16 classifier weight, graph blocks stacked on K
    bcls_ref  : (1, CP)         f32  classifier bias
    out_ref   : (NP, CP)        f32  padded logits
    xcat_ref  : (NP, G*HP)      bf16 VMEM scratch: lane-concatenated features
    """
    hp = wred_ref.shape[-1]
    lane_idx = lax.broadcasted_iota(jnp.int32, (1, hp), 1)
    lane_mask = (lane_idx < h_real).astype(jnp.float32)   # live-feature mask
    inv_h = jnp.float32(1.0 / h_real)

    # ---- dim reduction (nn.Linear) for every graph: independent chains ----
    feats = []
    for g in range(num_graphs):
        xg = jnp.dot(x_ref[g], wred_ref[g],
                     preferred_element_type=jnp.float32) + bred_ref[g]
        feats.append(xg)                                   # (NP, HP) f32

    # ---- GCN stack; graphs interleaved per layer (independent MXU chains) ----
    for l in range(num_layers):
        for g in range(num_graphs):
            w_l = w_ref[g, l]          # (HP, HP) bf16
            b_l = b_ref[g, l]          # (1, HP)  f32
            gamma_l = gamma_ref[g, l]  # (1, HP)  f32
            beta_l = beta_ref[g, l]    # (1, HP)  f32

            # GCNConv: A_norm @ (x @ W_l) + b_l
            xw = jnp.dot(feats[g].astype(jnp.bfloat16), w_l,
                         preferred_element_type=jnp.float32)        # (NP, HP)
            h = jnp.dot(a_ref[g], xw,
                        preferred_element_type=jnp.float32) + b_l   # f32 A pass

            # LayerNorm over the real H lanes: explicit mask, two independent
            # cross-lane reductions, var = E[h^2] - mu^2.
            hm = h * lane_mask
            s1 = jnp.sum(hm, axis=-1, keepdims=True)
            s2 = jnp.sum(hm * hm, axis=-1, keepdims=True)
            mu = s1 * inv_h
            var = jnp.maximum(s2 * inv_h - mu * mu, 0.0)
            hn = (hm - mu) * lax.rsqrt(var + eps) * gamma_l + beta_l  # pad->0

            # relu + residual
            feats[g] = feats[g] + jnp.maximum(hn, 0.0)

    # ---- classifier: one matmul with K = G*HP (256 for G=2) ----
    for g in range(num_graphs):
        xcat_ref[:, g * hp:(g + 1) * hp] = feats[g].astype(jnp.bfloat16)
    out_ref[...] = jnp.dot(xcat_ref[...], wcls_ref[...],
                           preferred_element_type=jnp.float32) + bcls_ref[...]


# ------------------------------ host-side prep -------------------------------

def gcn_norm_dense(edge_index, num_nodes):
    """Dense D^{-1/2}(A+I)D^{-1/2} matching torch_geometric gcn_norm defaults."""
    src, dst = edge_index[0], edge_index[1]
    A = jnp.zeros((num_nodes, num_nodes), jnp.float32)
    A = A.at[dst, src].add(1.0)                      # message src -> dst
    A = A + jnp.eye(num_nodes, dtype=jnp.float32)    # self loops
    deg = jnp.sum(A, axis=1)
    dinv = lax.rsqrt(jnp.maximum(deg, 1e-12))
    return A * dinv[:, None] * dinv[None, :]


def _pad_to(arr, shape):
    return jnp.pad(arr, [(0, t - s) for s, t in zip(arr.shape, shape)])


def prepare_padded_params(params, num_graphs, num_layers, input_dim, h_dim,
                          num_classes):
    """Zero-pad / stack / cast all weights ONCE, outside the hot path."""
    dp = _round_up(input_dim, LANE)
    hp = _round_up(h_dim, LANE)
    cp = _round_up(num_classes, LANE)
    gs = params["graphs"]

    # Classifier weight: rows are grouped contiguously per graph in concat order.
    assert params["cls_w"].shape == (h_dim * num_graphs, num_classes)
    wcls = jnp.zeros((num_graphs * hp, cp), jnp.float32)
    for g in range(num_graphs):
        wcls = wcls.at[g * hp:g * hp + h_dim, :num_classes].set(
            params["cls_w"][g * h_dim:(g + 1) * h_dim])

    padded = {
        "wred": jnp.stack([_pad_to(g["wred"], (dp, hp)) for g in gs]
                          ).astype(jnp.bfloat16),
        "bred": jnp.stack([_pad_to(g["bred"], (1, hp)) for g in gs]),
        "W": jnp.stack([_pad_to(g["W"], (num_layers, hp, hp)) for g in gs]
                       ).astype(jnp.bfloat16),
        "b": jnp.stack([_pad_to(g["b"], (num_layers, 1, hp)) for g in gs]),
        # gamma/beta pad lanes are zero -> normalized pad lanes stay zero.
        "gamma": jnp.stack([_pad_to(g["gamma"], (num_layers, 1, hp)) for g in gs]),
        "beta": jnp.stack([_pad_to(g["beta"], (num_layers, 1, hp)) for g in gs]),
        "wcls": wcls.astype(jnp.bfloat16),
        "bcls": _pad_to(params["cls_b"], (1, cp)),
    }
    return padded


def prepare_graph_inputs(graph_xs, graph_edge_indices, num_nodes, input_dim):
    """Normalized adjacencies + lane/sublane-dense padded node features, built
    ONCE (hoisted out of the jitted forward)."""
    npad = _round_up(num_nodes, LANE)   # lane-dense node dim for A
    dp = _round_up(input_dim, LANE)
    a_list, x_list = [], []
    for xg, ei in zip(graph_xs, graph_edge_indices):
        a = gcn_norm_dense(ei, num_nodes)
        a_list.append(_pad_to(a, (npad, npad)))
        x_list.append(_pad_to(xg, (npad, dp)))
    a = jnp.stack(a_list).astype(jnp.float32)      # (G, NP, NP) -- keep f32
    x = jnp.stack(x_list).astype(jnp.bfloat16)     # (G, NP, DP)
    return a, x


# ------------------------------- forward -------------------------------------

@functools.partial(jax.jit, static_argnames=("num_nodes", "h_dim", "num_classes"))
def multi_graph_model_forward(padded, a, x, *, num_nodes, h_dim, num_classes):
    """Full MultiGraphModel forward: one fused pallas_call (single grid step)."""
    G, NP, _ = a.shape
    DP = x.shape[-1]
    HP = padded["wred"].shape[-1]
    CP = padded["wcls"].shape[-1]
    L = padded["W"].shape[1]

    kernel = functools.partial(fused_multigraph_kernel,
                               num_graphs=G, num_layers=L, h_real=h_dim)

    out = pl.pallas_call(
        kernel,
        out_shape=jax.ShapeDtypeStruct((NP, CP), jnp.float32),
        grid=(1,),
        in_specs=[
            pl.BlockSpec((G, NP, NP), lambda i: (0, 0, 0)),          # a
            pl.BlockSpec((G, NP, DP), lambda i: (0, 0, 0)),          # x
            pl.BlockSpec((G, DP, HP), lambda i: (0, 0, 0)),          # wred
            pl.BlockSpec((G, 1, HP), lambda i: (0, 0, 0)),           # bred
            pl.BlockSpec((G, L, HP, HP), lambda i: (0, 0, 0, 0)),    # W
            pl.BlockSpec((G, L, 1, HP), lambda i: (0, 0, 0, 0)),     # b
            pl.BlockSpec((G, L, 1, HP), lambda i: (0, 0, 0, 0)),     # gamma
            pl.BlockSpec((G, L, 1, HP), lambda i: (0, 0, 0, 0)),     # beta
            pl.BlockSpec((G * HP, CP), lambda i: (0, 0)),            # wcls (concat K)
            pl.BlockSpec((1, CP), lambda i: (0, 0)),                 # bcls
        ],
        out_specs=pl.BlockSpec((NP, CP), lambda i: (0, 0)),
        scratch_shapes=[pltpu.VMEM((NP, G * HP), jnp.bfloat16)],
    )(a, x, padded["wred"], padded["bred"], padded["W"], padded["b"],
      padded["gamma"], padded["beta"], padded["wcls"], padded["bcls"])

    return out[:num_nodes, :num_classes]


# ----------------------------- pure-JAX reference ----------------------------

def reference_forward(params, graph_xs, graph_edge_indices):
    feats = []
    for i, (x, ei) in enumerate(zip(graph_xs, graph_edge_indices)):
        a = gcn_norm_dense(ei, x.shape[0])
        p = params["graphs"][i]
        h = x @ p["wred"] + p["bred"]
        for l in range(p["W"].shape[0]):
            c = a @ (h @ p["W"][l]) + p["b"][l]
            mu = jnp.mean(c, axis=-1, keepdims=True)
            var = jnp.mean((c - mu) ** 2, axis=-1, keepdims=True)
            cn = (c - mu) / jnp.sqrt(var + 1e-5) * p["gamma"][l] + p["beta"][l]
            h = h + jnp.maximum(cn, 0.0)
        feats.append(h)
    x_cat = jnp.concatenate(feats, axis=-1)
    return x_cat @ params["cls_w"] + params["cls_b"]


# ---------------------------------- main --------------------------------------

def init_params(key, num_graphs, num_layers, input_dim, h_dim, num_classes):
    params = {"graphs": []}
    for _ in range(num_graphs):
        key, k1, k2, k3, k4 = jax.random.split(key, 5)
        g = {
            "wred": jax.random.normal(k1, (input_dim, h_dim), jnp.float32) * 0.1,
            "bred": jax.random.normal(k2, (1, h_dim), jnp.float32) * 0.01,
            "W": jax.random.normal(k3, (num_layers, h_dim, h_dim), jnp.float32) * 0.1,
            "b": jax.random.normal(k4, (num_layers, 1, h_dim), jnp.float32) * 0.01,
            "gamma": jnp.ones((num_layers, 1, h_dim), jnp.float32),
            "beta": jnp.zeros((num_layers, 1, h_dim), jnp.float32),
        }
        params["graphs"].append(g)
    key, kc1, kc2 = jax.random.split(key, 3)
    params["cls_w"] = jax.random.normal(
        kc1, (h_dim * num_graphs, num_classes), jnp.float32) * 0.1
    params["cls_b"] = jax.random.normal(kc2, (1, num_classes), jnp.float32) * 0.01
    return params


if __name__ == "__main__":
    num_graphs = 2
    num_layers = 2
    input_dim = 16
    h_dim = 32
    num_classes = 8
    N = 16  # nodes per graph

    key = jax.random.PRNGKey(0)
    key, kp = jax.random.split(key)
    params = init_params(kp, num_graphs, num_layers, input_dim, h_dim, num_classes)

    graph_xs, graph_eis = [], []
    for _ in range(num_graphs):
        key, kx = jax.random.split(key)
        graph_xs.append(jax.random.normal(kx, (N, input_dim), jnp.float32))
        # deterministic ring graph (bidirectional edges)
        src = jnp.concatenate([jnp.arange(N), (jnp.arange(N) + 1) % N])
        dst = jnp.concatenate([(jnp.arange(N) + 1) % N, jnp.arange(N)])
        graph_eis.append(jnp.stack([src, dst]).astype(jnp.int32))

    # All padding / normalization / casts done ONCE, outside the forward.
    padded = prepare_padded_params(params, num_graphs, num_layers,
                                   input_dim, h_dim, num_classes)
    a_pad, x_pad = prepare_graph_inputs(graph_xs, graph_eis, N, input_dim)
    a_pad = jax.block_until_ready(a_pad)
    x_pad = jax.block_until_ready(x_pad)

    logits = multi_graph_model_forward(
        padded, a_pad, x_pad,
        num_nodes=N, h_dim=h_dim, num_classes=num_classes)
    logits = jax.block_until_ready(logits)

    ref = reference_forward(params, graph_xs, graph_eis)
    # bf16 MXU weights/activations (f32 accumulation, f32 A) vs. the all-f32
    # reference give ~1-2% deviation; 3e-2 tolerance leaves headroom.
    np.testing.assert_allclose(np.asarray(logits), np.asarray(ref),
                               rtol=3e-2, atol=3e-2)

    assert logits.shape == (N, num_classes)
    print("KERNEL_OK")
</pallas_src>

<mosaic_0001>
module attributes {stable_mosaic.version = 11 : i64} {
  func.func @fused_multigraph_kernel(%arg0: i32, %arg1: memref<2x128x128xf32, #tpu.memory_space<vmem>>, %arg2: memref<2x128x128xbf16, #tpu.memory_space<vmem>>, %arg3: memref<2x128x128xbf16, #tpu.memory_space<vmem>>, %arg4: memref<2x1x128xf32, #tpu.memory_space<vmem>>, %arg5: memref<2x2x128x128xbf16, #tpu.memory_space<vmem>>, %arg6: memref<2x2x1x128xf32, #tpu.memory_space<vmem>>, %arg7: memref<2x2x1x128xf32, #tpu.memory_space<vmem>>, %arg8: memref<2x2x1x128xf32, #tpu.memory_space<vmem>>, %arg9: memref<256x128xbf16, #tpu.memory_space<vmem>>, %arg10: memref<1x128xf32, #tpu.memory_space<vmem>>, %arg11: memref<128x128xf32, #tpu.memory_space<vmem>>, %arg12: memref<128x256xbf16, #tpu.memory_space<vmem>>) attributes {dimension_semantics = [#tpu.dimension_semantics<arbitrary>], iteration_bounds = array<i64: 1>, scalar_prefetch = 0 : i64, scratch_operands = 1 : i64, tpu.core_type = #tpu.core_type<tc>, window_params = [{pipeline_mode = #tpu.pipeline_mode<synchronous>, transform_indices = @transform_0, window_bounds = array<i64: 2, 128, 128>}, {pipeline_mode = #tpu.pipeline_mode<synchronous>, transform_indices = @transform_1, window_bounds = array<i64: 2, 128, 128>}, {pipeline_mode = #tpu.pipeline_mode<synchronous>, transform_indices = @transform_2, window_bounds = array<i64: 2, 128, 128>}, {pipeline_mode = #tpu.pipeline_mode<synchronous>, transform_indices = @transform_3, window_bounds = array<i64: 2, 1, 128>}, {pipeline_mode = #tpu.pipeline_mode<synchronous>, transform_indices = @transform_4, window_bounds = array<i64: 2, 2, 128, 128>}, {pipeline_mode = #tpu.pipeline_mode<synchronous>, transform_indices = @transform_5, window_bounds = array<i64: 2, 2, 1, 128>}, {pipeline_mode = #tpu.pipeline_mode<synchronous>, transform_indices = @transform_6, window_bounds = array<i64: 2, 2, 1, 128>}, {pipeline_mode = #tpu.pipeline_mode<synchronous>, transform_indices = @transform_7, window_bounds = array<i64: 2, 2, 1, 128>}, {pipeline_mode = #tpu.pipeline_mode<synchronous>, transform_indices = @transform_8, window_bounds = array<i64: 256, 128>}, {pipeline_mode = #tpu.pipeline_mode<synchronous>, transform_indices = @transform_9, window_bounds = array<i64: 1, 128>}, {pipeline_mode = #tpu.pipeline_mode<synchronous>, transform_indices = @transform_10, window_bounds = array<i64: 128, 128>}]} {
    %0 = tpu.iota {dimensions = array<i32: 1>} : vector<1x128xi32>
    %c32_i32 = arith.constant 32 : i32
    %1 = vector.broadcast %c32_i32 : i32 to vector<1x128xi32>
    %2 = arith.cmpi slt, %0, %1 : vector<1x128xi32>
    %3 = arith.extui %2 : vector<1x128xi1> to vector<1x128xi32>
    %4 = arith.sitofp %3 : vector<1x128xi32> to vector<1x128xf32>
    %c0 = arith.constant 0 : index
    %c0_0 = arith.constant 0 : index
    %c0_1 = arith.constant 0 : index
    %5 = vector.load %arg2[%c0, %c0_0, %c0_1] : memref<2x128x128xbf16, #tpu.memory_space<vmem>>, vector<1x128x128xbf16>
    %6 = vector.shape_cast %5 : vector<1x128x128xbf16> to vector<128x128xbf16>
    %c0_2 = arith.constant 0 : index
    %c0_3 = arith.constant 0 : index
    %c0_4 = arith.constant 0 : index
    %7 = vector.load %arg3[%c0_2, %c0_3, %c0_4] : memref<2x128x128xbf16, #tpu.memory_space<vmem>>, vector<1x128x128xbf16>
    %8 = vector.shape_cast %7 : vector<1x128x128xbf16> to vector<128x128xbf16>
    %cst = arith.constant dense<0.000000e+00> : vector<128x128xf32>
    %9 = tpu.matmul %6, %8, %cst {dimension_numbers = #tpu.dot_dimension_numbers<[1], [0], [0], [1], [0, 0, 1, 1], [], []>} : vector<128x128xbf16>, vector<128x128xbf16>, vector<128x128xf32> -> vector<128x128xf32>
    %c0_5 = arith.constant 0 : index
    %c0_6 = arith.constant 0 : index
    %c0_7 = arith.constant 0 : index
    %10 = vector.load %arg4[%c0_5, %c0_6, %c0_7] : memref<2x1x128xf32, #tpu.memory_space<vmem>>, vector<1x1x128xf32>
    %11 = vector.shape_cast %10 : vector<1x1x128xf32> to vector<1x128xf32>
    %12 = vector.broadcast %11 : vector<1x128xf32> to vector<128x128xf32>
    %13 = arith.addf %9, %12 : vector<128x128xf32>
    %c1 = arith.constant 1 : index
    %c0_8 = arith.constant 0 : index
    %c0_9 = arith.constant 0 : index
    %14 = vector.load %arg2[%c1, %c0_8, %c0_9] : memref<2x128x128xbf16, #tpu.memory_space<vmem>>, vector<1x128x128xbf16>
    %15 = vector.shape_cast %14 : vector<1x128x128xbf16> to vector<128x128xbf16>
    %c1_10 = arith.constant 1 : index
    %c0_11 = arith.constant 0 : index
    %c0_12 = arith.constant 0 : index
    %16 = vector.load %arg3[%c1_10, %c0_11, %c0_12] : memref<2x128x128xbf16, #tpu.memory_space<vmem>>, vector<1x128x128xbf16>
    %17 = vector.shape_cast %16 : vector<1x128x128xbf16> to vector<128x128xbf16>
    %cst_13 = arith.constant dense<0.000000e+00> : vector<128x128xf32>
    %18 = tpu.matmul %15, %17, %cst_13 {dimension_numbers = #tpu.dot_dimension_numbers<[1], [0], [0], [1], [0, 0, 1, 1], [], []>} : vector<128x128xbf16>, vector<128x128xbf16>, vector<128x128xf32> -> vector<128x128xf32>
    %c1_14 = arith.constant 1 : index
    %c0_15 = arith.constant 0 : index
    %c0_16 = arith.constant 0 : index
    %19 = vector.load %arg4[%c1_14, %c0_15, %c0_16] : memref<2x1x128xf32, #tpu.memory_space<vmem>>, vector<1x1x128xf32>
    %20 = vector.shape_cast %19 : vector<1x1x128xf32> to vector<1x128xf32>
    %21 = vector.broadcast %20 : vector<1x128xf32> to vector<128x128xf32>
    %22 = arith.addf %18, %21 : vector<128x128xf32>
    %c0_17 = arith.constant 0 : index
    %c0_18 = arith.constant 0 : index
    %c0_19 = arith.constant 0 : index
    %c0_20 = arith.constant 0 : index
    %23 = vector.load %arg5[%c0_17, %c0_18, %c0_19, %c0_20] : memref<2x2x128x128xbf16, #tpu.memory_space<vmem>>, vector<1x1x128x128xbf16>
    %24 = vector.shape_cast %23 : vector<1x1x128x128xbf16> to vector<128x128xbf16>
    %c0_21 = arith.constant 0 : index
    %c0_22 = arith.constant 0 : index
    %c0_23 = arith.constant 0 : index
    %c0_24 = arith.constant 0 : index
    %25 = vector.load %arg6[%c0_21, %c0_22, %c0_23, %c0_24] : memref<2x2x1x128xf32, #tpu.memory_space<vmem>>, vector<1x1x1x128xf32>
    %26 = vector.shape_cast %25 : vector<1x1x1x128xf32> to vector<1x128xf32>
    %c0_25 = arith.constant 0 : index
    %c0_26 = arith.constant 0 : index
    %c0_27 = arith.constant 0 : index
    %c0_28 = arith.constant 0 : index
    %27 = vector.load %arg7[%c0_25, %c0_26, %c0_27, %c0_28] : memref<2x2x1x128xf32, #tpu.memory_space<vmem>>, vector<1x1x1x128xf32>
    %28 = vector.shape_cast %27 : vector<1x1x1x128xf32> to vector<1x128xf32>
    %c0_29 = arith.constant 0 : index
    %c0_30 = arith.constant 0 : index
    %c0_31 = arith.constant 0 : index
    %c0_32 = arith.constant 0 : index
    %29 = vector.load %arg8[%c0_29, %c0_30, %c0_31, %c0_32] : memref<2x2x1x128xf32, #tpu.memory_space<vmem>>, vector<1x1x1x128xf32>
    %30 = vector.shape_cast %29 : vector<1x1x1x128xf32> to vector<1x128xf32>
    %31 = arith.truncf %13 : vector<128x128xf32> to vector<128x128xbf16>
    %cst_33 = arith.constant dense<0.000000e+00> : vector<128x128xf32>
    %32 = tpu.matmul %31, %24, %cst_33 {dimension_numbers = #tpu.dot_dimension_numbers<[1], [0], [0], [1], [0, 0, 1, 1], [], []>} : vector<128x128xbf16>, vector<128x128xbf16>, vector<128x128xf32> -> vector<128x128xf32>
    %c0_34 = arith.constant 0 : index
    %c0_35 = arith.constant 0 : index
    %c0_36 = arith.constant 0 : index
    %33 = vector.load %arg1[%c0_34, %c0_35, %c0_36] : memref<2x128x128xf32, #tpu.memory_space<vmem>>, vector<1x128x128xf32>
    %34 = vector.shape_cast %33 : vector<1x128x128xf32> to vector<128x128xf32>
    %cst_37 = arith.constant dense<0.000000e+00> : vector<128x128xf32>
    %35 = tpu.matmul %34, %32, %cst_37 {dimension_numbers = #tpu.dot_dimension_numbers<[1], [0], [0], [1], [0, 0, 1, 1], [], []>} : vector<128x128xf32>, vector<128x128xf32>, vector<128x128xf32> -> vector<128x128xf32>
    %36 = vector.broadcast %26 : vector<1x128xf32> to vector<128x128xf32>
    %37 = arith.addf %35, %36 : vector<128x128xf32>
    %38 = vector.broadcast %4 : vector<1x128xf32> to vector<128x128xf32>
    %39 = arith.mulf %37, %38 : vector<128x128xf32>
    %cst_38 = arith.constant dense<0.000000e+00> : vector<128xf32>
    %40 = vector.multi_reduction <add>, %39, %cst_38 [1] : vector<128x128xf32> to vector<128xf32>
    %41 = vector.shape_cast %40 : vector<128xf32> to vector<128x1xf32>
    %42 = arith.mulf %39, %39 : vector<128x128xf32>
    %cst_39 = arith.constant dense<0.000000e+00> : vector<128xf32>
    %43 = vector.multi_reduction <add>, %42, %cst_39 [1] : vector<128x128xf32> to vector<128xf32>
    %44 = vector.shape_cast %43 : vector<128xf32> to vector<128x1xf32>
    %cst_40 = arith.constant 3.125000e-02 : f32
    %45 = vector.broadcast %cst_40 : f32 to vector<128x1xf32>
    %46 = arith.mulf %41, %45 : vector<128x1xf32>
    %cst_41 = arith.constant 3.125000e-02 : f32
    %47 = vector.broadcast %cst_41 : f32 to vector<128x1xf32>
    %48 = arith.mulf %44, %47 : vector<128x1xf32>
    %49 = arith.mulf %46, %46 : vector<128x1xf32>
    %50 = arith.subf %48, %49 : vector<128x1xf32>
    %cst_42 = arith.constant 0.000000e+00 : f32
    %51 = vector.broadcast %cst_42 : f32 to vector<128x1xf32>
    %52 = arith.maximumf %50, %51 : vector<128x1xf32>
    %53 = vector.broadcast %46 : vector<128x1xf32> to vector<128x128xf32>
    %54 = arith.subf %39, %53 : vector<128x128xf32>
    %cst_43 = arith.constant 9.99999974E-6 : f32
    %55 = vector.broadcast %cst_43 : f32 to vector<128x1xf32>
    %56 = arith.addf %52, %55 : vector<128x1xf32>
    %57 = math.rsqrt %56 : vector<128x1xf32>
    %58 = vector.broadcast %57 : vector<128x1xf32> to vector<128x128xf32>
    %59 = arith.mulf %54, %58 : vector<128x128xf32>
    %60 = vector.broadcast %28 : vector<1x128xf32> to vector<128x128xf32>
    %61 = arith.mulf %59, %60 : vector<128x128xf32>
    %62 = vector.broadcast %30 : vector<1x128xf32> to vector<128x128xf32>
    %63 = arith.addf %61, %62 : vector<128x128xf32>
    %cst_44 = arith.constant 0.000000e+00 : f32
    %64 = vector.broadcast %cst_44 : f32 to vector<128x128xf32>
    %65 = arith.maximumf %63, %64 : vector<128x128xf32>
    %66 = arith.addf %13, %65 : vector<128x128xf32>
    %c1_45 = arith.constant 1 : index
    %c0_46 = arith.constant 0 : index
    %c0_47 = arith.constant 0 : index
    %c0_48 = arith.constant 0 : index
    %67 = vector.load %arg5[%c1_45, %c0_46, %c0_47, %c0_48] : memref<2x2x128x128xbf16, #tpu.memory_space<vmem>>, vector<1x1x128x128xbf16>
    %68 = vector.shape_cast %67 : vector<1x1x128x128xbf16> to vector<128x128xbf16>
    %c1_49 = arith.constant 1 : index
    %c0_50 = arith.constant 0 : index
    %c0_51 = arith.constant 0 : index
    %c0_52 = arith.constant 0 : index
    %69 = vector.load %arg6[%c1_49, %c0_50, %c0_51, %c0_52] : memref<2x2x1x128xf32, #tpu.memory_space<vmem>>, vector<1x1x1x128xf32>
    %70 = vector.shape_cast %69 : vector<1x1x1x128xf32> to vector<1x128xf32>
    %c1_53 = arith.constant 1 : index
    %c0_54 = arith.constant 0 : index
    %c0_55 = arith.constant 0 : index
    %c0_56 = arith.constant 0 : index
    %71 = vector.load %arg7[%c1_53, %c0_54, %c0_55, %c0_56] : memref<2x2x1x128xf32, #tpu.memory_space<vmem>>, vector<1x1x1x128xf32>
    %72 = vector.shape_cast %71 : vector<1x1x1x128xf32> to vector<1x128xf32>
    %c1_57 = arith.constant 1 : index
    %c0_58 = arith.constant 0 : index
    %c0_59 = arith.constant 0 : index
    %c0_60 = arith.constant 0 : index
    %73 = vector.load %arg8[%c1_57, %c0_58, %c0_59, %c0_60] : memref<2x2x1x128xf32, #tpu.memory_space<vmem>>, vector<1x1x1x128xf32>
    %74 = vector.shape_cast %73 : vector<1x1x1x128xf32> to vector<1x128xf32>
    %75 = arith.truncf %22 : vector<128x128xf32> to vector<128x128xbf16>
    %cst_61 = arith.constant dense<0.000000e+00> : vector<128x128xf32>
    %76 = tpu.matmul %75, %68, %cst_61 {dimension_numbers = #tpu.dot_dimension_numbers<[1], [0], [0], [1], [0, 0, 1, 1], [], []>} : vector<128x128xbf16>, vector<128x128xbf16>, vector<128x128xf32> -> vector<128x128xf32>
    %c1_62 = arith.constant 1 : index
    %c0_63 = arith.constant 0 : index
    %c0_64 = arith.constant 0 : index
    %77 = vector.load %arg1[%c1_62, %c0_63, %c0_64] : memref<2x128x128xf32, #tpu.memory_space<vmem>>, vector<1x128x128xf32>
    %78 = vector.shape_cast %77 : vector<1x128x128xf32> to vector<128x128xf32>
    %cst_65 = arith.constant dense<0.000000e+00> : vector<128x128xf32>
    %79 = tpu.matmul %78, %76, %cst_65 {dimension_numbers = #tpu.dot_dimension_numbers<[1], [0], [0], [1], [0, 0, 1, 1], [], []>} : vector<128x128xf32>, vector<128x128xf32>, vector<128x128xf32> -> vector<128x128xf32>
    %80 = vector.broadcast %70 : vector<1x128xf32> to vector<128x128xf32>
    %81 = arith.addf %79, %80 : vector<128x128xf32>
    %82 = vector.broadcast %4 : vector<1x128xf32> to vector<128x128xf32>
    %83 = arith.mulf %81, %82 : vector<128x128xf32>
    %cst_66 = arith.constant dense<0.000000e+00> : vector<128xf32>
    %84 = vector.multi_reduction <add>, %83, %cst_66 [1] : vector<128x128xf32> to vector<128xf32>
    %85 = vector.shape_cast %84 : vector<128xf32> to vector<128x1xf32>
    %86 = arith.mulf %83, %83 : vector<128x128xf32>
    %cst_67 = arith.constant dense<0.000000e+00> : vector<128xf32>
    %87 = vector.multi_reduction <add>, %86, %cst_67 [1] : vector<128x128xf32> to vector<128xf32>
    %88 = vector.shape_cast %87 : vector<128xf32> to vector<128x1xf32>
    %cst_68 = arith.constant 3.125000e-02 : f32
    %89 = vector.broadcast %cst_68 : f32 to vector<128x1xf32>
    %90 = arith.mulf %85, %89 : vector<128x1xf32>
    %cst_69 = arith.constant 3.125000e-02 : f32
    %91 = vector.broadcast %cst_69 : f32 to vector<128x1xf32>
    %92 = arith.mulf %88, %91 : vector<128x1xf32>
    %93 = arith.mulf %90, %90 : vector<128x1xf32>
    %94 = arith.subf %92, %93 : vector<128x1xf32>
    %cst_70 = arith.constant 0.000000e+00 : f32
    %95 = vector.broadcast %cst_70 : f32 to vector<128x1xf32>
    %96 = arith.maximumf %94, %95 : vector<128x1xf32>
    %97 = vector.broadcast %90 : vector<128x1xf32> to vector<128x128xf32>
    %98 = arith.subf %83, %97 : vector<128x128xf32>
    %cst_71 = arith.constant 9.99999974E-6 : f32
    %99 = vector.broadcast %cst_71 : f32 to vector<128x1xf32>
    %100 = arith.addf %96, %99 : vector<128x1xf32>
    %101 = math.rsqrt %100 : vector<128x1xf32>
    %102 = vector.broadcast %101 : vector<128x1xf32> to vector<128x128xf32>
    %103 = arith.mulf %98, %102 : vector<128x128xf32>
    %104 = vector.broadcast %72 : vector<1x128xf32> to vector<128x128xf32>
    %105 = arith.mulf %103, %104 : vector<128x128xf32>
    %106 = vector.broadcast %74 : vector<1x128xf32> to vector<128x128xf32>
    %107 = arith.addf %105, %106 : vector<128x128xf32>
    %cst_72 = arith.constant 0.000000e+00 : f32
    %108 = vector.broadcast %cst_72 : f32 to vector<128x128xf32>
    %109 = arith.maximumf %107, %108 : vector<128x128xf32>
    %110 = arith.addf %22, %109 : vector<128x128xf32>
    %c0_73 = arith.constant 0 : index
    %c1_74 = arith.constant 1 : index
    %c0_75 = arith.constant 0 : index
    %c0_76 = arith.constant 0 : index
    %111 = vector.load %arg5[%c0_73, %c1_74, %c0_75, %c0_76] : memref<2x2x128x128xbf16, #tpu.memory_space<vmem>>, vector<1x1x128x128xbf16>
    %112 = vector.shape_cast %111 : vector<1x1x128x128xbf16> to vector<128x128xbf16>
    %c0_77 = arith.constant 0 : index
    %c1_78 = arith.constant 1 : index
    %c0_79 = arith.constant 0 : index
    %c0_80 = arith.constant 0 : index
    %113 = vector.load %arg6[%c0_77, %c1_78, %c0_79, %c0_80] : memref<2x2x1x128xf32, #tpu.memory_space<vmem>>, vector<1x1x1x128xf32>
    %114 = vector.shape_cast %113 : vector<1x1x1x128xf32> to vector<1x128xf32>
    %c0_81 = arith.constant 0 : index
    %c1_82 = arith.constant 1 : index
    %c0_83 = arith.constant 0 : index
    %c0_84 = arith.constant 0 : index
    %115 = vector.load %arg7[%c0_81, %c1_82, %c0_83, %c0_84] : memref<2x2x1x128xf32, #tpu.memory_space<vmem>>, vector<1x1x1x128xf32>
    %116 = vector.shape_cast %115 : vector<1x1x1x128xf32> to vector<1x128xf32>
    %c0_85 = arith.constant 0 : index
    %c1_86 = arith.constant 1 : index
    %c0_87 = arith.constant 0 : index
    %c0_88 = arith.constant 0 : index
    %117 = vector.load %arg8[%c0_85, %c1_86, %c0_87, %c0_88] : memref<2x2x1x128xf32, #tpu.memory_space<vmem>>, vector<1x1x1x128xf32>
    %118 = vector.shape_cast %117 : vector<1x1x1x128xf32> to vector<1x128xf32>
    %119 = arith.truncf %66 : vector<128x128xf32> to vector<128x128xbf16>
    %cst_89 = arith.constant dense<0.000000e+00> : vector<128x128xf32>
    %120 = tpu.matmul %119, %112, %cst_89 {dimension_numbers = #tpu.dot_dimension_numbers<[1], [0], [0], [1], [0, 0, 1, 1], [], []>} : vector<128x128xbf16>, vector<128x128xbf16>, vector<128x128xf32> -> vector<128x128xf32>
    %c0_90 = arith.constant 0 : index
    %c0_91 = arith.constant 0 : index
    %c0_92 = arith.constant 0 : index
    %121 = vector.load %arg1[%c0_90, %c0_91, %c0_92] : memref<2x128x128xf32, #tpu.memory_space<vmem>>, vector<1x128x128xf32>
    %122 = vector.shape_cast %121 : vector<1x128x128xf32> to vector<128x128xf32>
    %cst_93 = arith.constant dense<0.000000e+00> : vector<128x128xf32>
    %123 = tpu.matmul %122, %120, %cst_93 {dimension_numbers = #tpu.dot_dimension_numbers<[1], [0], [0], [1], [0, 0, 1, 1], [], []>} : vector<128x128xf32>, vector<128x128xf32>, vector<128x128xf32> -> vector<128x128xf32>
    %124 = vector.broadcast %114 : vector<1x128xf32> to vector<128x128xf32>
    %125 = arith.addf %123, %124 : vector<128x128xf32>
    %126 = vector.broadcast %4 : vector<1x128xf32> to vector<128x128xf32>
    %127 = arith.mulf %125, %126 : vector<128x128xf32>
    %cst_94 = arith.constant dense<0.000000e+00> : vector<128xf32>
    %128 = vector.multi_reduction <add>, %127, %cst_94 [1] : vector<128x128xf32> to vector<128xf32>
    %129 = vector.shape_cast %128 : vector<128xf32> to vector<128x1xf32>
    %130 = arith.mulf %127, %127 : vector<128x128xf32>
    %cst_95 = arith.constant dense<0.000000e+00> : vector<128xf32>
    %131 = vector.multi_reduction <add>, %130, %cst_95 [1] : vector<128x128xf32> to vector<128xf32>
    %132 = vector.shape_cast %131 : vector<128xf32> to vector<128x1xf32>
    %cst_96 = arith.constant 3.125000e-02 : f32
    %133 = vector.broadcast %cst_96 : f32 to vector<128x1xf32>
    %134 = arith.mulf %129, %133 : vector<128x1xf32>
    %cst_97 = arith.constant 3.125000e-02 : f32
    %135 = vector.broadcast %cst_97 : f32 to vector<128x1xf32>
    %136 = arith.mulf %132, %135 : vector<128x1xf32>
    %137 = arith.mulf %134, %134 : vector<128x1xf32>
    %138 = arith.subf %136, %137 : vector<128x1xf32>
    %cst_98 = arith.constant 0.000000e+00 : f32
    %139 = vector.broadcast %cst_98 : f32 to vector<128x1xf32>
    %140 = arith.maximumf %138, %139 : vector<128x1xf32>
    %141 = vector.broadcast %134 : vector<128x1xf32> to vector<128x128xf32>
    %142 = arith.subf %127, %141 : vector<128x128xf32>
    %cst_99 = arith.constant 9.99999974E-6 : f32
    %143 = vector.broadcast %cst_99 : f32 to vector<128x1xf32>
    %144 = arith.addf %140, %143 : vector<128x1xf32>
    %145 = math.rsqrt %144 : vector<128x1xf32>
    %146 = vector.broadcast %145 : vector<128x1xf32> to vector<128x128xf32>
    %147 = arith.mulf %142, %146 : vector<128x128xf32>
    %148 = vector.broadcast %116 : vector<1x128xf32> to vector<128x128xf32>
    %149 = arith.mulf %147, %148 : vector<128x128xf32>
    %150 = vector.broadcast %118 : vector<1x128xf32> to vector<128x128xf32>
    %151 = arith.addf %149, %150 : vector<128x128xf32>
    %cst_100 = arith.constant 0.000000e+00 : f32
    %152 = vector.broadcast %cst_100 : f32 to vector<128x128xf32>
    %153 = arith.maximumf %151, %152 : vector<128x128xf32>
    %154 = arith.addf %66, %153 : vector<128x128xf32>
    %c1_101 = arith.constant 1 : index
    %c1_102 = arith.constant 1 : index
    %c0_103 = arith.constant 0 : index
    %c0_104 = arith.constant 0 : index
    %155 = vector.load %arg5[%c1_101, %c1_102, %c0_103, %c0_104] : memref<2x2x128x128xbf16, #tpu.memory_space<vmem>>, vector<1x1x128x128xbf16>
    %156 = vector.shape_cast %155 : vector<1x1x128x128xbf16> to vector<128x128xbf16>
    %c1_105 = arith.constant 1 : index
    %c1_106 = arith.constant 1 : index
    %c0_107 = arith.constant 0 : index
    %c0_108 = arith.constant 0 : index
    %157 = vector.load %arg6[%c1_105, %c1_106, %c0_107, %c0_108] : memref<2x2x1x128xf32, #tpu.memory_space<vmem>>, vector<1x1x1x128xf32>
    %158 = vector.shape_cast %157 : vector<1x1x1x128xf32> to vector<1x128xf32>
    %c1_109 = arith.constant 1 : index
    %c1_110 = arith.constant 1 : index
    %c0_111 = arith.constant 0 : index
    %c0_112 = arith.constant 0 : index
    %159 = vector.load %arg7[%c1_109, %c1_110, %c0_111, %c0_112] : memref<2x2x1x128xf32, #tpu.memory_space<vmem>>, vector<1x1x1x128xf32>
    %160 = vector.shape_cast %159 : vector<1x1x1x128xf32> to vector<1x128xf32>
    %c1_113 = arith.constant 1 : index
    %c1_114 = arith.constant 1 : index
    %c0_115 = arith.constant 0 : index
    %c0_116 = arith.constant 0 : index
    %161 = vector.load %arg8[%c1_113, %c1_114, %c0_115, %c0_116] : memref<2x2x1x128xf32, #tpu.memory_space<vmem>>, vector<1x1x1x128xf32>
    %162 = vector.shape_cast %161 : vector<1x1x1x128xf32> to vector<1x128xf32>
    %163 = arith.truncf %110 : vector<128x128xf32> to vector<128x128xbf16>
    %cst_117 = arith.constant dense<0.000000e+00> : vector<128x128xf32>
    %164 = tpu.matmul %163, %156, %cst_117 {dimension_numbers = #tpu.dot_dimension_numbers<[1], [0], [0], [1], [0, 0, 1, 1], [], []>} : vector<128x128xbf16>, vector<128x128xbf16>, vector<128x128xf32> -> vector<128x128xf32>
    %c1_118 = arith.constant 1 : index
    %c0_119 = arith.constant 0 : index
    %c0_120 = arith.constant 0 : index
    %165 = vector.load %arg1[%c1_118, %c0_119, %c0_120] : memref<2x128x128xf32, #tpu.memory_space<vmem>>, vector<1x128x128xf32>
    %166 = vector.shape_cast %165 : vector<1x128x128xf32> to vector<128x128xf32>
    %cst_121 = arith.constant dense<0.000000e+00> : vector<128x128xf32>
    %167 = tpu.matmul %166, %164, %cst_121 {dimension_numbers = #tpu.dot_dimension_numbers<[1], [0], [0], [1], [0, 0, 1, 1], [], []>} : vector<128x128xf32>, vector<128x128xf32>, vector<128x128xf32> -> vector<128x128xf32>
    %168 = vector.broadcast %158 : vector<1x128xf32> to vector<128x128xf32>
    %169 = arith.addf %167, %168 : vector<128x128xf32>
    %170 = vector.broadcast %4 : vector<1x128xf32> to vector<128x128xf32>
    %171 = arith.mulf %169, %170 : vector<128x128xf32>
    %cst_122 = arith.constant dense<0.000000e+00> : vector<128xf32>
    %172 = vector.multi_reduction <add>, %171, %cst_122 [1] : vector<128x128xf32> to vector<128xf32>
    %173 = vector.shape_cast %172 : vector<128xf32> to vector<128x1xf32>
    %174 = arith.mulf %171, %171 : vector<128x128xf32>
    %cst_123 = arith.constant dense<0.000000e+00> : vector<128xf32>
    %175 = vector.multi_reduction <add>, %174, %cst_123 [1] : vector<128x128xf32> to vector<128xf32>
    %176 = vector.shape_cast %175 : vector<128xf32> to vector<128x1xf32>
    %cst_124 = arith.constant 3.125000e-02 : f32
    %177 = vector.broadcast %cst_124 : f32 to vector<128x1xf32>
    %178 = arith.mulf %173, %177 : vector<128x1xf32>
    %cst_125 = arith.constant 3.125000e-02 : f32
    %179 = vector.broadcast %cst_125 : f32 to vector<128x1xf32>
    %180 = arith.mulf %176, %179 : vector<128x1xf32>
    %181 = arith.mulf %178, %178 : vector<128x1xf32>
    %182 = arith.subf %180, %181 : vector<128x1xf32>
    %cst_126 = arith.constant 0.000000e+00 : f32
    %183 = vector.broadcast %cst_126 : f32 to vector<128x1xf32>
    %184 = arith.maximumf %182, %183 : vector<128x1xf32>
    %185 = vector.broadcast %178 : vector<128x1xf32> to vector<128x128xf32>
    %186 = arith.subf %171, %185 : vector<128x128xf32>
    %cst_127 = arith.constant 9.99999974E-6 : f32
    %187 = vector.broadcast %cst_127 : f32 to vector<128x1xf32>
    %188 = arith.addf %184, %187 : vector<128x1xf32>
    %189 = math.rsqrt %188 : vector<128x1xf32>
    %190 = vector.broadcast %189 : vector<128x1xf32> to vector<128x128xf32>
    %191 = arith.mulf %186, %190 : vector<128x128xf32>
    %192 = vector.broadcast %160 : vector<1x128xf32> to vector<128x128xf32>
    %193 = arith.mulf %191, %192 : vector<128x128xf32>
    %194 = vector.broadcast %162 : vector<1x128xf32> to vector<128x128xf32>
    %195 = arith.addf %193, %194 : vector<128x128xf32>
    %cst_128 = arith.constant 0.000000e+00 : f32
    %196 = vector.broadcast %cst_128 : f32 to vector<128x128xf32>
    %197 = arith.maximumf %195, %196 : vector<128x128xf32>
    %198 = arith.addf %110, %197 : vector<128x128xf32>
    %199 = arith.truncf %154 : vector<128x128xf32> to vector<128x128xbf16>
    %c0_129 = arith.constant 0 : index
    %c0_130 = arith.constant 0 : index
    %200 = vector.load %arg12[%c0_129, %c0_130] : memref<128x256xbf16, #tpu.memory_space<vmem>>, vector<128x128xbf16>
    tpu.vector_store %arg12[%c0_129, %c0_130], %199 {strides = array<i32>} : memref<128x256xbf16, #tpu.memory_space<vmem>>, vector<128x128xbf16>,
    %201 = arith.truncf %198 : vector<128x128xf32> to vector<128x128xbf16>
    %c0_131 = arith.constant 0 : index
    %c128 = arith.constant 128 : index
    %202 = vector.load %arg12[%c0_131, %c128] : memref<128x256xbf16, #tpu.memory_space<vmem>>, vector<128x128xbf16>
    tpu.vector_store %arg12[%c0_131, %c128], %201 {strides = array<i32>} : memref<128x256xbf16, #tpu.memory_space<vmem>>, vector<128x128xbf16>,
    %c0_132 = arith.constant 0 : index
    %c0_133 = arith.constant 0 : index
    %203 = vector.load %arg12[%c0_132, %c0_133] : memref<128x256xbf16, #tpu.memory_space<vmem>>, vector<128x256xbf16>
    %c0_134 = arith.constant 0 : index
    %c0_135 = arith.constant 0 : index
    %204 = vector.load %arg9[%c0_134, %c0_135] : memref<256x128xbf16, #tpu.memory_space<vmem>>, vector<256x128xbf16>
    %cst_136 = arith.constant dense<0.000000e+00> : vector<128x128xf32>
    %205 = tpu.matmul %203, %204, %cst_136 {dimension_numbers = #tpu.dot_dimension_numbers<[1], [0], [0], [1], [0, 0, 1, 1], [], []>} : vector<128x256xbf16>, vector<256x128xbf16>, vector<128x128xf32> -> vector<128x128xf32>
    %c0_137 = arith.constant 0 : index
    %c0_138 = arith.constant 0 : index
    %206 = vector.load %arg10[%c0_137, %c0_138] : memref<1x128xf32, #tpu.memory_space<vmem>>, vector<1x128xf32>
    %207 = vector.broadcast %206 : vector<1x128xf32> to vector<128x128xf32>
    %208 = arith.addf %205, %207 : vector<128x128xf32>
    %c0_139 = arith.constant 0 : index
    %c0_140 = arith.constant 0 : index
    %209 = vector.load %arg11[%c0_139, %c0_140] : memref<128x128xf32, #tpu.memory_space<vmem>>, vector<128x128xf32>
    tpu.vector_store %arg11[%c0_139, %c0_140], %208 {strides = array<i32>} : memref<128x128xf32, #tpu.memory_space<vmem>>, vector<128x128xf32>,
    return
  }
  func.func @transform_0(%arg0: i32) -> (i32, i32, i32) {
    %c0_i32 = arith.constant 0 : i32
    %c0_i32_0 = arith.constant 0 : i32
    %c0_i32_1 = arith.constant 0 : i32
    %c0_i32_2 = arith.constant 0 : i32
    return %c0_i32, %c0_i32_0, %c0_i32_1 : i32, i32, i32
  }
  func.func @transform_1(%arg0: i32) -> (i32, i32, i32) {
    %c0_i32 = arith.constant 0 : i32
    %c0_i32_0 = arith.constant 0 : i32
    %c0_i32_1 = arith.constant 0 : i32
    %c0_i32_2 = arith.constant 0 : i32
    return %c0_i32, %c0_i32_0, %c0_i32_1 : i32, i32, i32
  }
  func.func @transform_2(%arg0: i32) -> (i32, i32, i32) {
    %c0_i32 = arith.constant 0 : i32
    %c0_i32_0 = arith.constant 0 : i32
    %c0_i32_1 = arith.constant 0 : i32
    %c0_i32_2 = arith.constant 0 : i32
    return %c0_i32, %c0_i32_0, %c0_i32_1 : i32, i32, i32
  }
  func.func @transform_3(%arg0: i32) -> (i32, i32, i32) {
    %c0_i32 = arith.constant 0 : i32
    %c0_i32_0 = arith.constant 0 : i32
    %c0_i32_1 = arith.constant 0 : i32
    %c0_i32_2 = arith.constant 0 : i32
    return %c0_i32, %c0_i32_0, %c0_i32_1 : i32, i32, i32
  }
  func.func @transform_4(%arg0: i32) -> (i32, i32, i32, i32) {
    %c0_i32 = arith.constant 0 : i32
    %c0_i32_0 = arith.constant 0 : i32
    %c0_i32_1 = arith.constant 0 : i32
    %c0_i32_2 = arith.constant 0 : i32
    %c0_i32_3 = arith.constant 0 : i32
    return %c0_i32, %c0_i32_0, %c0_i32_1, %c0_i32_2 : i32, i32, i32, i32
  }
  func.func @transform_5(%arg0: i32) -> (i32, i32, i32, i32) {
    %c0_i32 = arith.constant 0 : i32
    %c0_i32_0 = arith.constant 0 : i32
    %c0_i32_1 = arith.constant 0 : i32
    %c0_i32_2 = arith.constant 0 : i32
    %c0_i32_3 = arith.constant 0 : i32
    return %c0_i32, %c0_i32_0, %c0_i32_1, %c0_i32_2 : i32, i32, i32, i32
  }
  func.func @transform_6(%arg0: i32) -> (i32, i32, i32, i32) {
    %c0_i32 = arith.constant 0 : i32
    %c0_i32_0 = arith.constant 0 : i32
    %c0_i32_1 = arith.constant 0 : i32
    %c0_i32_2 = arith.constant 0 : i32
    %c0_i32_3 = arith.constant 0 : i32
    return %c0_i32, %c0_i32_0, %c0_i32_1, %c0_i32_2 : i32, i32, i32, i32
  }
  func.func @transform_7(%arg0: i32) -> (i32, i32, i32, i32) {
    %c0_i32 = arith.constant 0 : i32
    %c0_i32_0 = arith.constant 0 : i32
    %c0_i32_1 = arith.constant 0 : i32
    %c0_i32_2 = arith.constant 0 : i32
    %c0_i32_3 = arith.constant 0 : i32
    return %c0_i32, %c0_i32_0, %c0_i32_1, %c0_i32_2 : i32, i32, i32, i32
  }
  func.func @transform_8(%arg0: i32) -> (i32, i32) {
    %c0_i32 = arith.constant 0 : i32
    %c0_i32_0 = arith.constant 0 : i32
    %c0_i32_1 = arith.constant 0 : i32
    return %c0_i32, %c0_i32_0 : i32, i32
  }
  func.func @transform_9(%arg0: i32) -> (i32, i32) {
    %c0_i32 = arith.constant 0 : i32
    %c0_i32_0 = arith.constant 0 : i32
    %c0_i32_1 = arith.constant 0 : i32
    return %c0_i32, %c0_i32_0 : i32, i32
  }
  func.func @transform_10(%arg0: i32) -> (i32, i32) {
    %c0_i32 = arith.constant 0 : i32
    %c0_i32_0 = arith.constant 0 : i32
    %c0_i32_1 = arith.constant 0 : i32
    return %c0_i32, %c0_i32_0 : i32, i32
  }
}

</mosaic_0001>

<bundles_post_ra>
// kernel: multi_graph_model_forward.1
= control target key start
LH: loop header
LB: loop body
LE: loop exit
PB: predicated region body
PF: predicated region fallthrough
CT: control target
= control target key end

     0   :  { %15 = vsyncpa [#allocation4], 0  ;;  %s6979_s0 = inlined_call_operand.hbm [shape: f32[2,128,128], index: 0, kind: input, shape index: {}]   ;;  %s6980_s1 = inlined_call_operand.hbm [shape: bf16[2,128,128], index: 1, kind: input, shape index: {}]   ;;  %s6981_s2 = inlined_call_operand.hbm [shape: bf16[2,128,128], index: 2, kind: input, shape index: {}]   ;;  %s6982_s3 = inlined_call_operand.hbm [shape: f32[2,1,128], index: 3, kind: input, shape index: {}]   ;;  %s6983_s4 = inlined_call_operand.hbm [shape: bf16[2,2,128,128], index: 4, kind: input, shape index: {}]   ;;  %s6984_s5 = inlined_call_operand.hbm [shape: f32[2,2,1,128], index: 5, kind: input, shape index: {}]   ;;  %s6985_s6 = inlined_call_operand.vmem [shape: f32[2,2,1,128], index: 6, kind: input, shape index: {}]   ;;  %s6986_s7 = inlined_call_operand.hbm [shape: f32[2,2,1,128], index: 7, kind: input, shape index: {}]   ;;  %s6987_s8 = inlined_call_operand.hbm [shape: bf16[256,128], index: 8, kind: input, shape index: {}]   ;;  %s6988_s9 = inlined_call_operand.hbm [shape: f32[1,128], index: 9, kind: input, shape index: {}]   ;;  %s6989_s10 = inlined_call_operand.vmem [shape: f32[128,128], index: 10, kind: output, shape index: {}]  }
   0x1   :  { %16 = vsyncpa [#allocation6], 0 }
   0x2   :  { %17 = vsyncpa [#allocation9], 0 }
   0x3   :  { %18 = vsyncpa [#allocation12], 0  ;;  %s37_s15 = sshll.u32 %s6980_s1, 4  ;;  %s38_s15 = int_to_ptr.hbm [resolvable:$true] %s37_s15 }
   0x4   :  { %19 = vsyncpa [#allocation15], 0  ;;  %s4496_s16 = smov [#allocation5]   ;;  %s63_s20 = sshll.u32 %s6982_s3, 4  ;;  %s64_s20 = int_to_ptr.hbm [resolvable:$true] %s63_s20 }
   0x5   :  { %s39_s17 = sshll.u32 %s4496_s16, 4  ;;  %s4497_s21 = smov 64   ;;  %s40_s17 = int_to_ptr.vmem [resolvable:$true] %s39_s17 }
   0x6   :  { %s4498_s22 = smov 4   ;;  %s4499_s23 = smov [#allocation8]  }
   0x7   :  { %45 = dma.hbm_to_vmem [thread:$0]  %s38_s15, 2048, %s40_s17, [#allocation6], %s4497_s21, %s4497_s21, %s4498_s22  }
   0x8   :  { %s65_s24 = sshll.u32 %s4499_s23, 4  ;;  %s4500_s1 = smov 16   ;;  %s66_s24 = int_to_ptr.vmem [resolvable:$true] %s65_s24 }
   0x9   :  { %s4501_s25 = smov 1   ;;  %s89_s3 = sshll.u32 %s6984_s5, 4  ;;  %s90_s3 = int_to_ptr.hbm [resolvable:$true] %s89_s3 }
   0xa   :  { %71 = dma.hbm_to_vmem [thread:$0]  %s64_s20, 32, %s66_s24, [#allocation9], %s4500_s1, %s4500_s1, %s4501_s25  }
   0xb   :  { %s4502_s28 = smov [#allocation11]   ;;  %s117_s12 = sshll.u32 %s6987_s8, 4  ;;  %s118_s12 = int_to_ptr.hbm [resolvable:$true] %s117_s12 }
   0xc   :  { %s91_s29 = sshll.u32 %s4502_s28, 4  ;;  %s4503_s13 = smov [#allocation14]   ;;  %s92_s29 = int_to_ptr.vmem [resolvable:$true] %s91_s29 }
   0xd   :  { %97 = dma.hbm_to_vmem [thread:$0]  %s90_s3, 64, %s92_s29, [#allocation12], %s4500_s1, %s4500_s1, %s4501_s25  }
   0xe   :  { %s119_s14 = sshll.u32 %s4503_s13, 4  ;;  %s24_s17 = sshll.u32 %s6979_s0, 4  ;;  %s120_s14 = int_to_ptr.vmem [resolvable:$true] %s119_s14  ;;  %s25_s17 = int_to_ptr.hbm [resolvable:$true] %s24_s17 }
   0xf   :  { %125 = dma.hbm_to_vmem [thread:$0]  %s118_s12, 2048, %s120_s14, [#allocation15], %s4497_s21, %s4497_s21, %s4498_s22  }
  0x10   :  { %s4504_s5 = smov [#allocation3]   ;;  %s50_s20 = sshll.u32 %s6981_s2, 4  ;;  %s51_s20 = int_to_ptr.hbm [resolvable:$true] %s50_s20 }
  0x11   :  { %s26_s18 = sshll.u32 %s4504_s5, 4  ;;  %s4505_s23 = smov 128   ;;  %s27_s18 = int_to_ptr.vmem [resolvable:$true] %s26_s18 }
  0x12   :  { %s4506_s24 = smov 8   ;;  %s4507_s26 = smov [#allocation7]  }
  0x13   :  { %32 = dma.hbm_to_vmem [thread:$0]  %s25_s17, 4096, %s27_s18, [#allocation4], %s4505_s23, %s4505_s23, %s4506_s24  }
  0x14   :  { %s52_s27 = sshll.u32 %s4507_s26, 4  ;;  %s76_s28 = sshll.u32 %s6983_s4, 4  ;;  %s53_s27 = int_to_ptr.vmem [resolvable:$true] %s52_s27  ;;  %s77_s28 = int_to_ptr.hbm [resolvable:$true] %s76_s28 }
  0x15   :  { %58 = dma.hbm_to_vmem [thread:$0]  %s51_s20, 2048, %s53_s27, [#allocation6], %s4497_s21, %s4497_s21, %s4498_s22  }
  0x16   :  { %s104_s2 = sshll.u32 %s6986_s7, 4  ;;  %s4508_s11 = smov [#allocation10]   ;;  %s105_s2 = int_to_ptr.hbm [resolvable:$true] %s104_s2 }
  0x17   :  { %s78_s12 = sshll.u32 %s4508_s11, 4  ;;  %s4509_s13 = smov [#allocation13]   ;;  %s79_s12 = int_to_ptr.vmem [resolvable:$true] %s78_s12 }
  0x18   :  { %84 = dma.hbm_to_vmem [thread:$0]  %s77_s28, 4096, %s79_s12, [#allocation9], %s4497_s21, %s4497_s21, %s4498_s22  }
  0x19   :  { %s106_s4 = sshll.u32 %s4509_s13, 4  ;;  %s131_s16 = sshll.u32 %s6988_s9, 4  ;;  %s107_s4 = int_to_ptr.vmem [resolvable:$true] %s106_s4  ;;  %s132_s16 = int_to_ptr.hbm [resolvable:$true] %s131_s16 }
  0x1a   :  { %112 = dma.hbm_to_vmem [thread:$0]  %s105_s2, 64, %s107_s4, [#allocation12], %s4500_s1, %s4500_s1, %s4501_s25  }
  0x1b   :  { %s4510_s7 = smov [#allocation16]  }
  0x1c   :  { %s133_s17 = sshll.u32 %s4510_s7, 4  ;;  %s134_s17 = int_to_ptr.vmem [resolvable:$true] %s133_s17 }
  0x1d   :  { %136 = dma.hbm_to_vmem [thread:$0]  %s132_s16, 16, %s134_s17, [#allocation15]  }
  0x1e   :  { %4486 = dma.done.wait [#allocation4], 4096  }
  0x1f   :  { %4487 = vsyncadd [#allocation4], 4294963200 }
  0x20   :  { %4488 = dma.done.wait [#allocation6], 4096  }
  0x21   :  { %4489 = vsyncadd [#allocation6], 4294963200 }
  0x22   :  { %4490 = dma.done.wait [#allocation9], 4128  }
  0x23   :  { %4491 = vsyncadd [#allocation9], 4294963168 }
  0x24   :  { %4492 = dma.done.wait [#allocation12], 128  }
  0x25   :  { %4493 = vsyncadd [#allocation12], 4294967168 }
  0x26   :  { %4494 = dma.done.wait [#allocation15], 2064  }
  0x27   :  { %4495 = vsyncadd [#allocation15], 4294965232  ;;  %v3990_v0 = vld [vmem:[#allocation7 + $0x38] sm:$0xff]  ;;  %v3989_v2 = vld [vmem:[#allocation7 + $0x30] sm:$0xff] }
  0x28   :  { %v4006_v1 = vld [vmem:[#allocation7 + $0x78] sm:$0xff]  ;;  %310 = vmatpush.bf16.msra.mxu0 %v3990_v0  ;;  %v4005_v3 = vld [vmem:[#allocation7 + $0x70] sm:$0xff]  ;;  %v3988_v4 = vld [vmem:[#allocation7 + $0x28] sm:$0xff] }
  0x29   :  { %494 = vmatpush.bf16.msra.mxu1 %v4006_v1  ;;  %v4004_v5 = vld [vmem:[#allocation7 + $0x68] sm:$0xff]  ;;  %v3987_v6 = vld [vmem:[#allocation7 + $0x20] sm:$0xff]  ;;  %v3986_v8 = vld [vmem:[#allocation7 + $0x18] sm:$0xff] }
  0x2a   :  { %v4003_v7 = vld [vmem:[#allocation7 + $0x60] sm:$0xff]  ;;  %v4002_v9 = vld [vmem:[#allocation7 + $0x58] sm:$0xff]  ;;  %v3985_v10 = vld [vmem:[#allocation7 + $0x10] sm:$0xff] }
  0x2b   :  { %v4001_v11 = vld [vmem:[#allocation7 + $0x50] sm:$0xff]  ;;  %v3984_v12 = vld [vmem:[#allocation7 + $0x8] sm:$0xff]  ;;  %v3983_v14 = vld [vmem:[#allocation7] sm:$0xff] }
  0x2c   :  { %311 = vmatpush.bf16.msra.mxu0 %v3989_v2  ;;  %v4000_v13 = vld [vmem:[#allocation7 + $0x48] sm:$0xff]  ;;  %v3999_v15 = vld [vmem:[#allocation7 + $0x40] sm:$0xff]  ;;  %v3977_v20 = vld [vmem:[#allocation5 + $0x10] sm:$0xff] }
  0x2d   :  { %495 = vmatpush.bf16.msra.mxu1 %v4005_v3  ;;  %v3975_v16 = vld [vmem:[#allocation5] sm:$0xff]  ;;  %v3976_v18 = vld [vmem:[#allocation5 + $0x8] sm:$0xff]  ;;  %v3993_v21 = vld [vmem:[#allocation5 + $0x50] sm:$0xff] }
  0x2e   :  { %v3991_v17 = vld [vmem:[#allocation5 + $0x40] sm:$0xff]  ;;  %v3992_v19 = vld [vmem:[#allocation5 + $0x48] sm:$0xff]  ;;  %v3978_v22 = vld [vmem:[#allocation5 + $0x18] sm:$0xff] }
  0x2f   :  { %v3994_v23 = vld [vmem:[#allocation5 + $0x58] sm:$0xff]  ;;  %v3979_v24 = vld [vmem:[#allocation5 + $0x20] sm:$0xff]  ;;  %v3980_v30 = vld [vmem:[#allocation5 + $0x28] sm:$0xff] }
  0x30   :  { %312 = vmatpush.bf16.msra.mxu0 %v3988_v4  ;;  %v3995_v25 = vld [vmem:[#allocation5 + $0x60] sm:$0xff]  ;;  %v4013_v28 = vld [vmem:[#allocation10 + $0x30] sm:$0xff]  ;;  %v3996_v31 = vld [vmem:[#allocation5 + $0x68] sm:$0xff] }
  0x31   :  { %496 = vmatpush.bf16.msra.mxu1 %v4004_v5  ;;  %v4014_v26 = vld [vmem:[#allocation10 + $0x38] sm:$0xff]  ;;  %v4021_v29 = vld [vmem:[#allocation10 + $0xb0] sm:$0xff]  ;;  %v4012_v32 = vld [vmem:[#allocation10 + $0x28] sm:$0xff] }
  0x32   :  { %v4022_v27 = vld [vmem:[#allocation10 + $0xb8] sm:$0xff]  ;;  %618 = vmatpush.bf16.msra.mxu2 %v4014_v26  ;;  %v4020_v33 = vld [vmem:[#allocation10 + $0xa8] sm:$0xff]  ;;  %v4011_v34 = vld [vmem:[#allocation10 + $0x20] sm:$0xff] }
  0x33   :  { %v4019_v35 = vld [vmem:[#allocation10 + $0xa0] sm:$0xff]  ;;  %v4010_v36 = vld [vmem:[#allocation10 + $0x18] sm:$0xff]  ;;  %v3981_v38 = vld [vmem:[#allocation5 + $0x30] sm:$0xff] }
  0x34   :  { %313 = vmatpush.bf16.msra.mxu0 %v3987_v6  ;;  %v4018_v37 = vld [vmem:[#allocation10 + $0x98] sm:$0xff]  ;;  %v3997_v39 = vld [vmem:[#allocation5 + $0x70] sm:$0xff]  ;;  %v4007_v44 = vld [vmem:[#allocation10] sm:$0xff] }
  0x35   :  { %497 = vmatpush.bf16.msra.mxu1 %v4003_v7  ;;  %v4009_v40 = vld [vmem:[#allocation10 + $0x10] sm:$0xff]  ;;  %v4008_v42 = vld [vmem:[#allocation10 + $0x8] sm:$0xff]  ;;  %v4015_v45 = vld [vmem:[#allocation10 + $0x80] sm:$0xff] }
  0x36   :  { %619 = vmatpush.bf16.msra.mxu2 %v4013_v28  ;;  %v4017_v41 = vld [vmem:[#allocation10 + $0x90] sm:$0xff]  ;;  %v4016_v43 = vld [vmem:[#allocation10 + $0x88] sm:$0xff]  ;;  %v4615_v50 = vld [vmem:[#allocation8] ss:$0 sm:$0xff] }
  0x37   :  { %v3982_v46 = vld [vmem:[#allocation5 + $0x38] sm:$0xff]  ;;  %v4617_v51 = vld [vmem:[#allocation8 + $0x1] ss:$0 sm:$0xff] }
  0x38   :  { %314 = vmatpush.bf16.msra.mxu0 %v3986_v8  ;;  %v3998_v47 = vld [vmem:[#allocation5 + $0x78] sm:$0xff] }
  0x39   :  { %498 = vmatpush.bf16.msra.mxu1 %v4002_v9 }
  0x3a   :  { %620 = vmatpush.bf16.msra.mxu2 %v4012_v32 }
  0x3c   :  { %315 = vmatpush.bf16.msra.mxu0 %v3985_v10 }
  0x3d   :  { %499 = vmatpush.bf16.msra.mxu1 %v4001_v11 }
  0x3e   :  { %621 = vmatpush.bf16.msra.mxu2 %v4011_v34 }
  0x40   :  { %316 = vmatpush.bf16.msra.mxu0 %v3984_v12 }
  0x41   :  { %500 = vmatpush.bf16.msra.mxu1 %v4000_v13 }
  0x42   :  { %622 = vmatpush.bf16.msra.mxu2 %v4010_v36 }
  0x44   :  { %317 = vmatpush.bf16.msra.mxu0 %v3983_v14 }
  0x45   :  { %501 = vmatpush.bf16.msra.mxu1 %v3999_v15 }
  0x46   :  { %623 = vmatpush.bf16.msra.mxu2 %v4009_v40 }
  0x47   :  { %318 = vmatmul.bf16.vlgmr.msra.gmra.mxu0 %v3975_v16 }
  0x48   :  { %502 = vmatmul.bf16.vlgmr.msra.gmra.mxu1 %v3991_v17  ;;  %1284 = vmatpush.bf16.msrb.mxu0 %v4022_v27 }
  0x4a   :  { %624 = vmatpush.bf16.msra.mxu2 %v4008_v42 }
  0x4c   :  { %1285 = vmatpush.bf16.msrb.mxu0 %v4021_v29 }
  0x4e   :  { %625 = vmatpush.bf16.msra.mxu2 %v4007_v44 }
  0x50   :  { %1286 = vmatpush.bf16.msrb.mxu0 %v4020_v33 }
  0x54   :  { %1287 = vmatpush.bf16.msrb.mxu0 %v4019_v35 }
  0x57   :  { %323 = vmatmul.bf16.gmra.mxu0 %v3976_v18 }
  0x58   :  { %507 = vmatmul.bf16.gmra.mxu1 %v3992_v19  ;;  %1288 = vmatpush.bf16.msrb.mxu0 %v4018_v37 }
  0x5c   :  { %1289 = vmatpush.bf16.msrb.mxu0 %v4017_v41 }
  0x60   :  { %1290 = vmatpush.bf16.msrb.mxu0 %v4016_v43 }
  0x64   :  { %1291 = vmatpush.bf16.msrb.mxu0 %v4015_v45 }
  0x67   :  { %328 = vmatmul.bf16.gmra.mxu0 %v3977_v20 }
  0x68   :  { %512 = vmatmul.bf16.gmra.mxu1 %v3993_v21 }
  0x77   :  { %333 = vmatmul.bf16.gmra.mxu0 %v3978_v22 }
  0x78   :  { %517 = vmatmul.bf16.gmra.mxu1 %v3994_v23 }
  0x87   :  { %338 = vmatmul.bf16.gmra.mxu0 %v3979_v24 }
  0x88   :  { %522 = vmatmul.bf16.gmra.mxu1 %v3995_v25 }
  0x97   :  { %343 = vmatmul.bf16.gmra.mxu0 %v3980_v30 }
  0x98   :  { %527 = vmatmul.bf16.gmra.mxu1 %v3996_v31 }
  0xa7   :  { %348 = vmatmul.bf16.gmra.mxu0 %v3981_v38 }
  0xa8   :  { %532 = vmatmul.bf16.gmra.mxu1 %v3997_v39 }
  0xb7   :  { %353 = vmatmul.bf16.gmra.mxu0 %v3982_v46 }
  0xb8   :  { %537 = vmatmul.bf16.gmra.mxu1 %v3998_v47 }
  0xc4   :  { %v319_v48 = vpop.f32.mrf.mxu0 }
  0xc5   :  { %v503_v49 = vpop.f32.mrf.mxu1  ;;  %v4620_v54 = vadd.f32 %v4615_v50, %v319_v48 }
  0xc6   :  { %v4623_v55 = vadd.f32 %v4617_v51, %v503_v49 }
  0xcc   :  { %v321_v52 = vpop.f32.mrf.mxu0 }
  0xcd   :  { %v505_v53 = vpop.f32.mrf.mxu1  ;;  %v4626_v56 = vadd.f32 %v4615_v50, %v321_v52 }
  0xce   :  { %v4629_v57 = vadd.f32 %v4617_v51, %v505_v53 }
  0xcf   :  { %v562_v59 = vpack.c.bf16 %v4626_v56, %v4620_v54 }
  0xd0   :  { %v1228_v58 = vpack.c.bf16 %v4629_v57, %v4623_v55 }
  0xd1   :  { %626 = vmatmul.bf16.vlgmr.msra.gmra.mxu2 %v562_v59 }
  0xd2   :  { %1292 = vmatmul.bf16.vlgmr.msrb.gmra.mxu0 %v1228_v58 }
  0xd4   :  { %v324_v60 = vpop.f32.mrf.mxu0 }
  0xd5   :  { %v508_v61 = vpop.f32.mrf.mxu1  ;;  %v4636_v0 = vadd.f32 %v4615_v50, %v324_v60 }
  0xd6   :  { %v4639_v1 = vadd.f32 %v4617_v51, %v508_v61 }
  0xdc   :  { %v326_v62 = vpop.f32.mrf.mxu0 }
  0xdd   :  { %v510_v63 = vpop.f32.mrf.mxu1  ;;  %v4642_v2 = vadd.f32 %v4615_v50, %v326_v62 }
  0xde   :  { %v4645_v3 = vadd.f32 %v4617_v51, %v510_v63 }
  0xdf   :  { %v563_v4 = vpack.c.bf16 %v4642_v2, %v4636_v0 }
  0xe0   :  { %v1229_v5 = vpack.c.bf16 %v4645_v3, %v4639_v1 }
  0xe1   :  { %631 = vmatmul.bf16.gmra.mxu2 %v563_v4 }
  0xe2   :  { %1297 = vmatmul.bf16.gmra.mxu0 %v1229_v5 }
  0xe4   :  { %v329_v6 = vpop.f32.mrf.mxu0 }
  0xe5   :  { %v513_v7 = vpop.f32.mrf.mxu1  ;;  %v4652_v10 = vadd.f32 %v4615_v50, %v329_v6 }
  0xe6   :  { %v4655_v11 = vadd.f32 %v4617_v51, %v513_v7 }
  0xe7   :  { %7067 = vst [vmem:[#allocation22_spill] sm:$0xff] %v4652_v10 }
  0xec   :  { %v331_v8 = vpop.f32.mrf.mxu0 }
  0xed   :  { %v515_v9 = vpop.f32.mrf.mxu1  ;;  %v4658_v12 = vadd.f32 %v4615_v50, %v331_v8 }
  0xee   :  { %v4661_v13 = vadd.f32 %v4617_v51, %v515_v9 }
  0xef   :  { %7068 = vst [vmem:[#allocation23_spill] sm:$0xff] %v4658_v12  ;;  %v564_v14 = vpack.c.bf16 %v4658_v12, %v4652_v10 }
  0xf0   :  { %v1230_v15 = vpack.c.bf16 %v4661_v13, %v4655_v11 }
  0xf1   :  { %636 = vmatmul.bf16.gmra.mxu2 %v564_v14 }
  0xf2   :  { %1302 = vmatmul.bf16.gmra.mxu0 %v1230_v15 }
  0xf4   :  { %v334_v16 = vpop.f32.mrf.mxu0 }
  0xf5   :  { %v518_v17 = vpop.f32.mrf.mxu1  ;;  %v4668_v20 = vadd.f32 %v4615_v50, %v334_v16 }
  0xf6   :  { %v4671_v21 = vadd.f32 %v4617_v51, %v518_v17 }
  0xf7   :  { %7069 = vst [vmem:[#allocation24_spill] sm:$0xff] %v4668_v20 }
  0xf8   :  { %7070 = vst [vmem:[#allocation25_spill] sm:$0xff] %v4671_v21 }
  0xfc   :  { %v336_v18 = vpop.f32.mrf.mxu0 }
  0xfd   :  { %v520_v19 = vpop.f32.mrf.mxu1  ;;  %v4674_v22 = vadd.f32 %v4615_v50, %v336_v18 }
  0xfe   :  { %v4677_v23 = vadd.f32 %v4617_v51, %v520_v19 }
  0xff   :  { %7071 = vst [vmem:[#allocation26_spill] sm:$0xff] %v4674_v22  ;;  %v565_v24 = vpack.c.bf16 %v4674_v22, %v4668_v20 }
 0x100   :  { %7072 = vst [vmem:[#allocation27_spill] sm:$0xff] %v4677_v23  ;;  %v1231_v25 = vpack.c.bf16 %v4677_v23, %v4671_v21 }
 0x101   :  { %641 = vmatmul.bf16.gmra.mxu2 %v565_v24 }
 0x102   :  { %1307 = vmatmul.bf16.gmra.mxu0 %v1231_v25 }
 0x104   :  { %v339_v26 = vpop.f32.mrf.mxu0 }
 0x105   :  { %v523_v27 = vpop.f32.mrf.mxu1  ;;  %v4684_v30 = vadd.f32 %v4615_v50, %v339_v26 }
 0x106   :  { %v4687_v31 = vadd.f32 %v4617_v51, %v523_v27 }
 0x107   :  { %7073 = vst [vmem:[#allocation28_spill] sm:$0xff] %v4684_v30 }
 0x108   :  { %7074 = vst [vmem:[#allocation29_spill] sm:$0xff] %v4687_v31 }
 0x10c   :  { %v341_v28 = vpop.f32.mrf.mxu0 }
 0x10d   :  { %v525_v29 = vpop.f32.mrf.mxu1  ;;  %v4690_v32 = vadd.f32 %v4615_v50, %v341_v28 }
 0x10e   :  { %v4693_v33 = vadd.f32 %v4617_v51, %v525_v29 }
 0x10f   :  { %7075 = vst [vmem:[#allocation30_spill] sm:$0xff] %v4690_v32  ;;  %v566_v35 = vpack.c.bf16 %v4690_v32, %v4684_v30 }
 0x110   :  { %7076 = vst [vmem:[#allocation31_spill] sm:$0xff] %v4693_v33  ;;  %v1232_v34 = vpack.c.bf16 %v4693_v33, %v4687_v31 }
 0x111   :  { %646 = vmatmul.bf16.gmra.mxu2 %v566_v35 }
 0x112   :  { %1312 = vmatmul.bf16.gmra.mxu0 %v1232_v34 }
 0x114   :  { %v344_v36 = vpop.f32.mrf.mxu0 }
 0x115   :  { %v528_v37 = vpop.f32.mrf.mxu1  ;;  %v4700_v40 = vadd.f32 %v4615_v50, %v344_v36 }
 0x116   :  { %v4703_v41 = vadd.f32 %v4617_v51, %v528_v37 }
 0x117   :  { %7077 = vst [vmem:[#allocation32_spill] sm:$0xff] %v4700_v40 }
 0x118   :  { %7078 = vst [vmem:[#allocation33_spill] sm:$0xff] %v4703_v41 }
 0x11c   :  { %v346_v38 = vpop.f32.mrf.mxu0 }
 0x11d   :  { %v530_v39 = vpop.f32.mrf.mxu1  ;;  %v4706_v42 = vadd.f32 %v4615_v50, %v346_v38 }
 0x11e   :  { %v4709_v43 = vadd.f32 %v4617_v51, %v530_v39 }
 0x11f   :  { %7079 = vst [vmem:[#allocation34_spill] sm:$0xff] %v4706_v42  ;;  %v567_v45 = vpack.c.bf16 %v4706_v42, %v4700_v40 }
 0x120   :  { %7080 = vst [vmem:[#allocation35_spill] sm:$0xff] %v4709_v43  ;;  %v1233_v44 = vpack.c.bf16 %v4709_v43, %v4703_v41 }
 0x121   :  { %651 = vmatmul.bf16.gmra.mxu2 %v567_v45 }
 0x122   :  { %1317 = vmatmul.bf16.gmra.mxu0 %v1233_v44 }
 0x124   :  { %v349_v46 = vpop.f32.mrf.mxu0 }
 0x125   :  { %v533_v47 = vpop.f32.mrf.mxu1  ;;  %v4716_v52 = vadd.f32 %v4615_v50, %v349_v46 }
 0x126   :  { %v4719_v53 = vadd.f32 %v4617_v51, %v533_v47 }
 0x127   :  { %7081 = vst [vmem:[#allocation36_spill] sm:$0xff] %v4716_v52 }
 0x128   :  { %7082 = vst [vmem:[#allocation37_spill] sm:$0xff] %v4719_v53 }
 0x12c   :  { %v351_v48 = vpop.f32.mrf.mxu0 }
 0x12d   :  { %v535_v49 = vpop.f32.mrf.mxu1  ;;  %v4722_v58 = vadd.f32 %v4615_v50, %v351_v48 }
 0x12e   :  { %v4725_v59 = vadd.f32 %v4617_v51, %v535_v49 }
 0x12f   :  { %7083 = vst [vmem:[#allocation38_spill] sm:$0xff] %v4722_v58  ;;  %v568_v61 = vpack.c.bf16 %v4722_v58, %v4716_v52 }
 0x130   :  { %7084 = vst [vmem:[#allocation39_spill] sm:$0xff] %v4725_v59  ;;  %v1234_v60 = vpack.c.bf16 %v4725_v59, %v4719_v53 }
 0x131   :  { %656 = vmatmul.bf16.gmra.mxu2 %v568_v61 }
 0x132   :  { %1322 = vmatmul.bf16.gmra.mxu0 %v1234_v60 }
 0x134   :  { %v354_v62 = vpop.f32.mrf.mxu0 }
 0x135   :  { %v538_v63 = vpop.f32.mrf.mxu1  ;;  %v4732_v6 = vadd.f32 %v4615_v50, %v354_v62 }
 0x136   :  { %v4735_v7 = vadd.f32 %v4617_v51, %v538_v63 }
 0x137   :  { %7085 = vst [vmem:[#allocation40_spill] sm:$0xff] %v4732_v6 }
 0x138   :  { %7086 = vst [vmem:[#allocation41_spill] sm:$0xff] %v4735_v7 }
 0x13c   :  { %v356_v4 = vpop.f32.mrf.mxu0 }
 0x13d   :  { %v540_v5 = vpop.f32.mrf.mxu1  ;;  %v4738_v8 = vadd.f32 %v4615_v50, %v356_v4 }
 0x13e   :  { %v4741_v9 = vadd.f32 %v4617_v51, %v540_v5 }
 0x13f   :  { %7087 = vst [vmem:[#allocation42_spill] sm:$0xff] %v4738_v8  ;;  %v569_v15 = vpack.c.bf16 %v4738_v8, %v4732_v6  ;;  %v4037_v6 = vld [vmem:[#allocation10 + $0xf0] sm:$0xff] }
 0x140   :  { %7088 = vst [vmem:[#allocation43_spill] sm:$0xff] %v4741_v9  ;;  %v1235_v14 = vpack.c.bf16 %v4741_v9, %v4735_v7  ;;  %v4038_v7 = vld [vmem:[#allocation10 + $0xf8] sm:$0xff] }
 0x141   :  { %661 = vmatmul.bf16.gmra.mxu2 %v569_v15  ;;  %2601 = vmatpush.bf16.msra.mxu0 %v4038_v7 }
 0x142   :  { %1327 = vmatmul.bf16.gmra.mxu0 %v1235_v14 }
 0x145   :  { %2602 = vmatpush.bf16.msra.mxu0 %v4037_v6 }
 0x14f   :  { %v1293_v16 = vpop.f32.mrf.mxu0 }
 0x154   :  { %v4747_v17 = vpop.f32.mrf.mxu2 }
 0x157   :  { %v1295_v18 = vpop.f32.mrf.mxu0 }
 0x15c   :  { %v629_v19 = vpop.f32.mrf.mxu2 }
 0x15f   :  { %v1298_v24 = vpop.f32.mrf.mxu0 }
 0x164   :  { %v632_v25 = vpop.f32.mrf.mxu2 }
 0x167   :  { %v1300_v50 = vpop.f32.mrf.mxu0 }
 0x16c   :  { %v634_v26 = vpop.f32.mrf.mxu2 }
 0x16f   :  { %v1303_v27 = vpop.f32.mrf.mxu0 }
 0x174   :  { %v637_v51 = vpop.f32.mrf.mxu2 }
 0x177   :  { %v1305_v28 = vpop.f32.mrf.mxu0 }
 0x17c   :  { %v639_v29 = vpop.f32.mrf.mxu2 }
 0x17f   :  { %v1308_v34 = vpop.f32.mrf.mxu0 }
 0x184   :  { %v642_v35 = vpop.f32.mrf.mxu2 }
 0x187   :  { %v1310_v36 = vpop.f32.mrf.mxu0 }
 0x18c   :  { %v644_v37 = vpop.f32.mrf.mxu2 }
 0x18f   :  { %v1313_v38 = vpop.f32.mrf.mxu0 }
 0x194   :  { %v647_v39 = vpop.f32.mrf.mxu2 }
 0x197   :  { %v1315_v44 = vpop.f32.mrf.mxu0 }
 0x19c   :  { %v649_v45 = vpop.f32.mrf.mxu2 }
 0x19f   :  { %v1318_v46 = vpop.f32.mrf.mxu0 }
 0x1a4   :  { %v652_v47 = vpop.f32.mrf.mxu2 }
 0x1a7   :  { %v1320_v48 = vpop.f32.mrf.mxu0 }
 0x1ac   :  { %v654_v49 = vpop.f32.mrf.mxu2 }
 0x1af   :  { %v1323_v60 = vpop.f32.mrf.mxu0 }
 0x1b4   :  { %v657_v61 = vpop.f32.mrf.mxu2 }
 0x1b7   :  { %v1325_v62 = vpop.f32.mrf.mxu0 }
 0x1bc   :  { %v659_v63 = vpop.f32.mrf.mxu2 }
 0x1bf   :  { %v1328_v4 = vpop.f32.mrf.mxu0 }
 0x1c4   :  { %v662_v5 = vpop.f32.mrf.mxu2 }
 0x1c7   :  { %v1330_v14 = vpop.f32.mrf.mxu0 }
 0x1c8   :  { %1353 = vmatpush.msrb.mxu1 %v1330_v14 }
 0x1ca   :  { %1354 = vmatpush.msrb.mxu1 %v1328_v4  ;;  %v173_v4 = vlaneseq }
 0x1cc   :  { %1355 = vmatpush.msrb.mxu1 %v1325_v62  ;;  %v664_v15 = vpop.f32.mrf.mxu2  ;;  %v1347_v62 = vld [vmem:[#allocation3 + $0xe8] sm:$0xff]  ;;  %v174_v14 = vand.u32 127, %v173_v4 }
 0x1cd   :  { %686 = vmatpush.msra.mxu3 %v664_v15  ;;  %v4750_v15 = vld [vmem:[#allocation11 + $0x2] ss:$0 sm:$0xff] }
 0x1ce   :  { %1356 = vmatpush.msrb.mxu1 %v1323_v60  ;;  %v1346_v60 = vld [vmem:[#allocation3 + $0xe0] sm:$0xff]  ;;  %vm175_vm0 = vcmp.lt.s32.totalorder %v174_v14, 32 }
 0x1cf   :  { %687 = vmatpush.msra.mxu3 %v662_v5  ;;  %v681_v5 = vld [vmem:[#allocation3 + $0x70] sm:$0xff] }
 0x1d0   :  { %1357 = vmatpush.msrb.mxu1 %v1320_v48  ;;  %v1334_v48 = vld [vmem:[#allocation3 + $0x80] sm:$0xff] }
 0x1d1   :  { %688 = vmatpush.msra.mxu3 %v659_v63  ;;  %v680_v63 = vld [vmem:[#allocation3 + $0x68] sm:$0xff] }
 0x1d2   :  { %1358 = vmatpush.msrb.mxu1 %v1318_v46  ;;  %v677_v46 = vld [vmem:[#allocation3 + $0x50] sm:$0xff] }
 0x1d3   :  { %689 = vmatpush.msra.mxu3 %v657_v61  ;;  %v679_v61 = vld [vmem:[#allocation3 + $0x60] sm:$0xff] }
 0x1d4   :  { %1359 = vmatpush.msrb.mxu1 %v1315_v44  ;;  %v676_v44 = vld [vmem:[#allocation3 + $0x48] sm:$0xff] }
 0x1d5   :  { %690 = vmatpush.msra.mxu3 %v654_v49  ;;  %v678_v49 = vld [vmem:[#allocation3 + $0x58] sm:$0xff] }
 0x1d6   :  { %1360 = vmatpush.msrb.mxu1 %v1313_v38  ;;  %v667_v38 = vld [vmem:[#allocation3] sm:$0xff] }
 0x1d7   :  { %691 = vmatpush.msra.mxu3 %v652_v47  ;;  %v1345_v47 = vld [vmem:[#allocation3 + $0xd8] sm:$0xff] }
 0x1d8   :  { %1361 = vmatpush.msrb.mxu1 %v1310_v36  ;;  %v1342_v36 = vld [vmem:[#allocation3 + $0xc0] sm:$0xff] }
 0x1d9   :  { %692 = vmatpush.msra.mxu3 %v649_v45  ;;  %v1344_v45 = vld [vmem:[#allocation3 + $0xd0] sm:$0xff] }
 0x1da   :  { %1362 = vmatpush.msrb.mxu1 %v1308_v34  ;;  %v1335_v34 = vld [vmem:[#allocation3 + $0x88] sm:$0xff] }
 0x1db   :  { %693 = vmatpush.msra.mxu3 %v647_v39  ;;  %v1343_v39 = vld [vmem:[#allocation3 + $0xc8] sm:$0xff] }
 0x1dc   :  { %1363 = vmatpush.msrb.mxu1 %v1305_v28  ;;  %v668_v28 = vld [vmem:[#allocation3 + $0x8] sm:$0xff] }
 0x1dd   :  { %694 = vmatpush.msra.mxu3 %v644_v37  ;;  %v675_v37 = vld [vmem:[#allocation3 + $0x40] sm:$0xff] }
 0x1de   :  { %1364 = vmatpush.msrb.mxu1 %v1303_v27  ;;  %v1336_v27 = vld [vmem:[#allocation3 + $0x90] sm:$0xff] }
 0x1df   :  { %695 = vmatpush.msra.mxu3 %v642_v35  ;;  %v674_v35 = vld [vmem:[#allocation3 + $0x38] sm:$0xff] }
 0x1e0   :  { %1365 = vmatpush.msrb.mxu1 %v1300_v50  ;;  %v669_v50 = vld [vmem:[#allocation3 + $0x10] sm:$0xff] }
 0x1e1   :  { %696 = vmatpush.msra.mxu3 %v639_v29  ;;  %v1341_v29 = vld [vmem:[#allocation3 + $0xb8] sm:$0xff] }
 0x1e2   :  { %1366 = vmatpush.msrb.mxu1 %v1298_v24  ;;  %v1337_v24 = vld [vmem:[#allocation3 + $0x98] sm:$0xff] }
 0x1e3   :  { %697 = vmatpush.msra.mxu3 %v637_v51  ;;  %v673_v51 = vld [vmem:[#allocation3 + $0x30] sm:$0xff] }
 0x1e4   :  { %1367 = vmatpush.msrb.mxu1 %v1295_v18  ;;  %v670_v18 = vld [vmem:[#allocation3 + $0x18] sm:$0xff] }
 0x1e5   :  { %698 = vmatpush.msra.mxu3 %v634_v26  ;;  %v1338_v26 = vld [vmem:[#allocation3 + $0xa0] sm:$0xff] }
 0x1e6   :  { %1368 = vmatpush.msrb.mxu1 %v1293_v16  ;;  %v671_v16 = vld [vmem:[#allocation3 + $0x20] sm:$0xff] }
 0x1e7   :  { %1369 = vmatmul.f32.vlgmr.msrb.gmra.mxu1 %v1334_v48  ;;  %699 = vmatpush.msra.mxu3 %v632_v25  ;;  %v1340_v25 = vld [vmem:[#allocation3 + $0xb0] sm:$0xff]  ;;  %v682_v48 = vld [vmem:[#allocation3 + $0x78] sm:$0xff] }
 0x1e9   :  { %700 = vmatpush.msra.mxu3 %v629_v19  ;;  %v1339_v19 = vld [vmem:[#allocation3 + $0xa8] sm:$0xff] }
 0x1eb   :  { %701 = vmatpush.msra.mxu3 %v4747_v17  ;;  %v672_v17 = vld [vmem:[#allocation3 + $0x28] sm:$0xff] }
 0x1ec   :  { %702 = vmatmul.f32.vlgmr.msra.gmra.mxu3 %v667_v38  ;;  %v4511_v38 = vmov 0.0  }
 0x1ef   :  { %1372 = vmatmul.f32.gmra.mxu1 %v1335_v34  ;;  %v4752_v34 = vsel %vm175_vm0, 1.0, %v4511_v38 }
 0x1f4   :  { %705 = vmatmul.f32.gmra.mxu3 %v668_v28 }
 0x1f7   :  { %1375 = vmatmul.f32.gmra.mxu1 %v1336_v27 }
 0x1fc   :  { %708 = vmatmul.f32.gmra.mxu3 %v669_v50 }
 0x1ff   :  { %1378 = vmatmul.f32.gmra.mxu1 %v1337_v24  ;;  %v1348_v24 = vld [vmem:[#allocation3 + $0xf0] sm:$0xff] }
 0x204   :  { %711 = vmatmul.f32.gmra.mxu3 %v670_v18 }
 0x207   :  { %1381 = vmatmul.f32.gmra.mxu1 %v1338_v26 }
 0x20c   :  { %714 = vmatmul.f32.gmra.mxu3 %v671_v16  ;;  %v4760_v16 = vld [vmem:[#allocation11] ss:$0 sm:$0xff] }
 0x20f   :  { %1384 = vmatmul.f32.gmra.mxu1 %v1339_v19 }
 0x214   :  { %717 = vmatmul.f32.gmra.mxu3 %v672_v17 }
 0x217   :  { %1387 = vmatmul.f32.gmra.mxu1 %v1340_v25 }
 0x21c   :  { %720 = vmatmul.f32.gmra.mxu3 %v673_v51 }
 0x21f   :  { %1390 = vmatmul.f32.gmra.mxu1 %v1341_v29 }
 0x224   :  { %723 = vmatmul.f32.gmra.mxu3 %v674_v35 }
 0x227   :  { %1393 = vmatmul.f32.gmra.mxu1 %v1342_v36  ;;  %v1349_v36 = vld [vmem:[#allocation3 + $0xf8] sm:$0xff] }
 0x22c   :  { %726 = vmatmul.f32.gmra.mxu3 %v675_v37 }
 0x22f   :  { %1396 = vmatmul.f32.gmra.mxu1 %v1343_v39 }
 0x234   :  { %729 = vmatmul.f32.gmra.mxu3 %v676_v44 }
 0x237   :  { %1399 = vmatmul.f32.gmra.mxu1 %v1344_v45 }
 0x23c   :  { %732 = vmatmul.f32.gmra.mxu3 %v677_v46 }
 0x23f   :  { %1402 = vmatmul.f32.gmra.mxu1 %v1345_v47 }
 0x244   :  { %735 = vmatmul.f32.gmra.mxu3 %v678_v49 }
 0x247   :  { %1405 = vmatmul.f32.gmra.mxu1 %v1346_v60 }
 0x24c   :  { %738 = vmatmul.f32.gmra.mxu3 %v679_v61 }
 0x24f   :  { %1408 = vmatmul.f32.gmra.mxu1 %v1347_v62 }
 0x254   :  { %741 = vmatmul.f32.gmra.mxu3 %v680_v63 }
 0x257   :  { %1411 = vmatmul.f32.gmra.mxu1 %v1348_v24 }
 0x25c   :  { %744 = vmatmul.f32.gmra.mxu3 %v681_v5 }
 0x25f   :  { %1414 = vmatmul.f32.gmra.mxu1 %v1349_v36 }
 0x264   :  { %v1370_v28 = vpop.f32.mrf.mxu1  ;;  %747 = vmatmul.f32.gmra.mxu3 %v682_v48 }
 0x265   :  { %v1371_v27 = vadd.f32 %v4750_v15, %v1370_v28 }
 0x267   :  { %v4756_v50 = vmul.f32 %v4752_v34, %v1371_v27 }
 0x269   :  { %1434 = vadd.xlane.f32.xlu2 %v4756_v50  ;;  %v1466_v17 = vmul.f32 %v4756_v50, %v4756_v50 }
 0x26c   :  { %v1373_v18 = vpop.f32.mrf.mxu1 }
 0x26d   :  { %v1374_v26 = vadd.f32 %v4750_v15, %v1373_v18 }
 0x26f   :  { %v4763_v19 = vmul.f32 %v4752_v34, %v1374_v26  ;;  %v703_v25 = vpop.f32.mrf.mxu3 }
 0x270   :  { %v704_v51 = vadd.f32 %v4760_v16, %v703_v25 }
 0x271   :  { %1482 = vadd.xlane.f32.xlu2 %v1466_v17  ;;  %v1467_v29 = vmul.f32 %v4763_v19, %v4763_v19 }
 0x272   :  { %v4771_v35 = vmul.f32 %v4752_v34, %v704_v51 }
 0x273   :  { %1484 = vadd.xlane.f32.xlu0 %v1467_v29 }
 0x274   :  { %v1376_v37 = vpop.f32.mrf.mxu1  ;;  %v799_v44 = vmul.f32 %v4771_v35, %v4771_v35 }
 0x275   :  { %v1377_v39 = vadd.f32 %v4750_v15, %v1376_v37 }
 0x276   :  { %815 = vadd.xlane.f32.xlu1 %v799_v44 }
 0x277   :  { %v4777_v45 = vmul.f32 %v4752_v34, %v1377_v39  ;;  %v706_v46 = vpop.f32.mrf.mxu3 }
 0x278   :  { %v707_v47 = vadd.f32 %v4760_v16, %v706_v46 }
 0x279   :  { %1436 = vadd.xlane.f32.xlu2 %v4763_v19  ;;  %v1468_v49 = vmul.f32 %v4777_v45, %v4777_v45 }
 0x27a   :  { %v4786_v62 = vmul.f32 %v4752_v34, %v707_v47 }
 0x27b   :  { %767 = vadd.xlane.f32.xlu0 %v4771_v35 }
 0x27c   :  { %v1379_v60 = vpop.f32.mrf.mxu1  ;;  %v800_v14 = vmul.f32 %v4786_v62, %v4786_v62 }
 0x27d   :  { %v1380_v61 = vadd.f32 %v4750_v15, %v1379_v60 }
 0x27e   :  { %1486 = vadd.xlane.f32.xlu1 %v1468_v49 }
 0x27f   :  { %v4789_v63 = vmul.f32 %v4752_v34, %v1380_v61  ;;  %v709_v4 = vpop.f32.mrf.mxu3 }
 0x280   :  { %v710_v18 = vadd.f32 %v4760_v16, %v709_v4 }
 0x281   :  { %v1469_v5 = vmul.f32 %v4789_v63, %v4789_v63 }
 0x282   :  { %v4808_v25 = vmul.f32 %v4752_v34, %v710_v18 }
 0x283   :  { %1488 = vadd.xlane.f32.xlu2 %v1469_v5  ;;  %1438 = vadd.xlane.f32.xlu0 %v4777_v45 }
 0x284   :  { %v1382_v48 = vpop.f32.mrf.mxu1  ;;  %v801_v39 = vmul.f32 %v4808_v25, %v4808_v25 }
 0x285   :  { %v1383_v38 = vadd.f32 %v4750_v15, %v1382_v48 }
 0x286   :  { %817 = vadd.xlane.f32.xlu1 %v800_v14 }
 0x287   :  { %v4798_v28 = vmul.f32 %v4752_v34, %v1383_v38  ;;  %v712_v27 = vpop.f32.mrf.mxu3 }
 0x288   :  { %v713_v24 = vadd.f32 %v4760_v16, %v712_v27 }
 0x289   :  { %v1470_v46 = vmul.f32 %v4798_v28, %v4798_v28 }
 0x28a   :  { %v4805_v26 = vmul.f32 %v4752_v34, %v713_v24 }
 0x28b   :  { %1442 = vadd.xlane.f32.xlu2 %v4798_v28  ;;  %769 = vadd.xlane.f32.xlu0 %v4786_v62 }
 0x28c   :  { %v1385_v17 = vpop.f32.mrf.mxu1  ;;  %v802_v51 = vmul.f32 %v4805_v26, %v4805_v26 }
 0x28d   :  { %v1386_v60 = vadd.f32 %v4750_v15, %v1385_v17 }
 0x28e   :  { %1440 = vadd.xlane.f32.xlu1 %v4789_v63 }
 0x28f   :  { %v715_v29 = vpop.f32.mrf.mxu3  ;;  %v4829_v4 = vmul.f32 %v4752_v34, %v1386_v60 }
 0x290   :  { %v716_v36 = vadd.f32 %v4760_v16, %v715_v29 }
 0x291   :  { %v1471_v27 = vmul.f32 %v4829_v4, %v4829_v4 }
 0x292   :  { %v4818_v44 = vmul.f32 %v4752_v34, %v716_v36 }
 0x293   :  { %821 = vadd.xlane.f32.xlu2 %v802_v51  ;;  %771 = vadd.xlane.f32.xlu0 %v4808_v25 }
 0x294   :  { %v1388_v37 = vpop.f32.mrf.mxu1  ;;  %v803_v18 = vmul.f32 %v4818_v44, %v4818_v44 }
 0x295   :  { %v1389_v47 = vadd.f32 %v4750_v15, %v1388_v37 }
 0x296   :  { %819 = vadd.xlane.f32.xlu1 %v801_v39 }
 0x297   :  { %v718_v49 = vpop.f32.mrf.mxu3  ;;  %v4826_v61 = vmul.f32 %v4752_v34, %v1389_v47 }
 0x298   :  { %v719_v36 = vadd.f32 %v4760_v16, %v718_v49 }
 0x299   :  { %v1472_v5 = vmul.f32 %v4826_v61, %v4826_v61 }
 0x29a   :  { %v4850_v39 = vmul.f32 %v4752_v34, %v719_v36 }
 0x29b   :  { %775 = vadd.xlane.f32.xlu2 %v4818_v44  ;;  %1490 = vadd.xlane.f32.xlu0 %v1470_v46 }
 0x29c   :  { %v1391_v14 = vpop.f32.mrf.mxu1 }
 0x29d   :  { %v1392_v38 = vadd.f32 %v4750_v15, %v1391_v14 }
 0x29e   :  { %773 = vadd.xlane.f32.xlu1 %v4805_v26 }
 0x29f   :  { %v721_v48 = vpop.f32.mrf.mxu3  ;;  %v4839_v24 = vmul.f32 %v4752_v34, %v1392_v38 }
 0x2a0   :  { %v722_v17 = vadd.f32 %v4760_v16, %v721_v48 }
 0x2a1   :  { %v1473_v48 = vmul.f32 %v4839_v24, %v4839_v24 }
 0x2a2   :  { %v4847_v37 = vmul.f32 %v4752_v34, %v722_v17 }
 0x2a3   :  { %1494 = vadd.xlane.f32.xlu2 %v1472_v5  ;;  %1444 = vadd.xlane.f32.xlu0 %v4829_v4  ;;  %v804_v5 = vmul.f32 %v4850_v39, %v4850_v39 }
 0x2a4   :  { %v1394_v29 = vpop.f32.mrf.mxu1  ;;  %v805_v46 = vmul.f32 %v4847_v37, %v4847_v37 }
 0x2a5   :  { %v1395_v17 = vadd.f32 %v4750_v15, %v1394_v29 }
 0x2a6   :  { %1492 = vadd.xlane.f32.xlu1 %v1471_v27 }
 0x2a7   :  { %v724_v51 = vpop.f32.mrf.mxu3 }
 0x2a8   :  { %v725_v49 = vadd.f32 %v4760_v16, %v724_v51 }
 0x2aa   :  { %v4860_v14 = vmul.f32 %v4752_v34, %v725_v49  ;;  %v4874_v49 = vmul.f32 %v4752_v34, %v1395_v17 }
 0x2ab   :  { %1448 = vadd.xlane.f32.xlu2 %v4839_v24  ;;  %823 = vadd.xlane.f32.xlu0 %v803_v18 }
 0x2ac   :  { %v1397_v60 = vpop.f32.mrf.mxu1  ;;  %v806_v17 = vmul.f32 %v4860_v14, %v4860_v14  ;;  %v1474_v7 = vmul.f32 %v4874_v49, %v4874_v49 }
 0x2ad   :  { %v1398_v38 = vadd.f32 %v4750_v15, %v1397_v60 }
 0x2ae   :  { %1446 = vadd.xlane.f32.xlu1 %v4826_v61 }
 0x2af   :  { %v727_v47 = vpop.f32.mrf.mxu3  ;;  %v4867_v18 = vmul.f32 %v4752_v34, %v1398_v38 }
 0x2b0   :  { %v728_v60 = vadd.f32 %v4760_v16, %v727_v47 }
 0x2b1   :  { %v1475_v51 = vmul.f32 %v4867_v18, %v4867_v18 }
 0x2b3   :  { %827 = vadd.xlane.f32.xlu2 %v805_v46  ;;  %777 = vadd.xlane.f32.xlu0 %v4850_v39 }
 0x2b4   :  { %v1400_v36 = vpop.f32.mrf.mxu1 }
 0x2b6   :  { %825 = vadd.xlane.f32.xlu1 %v804_v5  ;;  %v1401_v5 = vadd.f32 %v4750_v15, %v1400_v36 }
 0x2b7   :  { %v730_v27 = vpop.f32.mrf.mxu3 }
 0x2b8   :  { %v731_v29 = vadd.f32 %v4760_v16, %v730_v27  ;;  %v4884_v38 = vmul.f32 %v4752_v34, %v1401_v5 }
 0x2ba   :  { %v4890_v47 = vmul.f32 %v4752_v34, %v731_v29 }
 0x2bb   :  { %781 = vadd.xlane.f32.xlu2 %v4860_v14  ;;  %1496 = vadd.xlane.f32.xlu0 %v1473_v48  ;;  %v4880_v48 = vmul.f32 %v4752_v34, %v728_v60 }
 0x2bc   :  { %7090 = vst [vmem:[#allocation45_spill] sm:$0xff] %v4890_v47  ;;  %v808_v27 = vmul.f32 %v4890_v47, %v4890_v47  ;;  %v1403_v36 = vpop.f32.mrf.mxu1 }
 0x2bd   :  { %7089 = vst [vmem:[#allocation44_spill] sm:$0xff] %v4880_v48  ;;  %v1404_v5 = vadd.f32 %v4750_v15, %v1403_v36  ;;  %v4036_v36 = vld [vmem:[#allocation10 + $0xe8] sm:$0xff] }
 0x2be   :  { %779 = vadd.xlane.f32.xlu1 %v4847_v37  ;;  %2603 = vmatpush.bf16.msra.mxu0 %v4036_v36  ;;  %v4034_v36 = vld [vmem:[#allocation10 + $0xd8] sm:$0xff] }
 0x2bf   :  { %v733_v46 = vpop.f32.mrf.mxu3  ;;  %v4904_v8 = vmul.f32 %v4752_v34, %v1404_v5 }
 0x2c0   :  { %v734_v60 = vadd.f32 %v4760_v16, %v733_v46 }
 0x2c1   :  { %7092 = vst [vmem:[#allocation47_spill] sm:$0xff] %v4904_v8  ;;  %v1477_v41 = vmul.f32 %v4904_v8, %v4904_v8 }
 0x2c3   :  { %1500 = vadd.xlane.f32.xlu2 %v1475_v51  ;;  %1450 = vadd.xlane.f32.xlu0 %v4874_v49  ;;  %v807_v51 = vmul.f32 %v4880_v48, %v4880_v48 }
 0x2c6   :  { %1452 = vadd.xlane.f32.xlu1 %v4867_v18 }
 0x2c7   :  { %v736_v9 = vpop.f32.mrf.mxu3 }
 0x2c8   :  { %v737_v58 = vadd.f32 %v4760_v16, %v736_v9 }
 0x2cb   :  { %1454 = vadd.xlane.f32.xlu2 %v4884_v38  ;;  %829 = vadd.xlane.f32.xlu0 %v806_v17  ;;  %v4901_v17 = vmul.f32 %v4752_v34, %v734_v60  ;;  %v1406_v60 = vpop.f32.mrf.mxu1 }
 0x2cd   :  { %7091 = vst [vmem:[#allocation46_spill] sm:$0xff] %v4901_v17 }
 0x2ce   :  { %831 = vadd.xlane.f32.xlu1 %v807_v51 }
 0x2cf   :  { %v739_v29 = vpop.f32.mrf.mxu3 }
 0x2d0   :  { %v740_v51 = vadd.f32 %v4760_v16, %v739_v29  ;;  %v809_v29 = vmul.f32 %v4901_v17, %v4901_v17 }
 0x2d2   :  { %v4911_v46 = vmul.f32 %v4752_v34, %v740_v51  ;;  %v4035_v51 = vld [vmem:[#allocation10 + $0xe0] sm:$0xff] }
 0x2d3   :  { %833 = vadd.xlane.f32.xlu2 %v808_v27  ;;  %783 = vadd.xlane.f32.xlu0 %v4880_v48 }
 0x2d4   :  { %7093 = vst [vmem:[#allocation48_spill] sm:$0xff] %v4911_v46  ;;  %v811_v5 = vmul.f32 %v4911_v46, %v4911_v46  ;;  %2604 = vmatpush.bf16.msra.mxu0 %v4035_v51 }
 0x2d6   :  { %785 = vadd.xlane.f32.xlu1 %v4890_v47 }
 0x2d7   :  { %v742_v53 = vpop.f32.mrf.mxu3 }
 0x2d8   :  { %v743_v6 = vadd.f32 %v4760_v16, %v742_v53  ;;  %2605 = vmatpush.bf16.msra.mxu0 %v4034_v36  ;;  %v4030_v53 = vld [vmem:[#allocation10 + $0x78] sm:$0xff]  ;;  %v1407_v36 = vadd.f32 %v4750_v15, %v1406_v60 }
 0x2d9   :  { %1951 = vmatpush.bf16.msrb.mxu2 %v4030_v53  ;;  %v4032_v53 = vld [vmem:[#allocation10 + $0xc8] sm:$0xff] }
 0x2da   :  { %v4928_v40 = vmul.f32 %v4752_v34, %v743_v6  ;;  %v4029_v6 = vld [vmem:[#allocation10 + $0x70] sm:$0xff] }
 0x2db   :  { %787 = vadd.xlane.f32.xlu2 %v4901_v17  ;;  %1456 = vadd.xlane.f32.xlu0 %v4904_v8 }
 0x2dc   :  { %v1435_v27 = vpop.xlane.xlu2 %1434  ;;  %7094 = vst [vmem:[#allocation49_spill] sm:$0xff] %v4928_v40 }
 0x2dd   :  { %v4919_v59 = vmul.f32 0.03125, %v1435_v27  ;;  %1952 = vmatpush.bf16.msrb.mxu2 %v4029_v6  ;;  %v1476_v6 = vmul.f32 %v4884_v38, %v4884_v38 }
 0x2de   :  { %1498 = vadd.xlane.f32.xlu1 %v1474_v7 }
 0x2df   :  { %v1546_v7 = vmul.f32 %v4919_v59, %v4919_v59  ;;  %v4933_v31 = vpop.f32.mrf.mxu3 }
 0x2e3   :  { %839 = vadd.xlane.f32.xlu2 %v811_v5  ;;  %835 = vadd.xlane.f32.xlu0 %v809_v29  ;;  %v1409_v5 = vpop.f32.mrf.mxu1  ;;  %v4931_v29 = vmul.f32 %v4752_v34, %v737_v58 }
 0x2e4   :  { %v1483_v52 = vpop.xlane.xlu2 %1482 }
 0x2e5   :  { %v1530_v43 = vmul.f32 0.03125, %v1483_v52  ;;  %7095 = vst [vmem:[#allocation50_spill] sm:$0xff] %v4931_v29  ;;  %v4033_v52 = vld [vmem:[#allocation10 + $0xd0] sm:$0xff] }
 0x2e6   :  { %v1485_v42 = vpop.xlane.xlu0 %1484  ;;  %1504 = vadd.xlane.f32.xlu1 %v1477_v41  ;;  %v1410_v41 = vadd.f32 %v4750_v15, %v1409_v5  ;;  %2606 = vmatpush.bf16.msra.mxu0 %v4033_v52 }
 0x2e7   :  { %v1562_v27 = vsub.f32 %v1530_v43, %v1546_v7  ;;  %v810_v7 = vmul.f32 %v4931_v29, %v4931_v29 }
 0x2e8   :  { %v4949_v5 = vmul.f32 %v4752_v34, %v1410_v41  ;;  %v4031_v41 = vld [vmem:[#allocation10 + $0xc0] sm:$0xff] }
 0x2e9   :  { %v1578_v9 = vmax.f32 %v1562_v27, 0.0  ;;  %v816_v51 = vpop.xlane.xlu1 %815 }
 0x2ea   :  { %7096 = vst [vmem:[#allocation51_spill] sm:$0xff] %v4949_v5  ;;  %2607 = vmatpush.bf16.msra.mxu0 %v4032_v53  ;;  %v863_v33 = vmul.f32 0.03125, %v816_v51  ;;  %v748_v51 = vpop.f32.mrf.mxu3 }
 0x2eb   :  { %v4935_v30 = vadd.f32 1e-05, %v1578_v9  ;;  %793 = vadd.xlane.f32.xlu2 %v4928_v40  ;;  %789 = vadd.xlane.f32.xlu0 %v4931_v29  ;;  %v1531_v9 = vmul.f32 0.03125, %v1485_v42  ;;  %v4958_v42 = vmul.f32 %v4752_v34, %v1407_v36 }
 0x2ec   :  { %v1437_v43 = vpop.xlane.xlu2 %1436 }
 0x2ed   :  { %4102 = vrsqrt.f32 %v4935_v30  ;;  %v4941_v58 = vmul.f32 0.03125, %v1437_v43  ;;  %v4028_v43 = vld [vmem:[#allocation10 + $0x68] sm:$0xff]  ;;  %7097 = vst [vmem:[#allocation52_spill] sm:$0xff] %v4958_v42  ;;  %vm1632_vm2 = vweird.f32 %v4935_v30 }
 0x2ee   :  { %v768_v27 = vpop.xlane.xlu0 %767  ;;  %837 = vadd.xlane.f32.xlu1 %v810_v7  ;;  %1953 = vmatpush.bf16.msrb.mxu2 %v4028_v43  ;;  %v4027_v7 = vld [vmem:[#allocation10 + $0x60] sm:$0xff]  ;;  %v1478_v43 = vmul.f32 %v4958_v42, %v4958_v42 }
 0x2ef   :  { %v1547_v32 = vmul.f32 %v4941_v58, %v4941_v58  ;;  %v4951_v52 = vmul.f32 0.03125, %v768_v27  ;;  %2608 = vmatpush.bf16.msra.mxu0 %v4031_v41  ;;  %v4026_v41 = vld [vmem:[#allocation10 + $0x58] sm:$0xff] }
 0x2f1   :  { %v1563_v22 = vsub.f32 %v1531_v9, %v1547_v32  ;;  %v879_v60 = vmul.f32 %v4951_v52, %v4951_v52  ;;  %v1487_v29 = vpop.xlane.xlu1 %1486 }
 0x2f2   :  { %1954 = vmatpush.bf16.msrb.mxu2 %v4027_v7 }
 0x2f3   :  { %v4103_v20 = vpop.eup %4102  ;;  %v1579_v27 = vmax.f32 %v1563_v22, 0.0  ;;  %v895_v8 = vsub.f32 %v863_v33, %v879_v60  ;;  %1460 = vadd.xlane.f32.xlu2 %v4949_v5  ;;  %1502 = vadd.xlane.f32.xlu0 %v1476_v6  ;;  %v812_v33 = vmul.f32 %v4928_v40, %v4928_v40  ;;  %v749_v60 = vadd.f32 %v4760_v16, %v748_v51 }
 0x2f4   :  { %v1627_v32 = vmul.f32 %v4103_v20, %v4935_v30  ;;  %vm1633_vm1 = vweird.f32 %v4103_v20  ;;  %v1594_v30 = vsub.f32 %v4756_v50, %v4919_v59  ;;  %v4024_v59 = vld [vmem:[#allocation10 + $0x48] sm:$0xff]  ;;  %v5010_v50 = vld [vmem:[%s6985_s6 + $0x2] ss:$0 sm:$0xff] }
 0x2f5   :  { %v4962_v53 = vadd.f32 1e-05, %v1579_v27  ;;  %v911_v9 = vmax.f32 %v895_v8, 0.0  ;;  %vm4982_vm3 = vmor %vm1632_vm2, %vm1633_vm1 }
 0x2f6   :  { %v1628_v17 = vmul.f32 %v4103_v20, %v1627_v32  ;;  %v1489_v36 = vpop.xlane.xlu2 %1488  ;;  %v1439_v47 = vpop.xlane.xlu0 %1438  ;;  %791 = vadd.xlane.f32.xlu1 %v4911_v46  ;;  %v1532_v32 = vmul.f32 0.03125, %v1487_v29  ;;  %1955 = vmatpush.bf16.msrb.mxu2 %v4026_v41  ;;  %v4979_v46 = vmul.f32 %v4752_v34, %v749_v60 }
 0x2f7   :  { %4104 = vrsqrt.f32 %v4962_v53  ;;  %v4967_v22 = vadd.f32 1e-05, %v911_v9  ;;  %v4973_v8 = vmul.f32 0.03125, %v1439_v47  ;;  %v1533_v21 = vmul.f32 0.03125, %v1489_v36 }
 0x2f8   :  { %v1629_v6 = vmul.f32 0.5, %v1628_v17  ;;  %7098 = vst [vmem:[#allocation53_spill] sm:$0xff] %v4979_v46  ;;  %v4025_v17 = vld [vmem:[#allocation10 + $0x50] sm:$0xff]  ;;  %vm1642_vm5 = vweird.f32 %v4962_v53 }
 0x2f9   :  { %4106 = vrsqrt.f32 %v4967_v22  ;;  %v1548_v7 = vmul.f32 %v4973_v8, %v4973_v8  ;;  %v818_v9 = vpop.xlane.xlu1 %817  ;;  %vm965_vm8 = vweird.f32 %v4967_v22 }
 0x2fa   :  { %v1630_v27 = vsub.f32 1.5, %v1629_v6  ;;  %1956 = vmatpush.bf16.msrb.mxu2 %v4025_v17 }
 0x2fb   :  { %1506 = vadd.xlane.f32.xlu2 %v1478_v43  ;;  %841 = vadd.xlane.f32.xlu0 %v812_v33  ;;  %v1564_v47 = vsub.f32 %v1532_v32, %v1548_v7  ;;  %v1479_v7 = vmul.f32 %v4949_v5, %v4949_v5 }
 0x2fc   :  { %v1631_v51 = vmul.f32 %v4103_v20, %v1630_v27 }
 0x2fd   :  { %v4105_v40 = vpop.eup %4104  ;;  %v1580_v43 = vmax.f32 %v1564_v47, 0.0 }
 0x2fe   :  { %v1635_v29 = vsel %vm4982_vm3, %v4103_v20, %v1631_v51  ;;  %v1637_v41 = vmul.f32 %v4105_v40, %v4962_v53  ;;  %v4989_v33 = vpop.xlane.xlu2 %1442  ;;  %v770_v60 = vpop.xlane.xlu0 %769  ;;  %1458 = vadd.xlane.f32.xlu1 %v4958_v42  ;;  %v814_v20 = vmul.f32 %v4979_v46, %v4979_v46  ;;  %v864_v42 = vmul.f32 0.03125, %v818_v9  ;;  %1957 = vmatpush.bf16.msrb.mxu2 %v4024_v59 }
 0x2ff   :  { %v4991_v27 = vpop.eup %4106  ;;  %v4995_v32 = vmul.f32 0.03125, %v770_v60  ;;  %v1412_v51 = vpop.f32.mrf.mxu1  ;;  %v5004_v6 = vadd.f32 1e-05, %v1580_v43  ;;  %v1786_v60 = vmul.f32 %v1635_v29, %v1594_v30  ;;  %vm1643_vm4 = vweird.f32 %v4105_v40 }
 0x300   :  { %v1638_v47 = vmul.f32 %v4105_v40, %v1637_v41  ;;  %v960_v17 = vmul.f32 %v4991_v27, %v4967_v22  ;;  %v1413_v48 = vadd.f32 %v4750_v15, %v1412_v51  ;;  %v746_v51 = vadd.f32 %v4760_v16, %v4933_v31  ;;  %vm1644_vm6 = vmor %vm1642_vm5, %vm1643_vm4 }
 0x301   :  { %v880_v5 = vmul.f32 %v4995_v32, %v4995_v32  ;;  %4108 = vrsqrt.f32 %v5004_v6  ;;  %v1441_v43 = vpop.xlane.xlu1 %1440  ;;  %v1805_v59 = vmul.f32 %v5010_v50, %v1786_v60  ;;  %vm966_vm7 = vweird.f32 %v4991_v27 }
 0x302   :  { %v1639_v23 = vmul.f32 0.5, %v1638_v47  ;;  %v961_v41 = vmul.f32 %v4991_v27, %v960_v17  ;;  %v5018_v10 = vmul.f32 0.03125, %v1441_v43  ;;  %v5021_v30 = vmul.f32 %v4752_v34, %v1413_v48  ;;  %v4023_v47 = vld [vmem:[#allocation10 + $0x40] sm:$0xff]  ;;  %vm5068_vm9 = vmor %vm965_vm8, %vm966_vm7 }
 0x303   :  { %v896_v12 = vsub.f32 %v864_v42, %v880_v5  ;;  %1508 = vadd.xlane.f32.xlu0 %v1479_v7  ;;  %845 = vadd.xlane.f32.xlu2 %v814_v20  ;;  %v5023_v17 = vld [vmem:[#allocation13 + $0x2] ss:$0 sm:$0xff]  ;;  %v1595_v48 = vsub.f32 %v4763_v19, %v4941_v58  ;;  %v5033_v7 = vmul.f32 %v4752_v34, %v746_v51  ;;  %vm1652_vm11 = vweird.f32 %v5004_v6 }
 0x304   :  { %v1640_v9 = vsub.f32 1.5, %v1639_v23  ;;  %v962_v29 = vmul.f32 0.5, %v961_v41  ;;  %v1549_v31 = vmul.f32 %v5018_v10, %v5018_v10  ;;  %1958 = vmatpush.bf16.msrb.mxu2 %v4023_v47  ;;  %v1480_v43 = vmul.f32 %v5021_v30, %v5021_v30 }
 0x305   :  { %v912_v36 = vmax.f32 %v896_v12, 0.0  ;;  %7101 = vst [vmem:[#allocation54_spill] sm:$0xff] %v5033_v7  ;;  %v1824_v19 = vadd.f32 %v5023_v17, %v1805_v59  ;;  %v813_v59 = vmul.f32 %v5033_v7, %v5033_v7 }
 0x306   :  { %v1641_v16 = vmul.f32 %v4105_v40, %v1640_v9  ;;  %v963_v5 = vsub.f32 1.5, %v962_v29  ;;  %v822_v42 = vpop.xlane.xlu2 %821  ;;  %v772_v23 = vpop.xlane.xlu0 %771  ;;  %v1565_v12 = vsub.f32 %v1533_v21, %v1549_v31  ;;  %797 = vadd.xlane.f32.xlu1 %v4979_v46 }
 0x307   :  { %v5035_v20 = vadd.f32 1e-05, %v912_v36  ;;  %v5038_v60 = vpop.eup %4108  ;;  %v5040_v41 = vmul.f32 0.03125, %v772_v23  ;;  %v5057_v36 = vmul.f32 0.03125, %v4989_v33  ;;  %v1415_v23 = vpop.f32.mrf.mxu1 }
 0x308   :  { %v1645_v53 = vsel %vm1644_vm6, %v4105_v40, %v1641_v16  ;;  %v1647_v51 = vmul.f32 %v5038_v60, %v5004_v6  ;;  %v964_v21 = vmul.f32 %v4991_v27, %v963_v5  ;;  %v1581_v9 = vmax.f32 %v1565_v12, 0.0 }
 0x309   :  { %v1787_v58 = vmul.f32 %v1645_v53, %v1595_v48  ;;  %4110 = vrsqrt.f32 %v5035_v20  ;;  %v820_v29 = vpop.xlane.xlu1 %819  ;;  %v881_v16 = vmul.f32 %v5040_v41, %v5040_v41  ;;  %v927_v48 = vsub.f32 %v4771_v35, %v4951_v52 }
 0x30a   :  { %v1648_v47 = vmul.f32 %v5038_v60, %v1647_v51  ;;  %v5059_v31 = vadd.f32 1e-05, %v1581_v9  ;;  %v865_v5 = vmul.f32 0.03125, %v820_v29  ;;  %v1840_v53 = vmax.f32 %v1824_v19, 0.0 }
 0x30b   :  { %v1806_v40 = vmul.f32 %v5010_v50, %v1787_v58  ;;  %795 = vadd.xlane.f32.xlu0 %v5033_v7  ;;  %1510 = vadd.xlane.f32.xlu2 %v1480_v43  ;;  %v968_v58 = vsel %vm5068_vm9, %v4991_v27, %v964_v21  ;;  %v1550_v43 = vmul.f32 %v5057_v36, %v5057_v36  ;;  %vm1653_vm10 = vweird.f32 %v5038_v60 }
 0x30c   :  { %v1649_v33 = vmul.f32 0.5, %v1648_v47  ;;  %4112 = vrsqrt.f32 %v5059_v31  ;;  %v897_v51 = vsub.f32 %v865_v5, %v881_v16  ;;  %v1416_v47 = vadd.f32 %v4750_v15, %v1415_v23  ;;  %v5090_v5 = vld [vmem:[%s6985_s6] ss:$0 sm:$0xff]  ;;  %vm5109_vm12 = vmor %vm1652_vm11, %vm1653_vm10 }
 0x30d   :  { %v1825_v22 = vadd.f32 %v5023_v17, %v1806_v40  ;;  %v1119_v21 = vmul.f32 %v968_v58, %v927_v48  ;;  %v5085_v16 = vadd.f32 %v1840_v53, %v4623_v55  ;;  %vm975_vm14 = vweird.f32 %v5035_v20 }
 0x30e   :  { %v776_v9 = vpop.xlane.xlu2 %775  ;;  %v1491_v35 = vpop.xlane.xlu0 %1490  ;;  %v1650_v40 = vsub.f32 1.5, %v1649_v33  ;;  %843 = vadd.xlane.f32.xlu1 %v813_v59  ;;  %v913_v46 = vmax.f32 %v897_v51, 0.0  ;;  %v5096_v48 = vmul.f32 %v4752_v34, %v1416_v47  ;;  %vm1662_vm1 = vweird.f32 %v5059_v31 }
 0x30f   :  { %v4111_v52 = vpop.eup %4110  ;;  %v1841_v29 = vmax.f32 %v1825_v22, 0.0  ;;  %v1534_v7 = vmul.f32 0.03125, %v1491_v35  ;;  %v1138_v6 = vmul.f32 %v5090_v5, %v1119_v21  ;;  %v928_v21 = vsub.f32 %v4786_v62, %v4995_v32 }
 0x310   :  { %v970_v19 = vmul.f32 %v4111_v52, %v5035_v20  ;;  %v1651_v59 = vmul.f32 %v5038_v60, %v1650_v40  ;;  %v5093_v23 = vadd.f32 1e-05, %v913_v46  ;;  %v1596_v46 = vsub.f32 %v4777_v45, %v4973_v8  ;;  %v5120_v40 = vld [vmem:[#allocation13] ss:$0 sm:$0xff] }
 0x311   :  { %v5081_v27 = vadd.f32 %v1841_v29, %v4629_v57  ;;  %v1566_v22 = vsub.f32 %v1534_v7, %v1550_v43  ;;  %v774_v12 = vpop.xlane.xlu1 %773  ;;  %v866_v57 = vmul.f32 0.03125, %v822_v42  ;;  %vm976_vm13 = vweird.f32 %v4111_v52 }
 0x312   :  { %v971_v15 = vmul.f32 %v4111_v52, %v970_v19  ;;  %v5098_v33 = vmul.f32 0.03125, %v774_v12  ;;  %v4113_v53 = vpop.eup %4112  ;;  %4114 = vrsqrt.f32 %v5093_v23  ;;  %v1655_v35 = vsel %vm5109_vm12, %v5038_v60, %v1651_v59  ;;  %vm977_vm15 = vmor %vm975_vm14, %vm976_vm13 }
 0x313   :  { %7104 = vst [vmem:[#allocation55_spill] sm:$0xff] %v5081_v27  ;;  %1462 = vadd.xlane.f32.xlu0 %v5021_v30  ;;  %v2545_v55 = vpack.c.bf16 %v5081_v27, %v5085_v16  ;;  %v1657_v7 = vmul.f32 %v4113_v53, %v5059_v31  ;;  %v1582_v43 = vmax.f32 %v1566_v22, 0.0  ;;  %v1481_v22 = vmul.f32 %v5096_v48, %v5096_v48 }
 0x314   :  { %v972_v58 = vmul.f32 0.5, %v971_v15  ;;  %v882_v51 = vmul.f32 %v5098_v33, %v5098_v33  ;;  %v1788_v59 = vmul.f32 %v1655_v35, %v1596_v46  ;;  %vm1663_vm0 = vweird.f32 %v4113_v53 }
 0x315   :  { %2609 = vmatmul.bf16.vlgmr.msra.gmra.mxu0 %v2545_v55  ;;  %v1658_v47 = vmul.f32 %v4113_v53, %v1657_v7  ;;  %v5122_v19 = vadd.f32 1e-05, %v1582_v43  ;;  %v5135_v7 = vmul.f32 0.03125, %v776_v9  ;;  %vm1664_vm2 = vmor %vm1662_vm1, %vm1663_vm0  ;;  %vm985_vm4 = vweird.f32 %v5093_v23 }
 0x316   :  { %v973_v45 = vsub.f32 1.5, %v972_v58  ;;  %v1495_v8 = vpop.xlane.xlu2 %1494  ;;  %v1445_v29 = vpop.xlane.xlu0 %1444  ;;  %v898_v15 = vsub.f32 %v866_v57, %v882_v51  ;;  %1464 = vadd.xlane.f32.xlu1 %v5096_v48  ;;  %v1157_v51 = vadd.f32 %v5120_v40, %v1138_v6  ;;  %v1807_v9 = vmul.f32 %v5010_v50, %v1788_v59 }
 0x317   :  { %v5130_v60 = vmul.f32 0.03125, %v1445_v29  ;;  %v1659_v55 = vmul.f32 0.5, %v1658_v47  ;;  %4116 = vrsqrt.f32 %v5122_v19  ;;  %v883_v29 = vmul.f32 %v5135_v7, %v5135_v7 }
 0x318   :  { %v974_v12 = vmul.f32 %v4111_v52, %v973_v45  ;;  %v914_v58 = vmax.f32 %v898_v15, 0.0  ;;  %v5133_v57 = vpop.eup %4114  ;;  %v1597_v15 = vsub.f32 %v4789_v63, %v5018_v10  ;;  %v1598_v10 = vsub.f32 %v4798_v28, %v5057_v36 }
 0x319   :  { %v1493_v43 = vpop.xlane.xlu1 %1492  ;;  %v1660_v32 = vsub.f32 1.5, %v1659_v55  ;;  %v980_v20 = vmul.f32 %v5133_v57, %v5093_v23  ;;  %v1551_v35 = vmul.f32 %v5130_v60, %v5130_v60  ;;  %vm986_vm3 = vweird.f32 %v5133_v57 }
 0x31a   :  { %v978_v42 = vsel %vm977_vm15, %v4111_v52, %v974_v12  ;;  %v5141_v46 = vadd.f32 1e-05, %v914_v58  ;;  %v1535_v52 = vmul.f32 0.03125, %v1493_v43  ;;  %vm5190_vm5 = vmor %vm985_vm4, %vm986_vm3  ;;  %vm1672_vm6 = vweird.f32 %v5122_v19 }
 0x31b   :  { %v1120_v62 = vmul.f32 %v978_v42, %v928_v21  ;;  %1512 = vadd.xlane.f32.xlu0 %v1481_v22  ;;  %v1661_v45 = vmul.f32 %v4113_v53, %v1660_v32  ;;  %v981_v6 = vmul.f32 %v5133_v57, %v980_v20  ;;  %v1173_v42 = vmax.f32 %v1157_v51, 0.0 }
 0x31c   :  { %4118 = vrsqrt.f32 %v5141_v46  ;;  %v1567_v31 = vsub.f32 %v1535_v52, %v1551_v35  ;;  %v1826_v35 = vadd.f32 %v5023_v17, %v1807_v9  ;;  %vm995_vm10 = vweird.f32 %v5141_v46 }
 0x31d   :  { %v1139_v47 = vmul.f32 %v5090_v5, %v1120_v62  ;;  %v5153_v12 = vpop.eup %4116  ;;  %v1665_v59 = vsel %vm1664_vm2, %v4113_v53, %v1661_v45  ;;  %v982_v55 = vmul.f32 0.5, %v981_v6  ;;  %v1536_v6 = vmul.f32 0.03125, %v1495_v8 }
 0x31e   :  { %v1449_v22 = vpop.xlane.xlu2 %1448  ;;  %v824_v21 = vpop.xlane.xlu0 %823  ;;  %v1789_v43 = vmul.f32 %v1665_v59, %v1597_v15  ;;  %v1667_v32 = vmul.f32 %v5153_v12, %v5122_v19  ;;  %v1583_v62 = vmax.f32 %v1567_v31, 0.0  ;;  %v5168_v31 = vadd.f32 %v1173_v42, %v4620_v54 }
 0x31f   :  { %v867_v58 = vmul.f32 0.03125, %v824_v21  ;;  %v983_v63 = vsub.f32 1.5, %v982_v55  ;;  %v1158_v51 = vadd.f32 %v5120_v40, %v1139_v47  ;;  %vm1673_vm7 = vweird.f32 %v5153_v12 }
 0x320   :  { %v1808_v52 = vmul.f32 %v5010_v50, %v1789_v43  ;;  %v1668_v27 = vmul.f32 %v5153_v12, %v1667_v32  ;;  %v5162_v53 = vadd.f32 1e-05, %v1583_v62  ;;  %v1842_v62 = vmax.f32 %v1826_v35, 0.0  ;;  %vm5219_vm9 = vmor %vm1672_vm6, %vm1673_vm7 }
 0x321   :  { %v899_v20 = vsub.f32 %v867_v58, %v883_v29  ;;  %v1447_v45 = vpop.xlane.xlu1 %1446  ;;  %v1174_v29 = vmax.f32 %v1158_v51, 0.0  ;;  %v984_v55 = vmul.f32 %v5133_v57, %v983_v63  ;;  %v1599_v28 = vsub.f32 %v4829_v4, %v5130_v60 }
 0x322   :  { %v5165_v21 = vmul.f32 0.03125, %v1447_v45  ;;  %v4119_v59 = vpop.eup %4118  ;;  %v1669_v9 = vmul.f32 0.5, %v1668_v27  ;;  %4120 = vrsqrt.f32 %v5162_v53  ;;  %v1827_v27 = vadd.f32 %v5023_v17, %v1808_v52 }
 0x323   :  { %v915_v15 = vmax.f32 %v899_v20, 0.0  ;;  %v990_v58 = vmul.f32 %v4119_v59, %v5141_v46  ;;  %v5181_v42 = vadd.f32 %v1174_v29, %v4626_v56  ;;  %v929_v45 = vsub.f32 %v4808_v25, %v5040_v41 }
 0x324   :  { %v1552_v8 = vmul.f32 %v5165_v21, %v5165_v21  ;;  %v1670_v47 = vsub.f32 1.5, %v1669_v9  ;;  %v930_v56 = vsub.f32 %v4805_v26, %v5098_v33  ;;  %v988_v25 = vsel %vm5190_vm5, %v5133_v57, %v984_v55 }
 0x325   :  { %v5174_v43 = vadd.f32 1e-05, %v915_v15  ;;  %v991_v63 = vmul.f32 %v4119_v59, %v990_v58  ;;  %v1895_v23 = vpack.c.bf16 %v5181_v42, %v5168_v31  ;;  %v5207_v33 = vadd.f32 %v1842_v62, %v4639_v1 }
 0x326   :  { %v5178_v32 = vpop.xlane.xlu2 %827  ;;  %v778_v54 = vpop.xlane.xlu0 %777  ;;  %v1568_v20 = vsub.f32 %v1536_v6, %v1552_v8  ;;  %v1843_v6 = vmax.f32 %v1827_v27, 0.0  ;;  %v1671_v9 = vmul.f32 %v5153_v12, %v1670_v47  ;;  %vm996_vm8 = vweird.f32 %v4119_v59 }
 0x327   :  { %4122 = vrsqrt.f32 %v5174_v43  ;;  %v5196_v52 = vmul.f32 0.03125, %v778_v54  ;;  %v992_v35 = vmul.f32 0.5, %v991_v63  ;;  %1959 = vmatmul.bf16.vlgmr.msrb.gmra.mxu2 %v1895_v23  ;;  %v5210_v8 = vmul.f32 0.03125, %v1449_v22  ;;  %vm997_vm11 = vmor %vm995_vm10, %vm996_vm8 }
 0x328   :  { %v1584_v15 = vmax.f32 %v1568_v20, 0.0  ;;  %v4121_v41 = vpop.eup %4120  ;;  %v5215_v55 = vadd.f32 %v1843_v6, %v4645_v3  ;;  %v1121_v19 = vmul.f32 %v988_v25, %v929_v45  ;;  %v1675_v63 = vsel %vm5219_vm9, %v5153_v12, %v1671_v9 }
 0x329   :  { %v826_v26 = vpop.xlane.xlu1 %825  ;;  %v993_v29 = vsub.f32 1.5, %v992_v35  ;;  %v1677_v58 = vmul.f32 %v4121_v41, %v5162_v53  ;;  %v884_v22 = vmul.f32 %v5196_v52, %v5196_v52  ;;  %v1553_v3 = vmul.f32 %v5210_v8, %v5210_v8 }
 0x32a   :  { %v5212_v54 = vadd.f32 1e-05, %v1584_v15  ;;  %v868_v57 = vmul.f32 0.03125, %v826_v26  ;;  %v2546_v15 = vpack.c.bf16 %v5215_v55, %v5207_v33  ;;  %v1140_v9 = vmul.f32 %v5090_v5, %v1121_v19 }
 0x32b   :  { %v994_v1 = vmul.f32 %v4119_v59, %v993_v29  ;;  %v1678_v62 = vmul.f32 %v4121_v41, %v1677_v58  ;;  %v1790_v26 = vmul.f32 %v1675_v63, %v1598_v10  ;;  %vm1683_vm12 = vweird.f32 %v4121_v41 }
 0x32c   :  { %4124 = vrsqrt.f32 %v5212_v54  ;;  %v900_v35 = vsub.f32 %v868_v57, %v884_v22  ;;  %2614 = vmatmul.bf16.gmra.mxu0 %v2546_v15  ;;  %vm1682_vm13 = vweird.f32 %v5162_v53  ;;  %v869_v36 = vmul.f32 0.03125, %v5178_v32 }
 0x32d   :  { %v5217_v47 = vpop.eup %4122  ;;  %v998_v46 = vsel %vm997_vm11, %v4119_v59, %v994_v1  ;;  %v1679_v23 = vmul.f32 0.5, %v1678_v62  ;;  %vm1684_vm14 = vmor %vm1682_vm13, %vm1683_vm12  ;;  %v1159_v10 = vadd.f32 %v5120_v40, %v1140_v9  ;;  %v931_v60 = vsub.f32 %v4818_v44, %v5135_v7 }
 0x32e   :  { %v1000_v20 = vmul.f32 %v5217_v47, %v5174_v43  ;;  %v782_v45 = vpop.xlane.xlu2 %781  ;;  %v1497_v51 = vpop.xlane.xlu0 %1496  ;;  %v1122_v6 = vmul.f32 %v998_v46, %v930_v56  ;;  %v916_v58 = vmax.f32 %v900_v35, 0.0  ;;  %v1601_v32 = vsub.f32 %v4839_v24, %v5210_v8 }
 0x32f   :  { %v1537_v25 = vmul.f32 0.03125, %v1497_v51  ;;  %v1680_v29 = vsub.f32 1.5, %v1679_v23  ;;  %vm1005_vm15 = vweird.f32 %v5174_v43  ;;  %vm1006_vm0 = vweird.f32 %v5217_v47 }
 0x330   :  { %v1001_v12 = vmul.f32 %v5217_v47, %v1000_v20  ;;  %v1141_v59 = vmul.f32 %v5090_v5, %v1122_v6  ;;  %v5243_v1 = vadd.f32 1e-05, %v916_v58  ;;  %vm5299_vm2 = vmor %vm1005_vm15, %vm1006_vm0  ;;  %vm1692_vm3 = vweird.f32 %v5212_v54 }
 0x331   :  { %v780_v27 = vpop.xlane.xlu1 %779  ;;  %v1681_v56 = vmul.f32 %v4121_v41, %v1680_v29  ;;  %v1569_v62 = vsub.f32 %v1537_v25, %v1553_v3  ;;  %v1809_v3 = vmul.f32 %v5010_v50, %v1790_v26 }
 0x332   :  { %v1002_v57 = vmul.f32 0.5, %v1001_v12  ;;  %v5245_v22 = vmul.f32 0.03125, %v780_v27  ;;  %v5247_v19 = vpop.eup %4124  ;;  %v1160_v53 = vadd.f32 %v5120_v40, %v1141_v59  ;;  %4126 = vrsqrt.f32 %v5243_v1 }
 0x333   :  { %v1685_v63 = vsel %vm1684_vm14, %v4121_v41, %v1681_v56  ;;  %v1687_v20 = vmul.f32 %v5247_v19, %v5212_v54  ;;  %v1585_v23 = vmax.f32 %v1569_v62, 0.0  ;;  %v1175_v12 = vmax.f32 %v1159_v10, 0.0 }
 0x334   :  { %v1791_v51 = vmul.f32 %v1685_v63, %v1599_v28  ;;  %v1003_v46 = vsub.f32 1.5, %v1002_v57  ;;  %v885_v15 = vmul.f32 %v5245_v22, %v5245_v22  ;;  %v1176_v25 = vmax.f32 %v1160_v53, 0.0 }
 0x335   :  { %v1688_v41 = vmul.f32 %v5247_v19, %v1687_v20  ;;  %v5268_v6 = vadd.f32 1e-05, %v1585_v23  ;;  %v1828_v44 = vadd.f32 %v5023_v17, %v1809_v3  ;;  %v5284_v10 = vmul.f32 0.03125, %v782_v45 }
 0x336   :  { %v1501_v35 = vpop.xlane.xlu2 %1500  ;;  %v5258_v4 = vpop.xlane.xlu0 %1450  ;;  %v901_v26 = vsub.f32 %v869_v36, %v885_v15  ;;  %v1810_v29 = vmul.f32 %v5010_v50, %v1791_v51  ;;  %v1004_v7 = vmul.f32 %v5217_v47, %v1003_v46  ;;  %v5280_v28 = vadd.f32 %v1176_v25, %v4642_v2 }
 0x337   :  { %v1689_v9 = vmul.f32 0.5, %v1688_v41  ;;  %4128 = vrsqrt.f32 %v5268_v6  ;;  %v1539_v58 = vmul.f32 0.03125, %v1501_v35  ;;  %v5287_v53 = vadd.f32 %v1175_v12, %v4636_v0 }
 0x338   :  { %v5275_v57 = vpop.eup %4126  ;;  %v917_v56 = vmax.f32 %v901_v26, 0.0  ;;  %v1829_v63 = vadd.f32 %v5023_v17, %v1810_v29  ;;  %vm1693_vm1 = vweird.f32 %v5247_v19  ;;  %v1844_v51 = vmax.f32 %v1828_v44, 0.0 }
 0x339   :  { %v1453_v59 = vpop.xlane.xlu1 %1452  ;;  %v1690_v27 = vsub.f32 1.5, %v1689_v9  ;;  %v1010_v36 = vmul.f32 %v5275_v57, %v5243_v1  ;;  %v1896_v46 = vpack.c.bf16 %v5280_v28, %v5287_v53  ;;  %v1600_v15 = vsub.f32 %v4826_v61, %v5165_v21  ;;  %vm5322_vm4 = vmor %vm1692_vm3, %vm1693_vm1 }
 0x33a   :  { %v5277_v62 = vmul.f32 0.03125, %v1453_v59  ;;  %v5291_v20 = vadd.f32 1e-05, %v917_v56  ;;  %v1845_v41 = vmax.f32 %v1829_v63, 0.0  ;;  %v1008_v12 = vsel %vm5299_vm2, %v5217_v47, %v1004_v7 }
 0x33b   :  { %v1691_v0 = vmul.f32 %v5247_v19, %v1690_v27  ;;  %v1011_v45 = vmul.f32 %v5275_v57, %v1010_v36  ;;  %v886_v26 = vmul.f32 %v5284_v10, %v5284_v10  ;;  %1964 = vmatmul.bf16.gmra.mxu2 %v1896_v46  ;;  %v5329_v44 = vadd.f32 %v1844_v51, %v4655_v11 }
 0x33c   :  { %v1555_v3 = vmul.f32 %v5277_v62, %v5277_v62  ;;  %4130 = vrsqrt.f32 %v5291_v20  ;;  %v5332_v54 = vadd.f32 %v1845_v41, %v4661_v13  ;;  %vm1016_vm5 = vweird.f32 %v5275_v57 }
 0x33d   :  { %v5315_v25 = vpop.eup %4128  ;;  %v1012_v9 = vmul.f32 0.5, %v1011_v45  ;;  %v1695_v7 = vsel %vm5322_vm4, %v5247_v19, %v1691_v0  ;;  %v1123_v27 = vmul.f32 %v1008_v12, %v931_v60  ;;  %v932_v13 = vsub.f32 %v4850_v39, %v5196_v52 }
 0x33e   :  { %v5307_v23 = vpop.xlane.xlu2 %1454  ;;  %v830_v35 = vpop.xlane.xlu0 %829  ;;  %v1571_v43 = vsub.f32 %v1539_v58, %v1555_v3  ;;  %v1697_v21 = vmul.f32 %v5315_v25, %v5268_v6  ;;  %v2547_v11 = vpack.c.bf16 %v5332_v54, %v5329_v44  ;;  %vm1015_vm6 = vweird.f32 %v5243_v1 }
 0x33f   :  { %v870_v29 = vmul.f32 0.03125, %v830_v35  ;;  %v1013_v58 = vsub.f32 1.5, %v1012_v9  ;;  %v934_v19 = vsub.f32 %v4860_v14, %v5284_v10  ;;  %vm5351_vm7 = vmor %vm1015_vm6, %vm1016_vm5  ;;  %v5356_v0 = vmul.f32 0.03125, %v5258_v4 }
 0x340   :  { %v1587_v47 = vmax.f32 %v1571_v43, 0.0  ;;  %v1698_v56 = vmul.f32 %v5315_v25, %v1697_v21  ;;  %2619 = vmatmul.bf16.gmra.mxu0 %v2547_v11  ;;  %v1792_v52 = vmul.f32 %v1695_v7, %v1600_v15  ;;  %v1142_v41 = vmul.f32 %v5090_v5, %v1123_v27 }
 0x341   :  { %v832_v59 = vpop.xlane.xlu1 %831  ;;  %v902_v63 = vsub.f32 %v870_v29, %v886_v26  ;;  %v1014_v3 = vmul.f32 %v5275_v57, %v1013_v58  ;;  %vm1703_vm8 = vweird.f32 %v5315_v25  ;;  %vm1702_vm9 = vweird.f32 %v5268_v6 }
 0x342   :  { %v5339_v36 = vadd.f32 1e-05, %v1587_v47  ;;  %v5349_v51 = vpop.eup %4130  ;;  %v1699_v2 = vmul.f32 0.5, %v1698_v56  ;;  %v933_v15 = vsub.f32 %v4847_v37, %v5245_v22  ;;  %v1811_v21 = vmul.f32 %v5010_v50, %v1792_v52  ;;  %vm1704_vm10 = vmor %vm1702_vm9, %vm1703_vm8 }
 0x343   :  { %v918_v39 = vmax.f32 %v902_v63, 0.0  ;;  %v1020_v1 = vmul.f32 %v5349_v51, %v5291_v20  ;;  %v1018_v35 = vsel %vm5351_vm7, %v5275_v57, %v1014_v3  ;;  %v871_v57 = vmul.f32 0.03125, %v832_v59 }
 0x344   :  { %4132 = vrsqrt.f32 %v5339_v36  ;;  %v1700_v43 = vsub.f32 1.5, %v1699_v2  ;;  %v1124_v26 = vmul.f32 %v1018_v35, %v932_v13  ;;  %v5381_v6 = vmul.f32 %v5356_v0, %v5356_v0 }
 0x345   :  { %v5366_v4 = vadd.f32 1e-05, %v918_v39  ;;  %v1021_v9 = vmul.f32 %v5349_v51, %v1020_v1  ;;  %v1161_v58 = vadd.f32 %v5120_v40, %v1142_v41  ;;  %v1602_v3 = vsub.f32 %v4874_v49, %v5356_v0 }
 0x346   :  { %v834_v45 = vpop.xlane.xlu2 %833  ;;  %v784_v46 = vpop.xlane.xlu0 %783  ;;  %v1701_v29 = vmul.f32 %v5315_v25, %v1700_v43  ;;  %v1143_v2 = vmul.f32 %v5090_v5, %v1124_v26  ;;  %vm1026_vm11 = vweird.f32 %v5349_v51  ;;  %vm1025_vm12 = vweird.f32 %v5291_v20 }
 0x347   :  { %v5368_v12 = vmul.f32 0.03125, %v784_v46  ;;  %4134 = vrsqrt.f32 %v5366_v4  ;;  %v1022_v47 = vmul.f32 0.5, %v1021_v9  ;;  %v872_v63 = vmul.f32 0.03125, %v834_v45  ;;  %vm5422_vm13 = vmor %vm1025_vm12, %vm1026_vm11 }
 0x348   :  { %v1705_v56 = vsel %vm1704_vm10, %v5315_v25, %v1701_v29  ;;  %v1603_v25 = vsub.f32 %v4867_v18, %v5277_v62  ;;  %v5403_v46 = vmul.f32 0.03125, %v5307_v23  ;;  %v1177_v43 = vmax.f32 %v1161_v58, 0.0  ;;  %v7132_v18 = vld [vmem:[#allocation47_spill] sm:$0xff] }
 0x349   :  { %v887_v61 = vmul.f32 %v5368_v12, %v5368_v12  ;;  %v786_v7 = vpop.xlane.xlu1 %785  ;;  %v1023_v13 = vsub.f32 1.5, %v1022_v47  ;;  %v1793_v39 = vmul.f32 %v1705_v56, %v1601_v32  ;;  %v1830_v9 = vadd.f32 %v5023_v17, %v1811_v21  ;;  %v7119_v56 = vld [vmem:[#allocation22_spill] sm:$0xff] }
 0x34a   :  { %v5384_v27 = vpop.eup %4132  ;;  %v5387_v11 = vmul.f32 0.03125, %v786_v7  ;;  %v5415_v23 = vmul.f32 %v5403_v46, %v5403_v46  ;;  %vm1722_vm14 = vweird.f32 %v5339_v36  ;;  %vm1035_vm0 = vweird.f32 %v5366_v4 }
 0x34b   :  { %v903_v59 = vsub.f32 %v871_v57, %v887_v61  ;;  %v1717_v60 = vmul.f32 %v5384_v27, %v5339_v36  ;;  %v1024_v24 = vmul.f32 %v5349_v51, %v1023_v13  ;;  %v1162_v57 = vadd.f32 %v5120_v40, %v1143_v2 }
 0x34c   :  { %v888_v1 = vmul.f32 %v5387_v11, %v5387_v11  ;;  %v1812_v47 = vmul.f32 %v5010_v50, %v1793_v39  ;;  %v1846_v13 = vmax.f32 %v1830_v9, 0.0  ;;  %vm1723_vm1 = vweird.f32 %v5384_v27 }
 0x34d   :  { %v919_v52 = vmax.f32 %v903_v59, 0.0  ;;  %v1718_v45 = vmul.f32 %v5384_v27, %v1717_v60  ;;  %v5406_v26 = vpop.eup %4134  ;;  %v1028_v60 = vsel %vm5422_vm13, %v5349_v51, %v1024_v24  ;;  %vm5493_vm3 = vmor %vm1722_vm14, %vm1723_vm1 }
 0x34e   :  { %v788_v35 = vpop.xlane.xlu2 %787  ;;  %v1457_v41 = vpop.xlane.xlu0 %1456  ;;  %v904_v32 = vsub.f32 %v872_v63, %v888_v1  ;;  %v1030_v29 = vmul.f32 %v5406_v26, %v5366_v4  ;;  %v5430_v63 = vadd.f32 %v1177_v43, %v7119_v56  ;;  %vm1036_vm15 = vweird.f32 %v5406_v26  ;;  %v7121_v56 = vld [vmem:[#allocation25_spill] sm:$0xff] }
 0x34f   :  { %v5410_v8 = vadd.f32 1e-05, %v919_v52  ;;  %v1719_v61 = vmul.f32 0.5, %v1718_v45  ;;  %v5438_v39 = vmul.f32 0.03125, %v788_v35  ;;  %v5440_v52 = vmul.f32 0.03125, %v1457_v41  ;;  %v7120_v41 = vld [vmem:[#allocation23_spill] sm:$0xff]  ;;  %vm5471_vm2 = vmor %vm1035_vm0, %vm1036_vm15 }
 0x350   :  { %v920_v21 = vmax.f32 %v904_v32, 0.0  ;;  %v1031_v58 = vmul.f32 %v5406_v26, %v1030_v29  ;;  %v1178_v45 = vmax.f32 %v1162_v57, 0.0  ;;  %v1831_v51 = vadd.f32 %v5023_v17, %v1812_v47 }
 0x351   :  { %4136 = vrsqrt.f32 %v5410_v8  ;;  %v1499_v59 = vpop.xlane.xlu1 %1498  ;;  %v1720_v32 = vsub.f32 1.5, %v1719_v61  ;;  %v889_v9 = vmul.f32 %v5438_v39, %v5438_v39  ;;  %v1125_v35 = vmul.f32 %v1028_v60, %v933_v15  ;;  %v7124_v60 = vld [vmem:[#allocation27_spill] sm:$0xff] }
 0x352   :  { %v5436_v2 = vadd.f32 1e-05, %v920_v21  ;;  %v1032_v1 = vmul.f32 0.5, %v1031_v58  ;;  %v1538_v43 = vmul.f32 0.03125, %v1499_v59  ;;  %v5451_v29 = vadd.f32 %v1178_v45, %v7120_v41 }
 0x353   :  { %v1847_v58 = vmax.f32 %v1831_v51, 0.0  ;;  %v5460_v47 = vadd.f32 %v1846_v13, %v7121_v56  ;;  %vm1045_vm5 = vweird.f32 %v5410_v8 }
 0x354   :  { %4138 = vrsqrt.f32 %v5436_v2  ;;  %v1033_v24 = vsub.f32 1.5, %v1032_v1  ;;  %v1570_v21 = vsub.f32 %v1538_v43, %v5381_v6  ;;  %v1897_v15 = vpack.c.bf16 %v5451_v29, %v5430_v63 }
 0x355   :  { %v1721_v6 = vmul.f32 %v5384_v27, %v1720_v32  ;;  %v5476_v1 = vadd.f32 %v1847_v58, %v7124_v60  ;;  %v1144_v43 = vmul.f32 %v5090_v5, %v1125_v35  ;;  %vm1055_vm8 = vweird.f32 %v5436_v2 }
 0x356   :  { %v5454_v57 = vpop.xlane.xlu2 %839  ;;  %v836_v61 = vpop.xlane.xlu0 %835  ;;  %v1034_v37 = vmul.f32 %v5406_v26, %v1033_v24  ;;  %v1586_v13 = vmax.f32 %v1570_v21, 0.0  ;;  %v1557_v24 = vmul.f32 %v5440_v52, %v5440_v52  ;;  %1969 = vmatmul.bf16.gmra.mxu2 %v1897_v15 }
 0x357   :  { %v5456_v7 = vpop.eup %4136  ;;  %v873_v59 = vmul.f32 0.03125, %v836_v61  ;;  %v2548_v21 = vpack.c.bf16 %v5476_v1, %v5460_v47  ;;  %v1725_v4 = vsel %vm5493_vm3, %v5384_v27, %v1721_v6  ;;  %v1163_v10 = vadd.f32 %v5120_v40, %v1144_v43  ;;  %v7131_v43 = vld [vmem:[#allocation46_spill] sm:$0xff] }
 0x358   :  { %v1040_v22 = vmul.f32 %v5456_v7, %v5410_v8  ;;  %v1038_v41 = vsel %vm5471_vm2, %v5406_v26, %v1034_v37  ;;  %v5485_v56 = vadd.f32 1e-05, %v1586_v13  ;;  %vm1046_vm4 = vweird.f32 %v5456_v7  ;;  %v7130_v8 = vld [vmem:[#allocation45_spill] sm:$0xff] }
 0x359   :  { %v905_v45 = vsub.f32 %v873_v59, %v889_v9  ;;  %v1505_v32 = vpop.xlane.xlu1 %1504  ;;  %v7127_v59 = vld [vmem:[#allocation44_spill] sm:$0xff]  ;;  %v1126_v15 = vmul.f32 %v1038_v41, %v934_v19  ;;  %2624 = vmatmul.bf16.gmra.mxu0 %v2548_v21  ;;  %v1795_v41 = vmul.f32 %v1725_v4, %v1603_v25  ;;  %vm5521_vm6 = vmor %vm1045_vm5, %vm1046_vm4  ;;  %v1179_v4 = vmax.f32 %v1163_v10, 0.0 }
 0x35a   :  { %v1041_v51 = vmul.f32 %v5456_v7, %v1040_v22  ;;  %v4139_v61 = vpop.eup %4138  ;;  %v1541_v58 = vmul.f32 0.03125, %v1505_v32  ;;  %v935_v22 = vsub.f32 %v7127_v59, %v5368_v12  ;;  %4140 = vrsqrt.f32 %v5485_v56 }
 0x35b   :  { %v921_v9 = vmax.f32 %v905_v45, 0.0  ;;  %v1050_v37 = vmul.f32 %v4139_v61, %v5436_v2  ;;  %v1145_v32 = vmul.f32 %v5090_v5, %v1126_v15  ;;  %vm1056_vm7 = vweird.f32 %v4139_v61 }
 0x35c   :  { %v1042_v26 = vmul.f32 0.5, %v1041_v51  ;;  %v1573_v13 = vsub.f32 %v1541_v58, %v1557_v24  ;;  %v937_v58 = vsub.f32 %v7131_v43, %v5438_v39  ;;  %vm1057_vm9 = vmor %vm1055_vm8, %vm1056_vm7  ;;  %vm1712_vm10 = vweird.f32 %v5485_v56 }
 0x35d   :  { %v5507_v36 = vadd.f32 1e-05, %v921_v9  ;;  %v1051_v12 = vmul.f32 %v4139_v61, %v1050_v37  ;;  %v1164_v24 = vadd.f32 %v5120_v40, %v1145_v32  ;;  %v936_v9 = vsub.f32 %v7130_v8, %v5387_v11 }
 0x35e   :  { %v1043_v60 = vsub.f32 1.5, %v1042_v26  ;;  %v794_v45 = vpop.xlane.xlu2 %793  ;;  %v790_v51 = vpop.xlane.xlu0 %789  ;;  %v1589_v14 = vmax.f32 %v1573_v13, 0.0  ;;  %v7151_v39 = vsub.f32 %v7132_v18, %v5440_v52 }
 0x35f   :  { %4142 = vrsqrt.f32 %v5507_v36  ;;  %v1052_v27 = vmul.f32 0.5, %v1051_v12  ;;  %v5515_v6 = vmul.f32 0.03125, %v790_v51  ;;  %v1814_v51 = vmul.f32 %v5010_v50, %v1795_v41  ;;  %v7135_v50 = vld [vmem:[#allocation26_spill] sm:$0xff] }
 0x360   :  { %v1044_v19 = vmul.f32 %v5456_v7, %v1043_v60  ;;  %v5529_v35 = vadd.f32 1e-05, %v1589_v14  ;;  %v5536_v37 = vpop.eup %4140  ;;  %v1180_v60 = vmax.f32 %v1164_v24, 0.0  ;;  %v875_v14 = vmul.f32 0.03125, %v5454_v57 }
 0x361   :  { %v1053_v26 = vsub.f32 1.5, %v1052_v27  ;;  %v838_v25 = vpop.xlane.xlu1 %837  ;;  %v890_v11 = vmul.f32 %v5515_v6, %v5515_v6  ;;  %vm1713_vm11 = vweird.f32 %v5536_v37  ;;  %vm1065_vm12 = vweird.f32 %v5507_v36 }
 0x362   :  { %v1048_v59 = vsel %vm5521_vm6, %v5456_v7, %v1044_v19  ;;  %4144 = vrsqrt.f32 %v5529_v35  ;;  %v874_v15 = vmul.f32 0.03125, %v838_v25  ;;  %v1707_v7 = vmul.f32 %v5536_v37, %v5485_v56  ;;  %vm1714_vm13 = vmor %vm1712_vm10, %vm1713_vm11 }
 0x363   :  { %v1054_v13 = vmul.f32 %v4139_v61, %v1053_v26  ;;  %v1127_v32 = vmul.f32 %v1048_v59, %v935_v22  ;;  %v7133_v26 = vld [vmem:[#allocation24_spill] sm:$0xff]  ;;  %v5557_v22 = vadd.f32 %v1180_v60, %v7135_v50  ;;  %v7138_v50 = vld [vmem:[#allocation50_spill] sm:$0xff]  ;;  %vm1742_vm14 = vweird.f32 %v5529_v35 }
 0x364   :  { %v906_v19 = vsub.f32 %v874_v15, %v890_v11  ;;  %v1708_v10 = vmul.f32 %v5536_v37, %v1707_v7  ;;  %v5554_v25 = vadd.f32 %v1179_v4, %v7133_v26 }
 0x365   :  { %v5544_v12 = vpop.eup %4142  ;;  %v1058_v27 = vsel %vm1057_vm9, %v4139_v61, %v1054_v13  ;;  %7136 = vst [vmem:[#allocation23_spill] sm:$0xff] %v5557_v22  ;;  %v5560_v61 = vmul.f32 0.03125, %v794_v45  ;;  %v1146_v13 = vmul.f32 %v5090_v5, %v1127_v32  ;;  %v1833_v32 = vadd.f32 %v5023_v17, %v1814_v51 }
 0x366   :  { %v1060_v2 = vmul.f32 %v5544_v12, %v5507_v36  ;;  %v1503_v21 = vpop.xlane.xlu0 %1502  ;;  %v1128_v24 = vmul.f32 %v1058_v27, %v936_v9  ;;  %v922_v8 = vmax.f32 %v906_v19, 0.0  ;;  %7134 = vst [vmem:[#allocation22_spill] sm:$0xff] %v5554_v25  ;;  %v1709_v41 = vmul.f32 0.5, %v1708_v10  ;;  %v1461_v59 = vpop.xlane.xlu2 %1460  ;;  %v7146_v36 = vld [vmem:[#allocation28_spill] sm:$0xff] }
 0x367   :  { %v1540_v11 = vmul.f32 0.03125, %v1503_v21  ;;  %v1898_v4 = vpack.c.bf16 %v5557_v22, %v5554_v25  ;;  %v892_v10 = vmul.f32 %v5560_v61, %v5560_v61  ;;  %v1165_v17 = vadd.f32 %v5120_v40, %v1146_v13 }
 0x368   :  { %v1061_v57 = vmul.f32 %v5544_v12, %v1060_v2  ;;  %v5562_v15 = vpop.eup %4144  ;;  %v1147_v9 = vmul.f32 %v5090_v5, %v1128_v24  ;;  %v5566_v7 = vadd.f32 1e-05, %v922_v8  ;;  %v1710_v60 = vsub.f32 1.5, %v1709_v41  ;;  %v7137_v24 = vld [vmem:[#allocation49_spill] sm:$0xff] }
 0x369   :  { %v1737_v45 = vmul.f32 %v5562_v15, %v5529_v35  ;;  %v792_v27 = vpop.xlane.xlu1 %791  ;;  %1974 = vmatmul.bf16.gmra.mxu2 %v1898_v4  ;;  %v1572_v5 = vsub.f32 %v1540_v11, %v5415_v23  ;;  %vm1066_vm15 = vweird.f32 %v5544_v12  ;;  %v5596_v56 = vmul.f32 0.03125, %v1461_v59 }
 0x36a   :  { %v1062_v19 = vmul.f32 0.5, %v1061_v57  ;;  %4146 = vrsqrt.f32 %v5566_v7  ;;  %v1711_v2 = vmul.f32 %v5536_v37, %v1710_v60  ;;  %v5583_v26 = vmul.f32 0.03125, %v792_v27  ;;  %vm5634_vm2 = vmor %vm1065_vm12, %vm1066_vm15 }
 0x36b   :  { %v1738_v21 = vmul.f32 %v5562_v15, %v1737_v45  ;;  %v1588_v23 = vmax.f32 %v1572_v5, 0.0  ;;  %v1166_v51 = vadd.f32 %v5120_v40, %v1147_v9  ;;  %v1849_v5 = vmax.f32 %v1833_v32, 0.0 }
 0x36c   :  { %v1715_v57 = vsel %vm1714_vm13, %v5536_v37, %v1711_v2  ;;  %v1063_v11 = vsub.f32 1.5, %v1062_v19  ;;  %v891_v60 = vmul.f32 %v5583_v26, %v5583_v26  ;;  %vm1743_vm0 = vweird.f32 %v5562_v15 }
 0x36d   :  { %v1739_v4 = vmul.f32 0.5, %v1738_v21  ;;  %v5598_v27 = vadd.f32 1e-05, %v1588_v23  ;;  %v1794_v40 = vmul.f32 %v1715_v57, %v1602_v3  ;;  %v1559_v2 = vmul.f32 %v5596_v56, %v5596_v56  ;;  %v7139_v23 = vld [vmem:[#allocation51_spill] sm:$0xff]  ;;  %vm5656_vm3 = vmor %vm1742_vm14, %vm1743_vm0 }
 0x36e   :  { %v842_v45 = vpop.xlane.xlu0 %841  ;;  %v907_v13 = vsub.f32 %v875_v14, %v891_v60  ;;  %v1182_v59 = vmax.f32 %v1166_v51, 0.0  ;;  %v1064_v21 = vmul.f32 %v5544_v12, %v1063_v11  ;;  %v1507_v0 = vpop.xlane.xlu2 %1506  ;;  %v1181_v14 = vmax.f32 %v1165_v17, 0.0  ;;  %v5627_v17 = vld [vmem:[%s6985_s6 + $0x2] ss:$0 sm:$0xff] }
 0x36f   :  { %v1740_v37 = vsub.f32 1.5, %v1739_v4  ;;  %v876_v9 = vmul.f32 0.03125, %v842_v45  ;;  %4148 = vrsqrt.f32 %v5598_v27  ;;  %vm1075_vm1 = vweird.f32 %v5566_v7  ;;  %v7140_v45 = vld [vmem:[#allocation31_spill] sm:$0xff] }
 0x370   :  { %v5603_v19 = vpop.eup %4146  ;;  %v923_v49 = vmax.f32 %v907_v13, 0.0  ;;  %v5618_v8 = vadd.f32 %v1849_v5, %v7140_v45  ;;  %v1813_v13 = vmul.f32 %v5627_v17, %v1794_v40  ;;  %v1542_v5 = vmul.f32 0.03125, %v1507_v0 }
 0x371   :  { %v1070_v32 = vmul.f32 %v5603_v19, %v5566_v7  ;;  %v1459_v3 = vpop.xlane.xlu1 %1458  ;;  %v908_v4 = vsub.f32 %v876_v9, %v892_v10  ;;  %v1741_v51 = vmul.f32 %v5562_v15, %v1740_v37  ;;  %v1068_v40 = vsel %vm5634_vm2, %v5544_v12, %v1064_v21 }
 0x372   :  { %v5615_v60 = vmul.f32 0.03125, %v1459_v3  ;;  %7141 = vst [vmem:[#allocation25_spill] sm:$0xff] %v5618_v8  ;;  %v5622_v20 = vadd.f32 1e-05, %v923_v49  ;;  %v5648_v45 = vadd.f32 %v1181_v14, %v7146_v36  ;;  %vm1076_vm4 = vweird.f32 %v5603_v19  ;;  %v7150_v36 = vld [vmem:[#allocation48_spill] sm:$0xff] }
 0x373   :  { %v1071_v11 = vmul.f32 %v5603_v19, %v1070_v32  ;;  %v924_v37 = vmax.f32 %v908_v4, 0.0  ;;  %v7144_v32 = vld [vmem:[#allocation30_spill] sm:$0xff]  ;;  %v5662_v4 = vld [vmem:[#allocation13 + $0x2] ss:$0 sm:$0xff]  ;;  %vm5694_vm5 = vmor %vm1075_vm1, %vm1076_vm4  ;;  %vm1732_vm6 = vweird.f32 %v5598_v27 }
 0x374   :  { %v1558_v9 = vmul.f32 %v5615_v60, %v5615_v60  ;;  %v5641_v49 = vadd.f32 %v1182_v59, %v7144_v32  ;;  %4150 = vrsqrt.f32 %v5622_v20  ;;  %7147 = vst [vmem:[#allocation44_spill] sm:$0xff] %v5648_v45  ;;  %v1832_v14 = vadd.f32 %v5662_v4, %v1813_v13 }
 0x375   :  { %v1072_v3 = vmul.f32 0.5, %v1071_v11  ;;  %v5650_v41 = vpop.eup %4148  ;;  %v5660_v0 = vadd.f32 1e-05, %v924_v37  ;;  %v1745_v11 = vsel %vm5656_vm3, %v5562_v15, %v1741_v51  ;;  %v1129_v13 = vmul.f32 %v1068_v40, %v937_v58  ;;  %v7157_v58 = vld [vmem:[#allocation52_spill] sm:$0xff] }
 0x376   :  { %7145 = vst [vmem:[#allocation27_spill] sm:$0xff] %v5641_v49  ;;  %v1509_v57 = vpop.xlane.xlu0 %1508  ;;  %v1574_v12 = vsub.f32 %v1542_v5, %v1558_v9  ;;  %v1727_v35 = vmul.f32 %v5650_v41, %v5598_v27  ;;  %v1848_v51 = vmax.f32 %v1832_v14, 0.0  ;;  %v1797_v43 = vmul.f32 %v1745_v11, %v7151_v39 }
 0x377   :  { %v1543_v21 = vmul.f32 0.03125, %v1509_v57  ;;  %v1073_v10 = vsub.f32 1.5, %v1072_v3  ;;  %4152 = vrsqrt.f32 %v5660_v0  ;;  %v1899_v57 = vpack.c.bf16 %v5641_v49, %v5648_v45  ;;  %v846_v3 = vpop.xlane.xlu2 %845 }
 0x378   :  { %v1590_v37 = vmax.f32 %v1574_v12, 0.0  ;;  %v1728_v15 = vmul.f32 %v5650_v41, %v1727_v35  ;;  %v878_v18 = vmul.f32 0.03125, %v846_v3  ;;  %vm1733_vm7 = vweird.f32 %v5650_v41 }
 0x379   :  { %v1575_v5 = vsub.f32 %v1543_v21, %v1559_v2  ;;  %v1074_v9 = vmul.f32 %v5603_v19, %v1073_v10  ;;  %v798_v32 = vpop.xlane.xlu1 %797  ;;  %1979 = vmatmul.bf16.gmra.mxu2 %v1899_v57  ;;  %v7154_v21 = vld [vmem:[#allocation29_spill] sm:$0xff]  ;;  %v5715_v57 = vld [vmem:[%s6985_s6] ss:$0 sm:$0xff]  ;;  %vm1085_vm8 = vweird.f32 %v5622_v20  ;;  %vm5738_vm9 = vmor %vm1732_vm6, %vm1733_vm7  ;;  %vm1095_vm10 = vweird.f32 %v5660_v0 }
 0x37a   :  { %v5681_v62 = vadd.f32 1e-05, %v1590_v37  ;;  %v5683_v49 = vmul.f32 0.03125, %v798_v32  ;;  %v5685_v2 = vpop.eup %4150  ;;  %v1729_v40 = vmul.f32 0.5, %v1728_v15  ;;  %v5700_v14 = vadd.f32 %v1848_v51, %v7154_v21 }
 0x37b   :  { %v1591_v12 = vmax.f32 %v1575_v5, 0.0  ;;  %v1078_v10 = vsel %vm5694_vm5, %v5603_v19, %v1074_v9  ;;  %v1080_v52 = vmul.f32 %v5685_v2, %v5622_v20  ;;  %v1148_v19 = vmul.f32 %v5715_v57, %v1129_v13 }
 0x37c   :  { %7155 = vst [vmem:[#allocation45_spill] sm:$0xff] %v5700_v14  ;;  %4154 = vrsqrt.f32 %v5681_v62  ;;  %v1730_v7 = vsub.f32 1.5, %v1729_v40  ;;  %v2549_v35 = vpack.c.bf16 %v5618_v8, %v5700_v14  ;;  %v894_v15 = vmul.f32 %v5683_v49, %v5683_v49 }
 0x37d   :  { %v5708_v11 = vadd.f32 1e-05, %v1591_v12  ;;  %v5718_v5 = vpop.eup %4152  ;;  %v1081_v9 = vmul.f32 %v5685_v2, %v1080_v52  ;;  %v7156_v32 = vsub.f32 %v7138_v50, %v5515_v6  ;;  %vm1086_vm11 = vweird.f32 %v5685_v2 }
 0x37e   :  { %v796_v37 = vpop.xlane.xlu0 %795  ;;  %v1731_v12 = vmul.f32 %v5650_v41, %v1730_v7  ;;  %v1090_v13 = vmul.f32 %v5718_v5, %v5660_v0  ;;  %2629 = vmatmul.bf16.gmra.mxu0 %v2549_v35  ;;  %v910_v21 = vsub.f32 %v878_v18, %v894_v15  ;;  %v5746_v7 = vld [vmem:[#allocation13] ss:$0 sm:$0xff]  ;;  %v1816_v6 = vmul.f32 %v5627_v17, %v1797_v43  ;;  %vm5771_vm12 = vmor %vm1085_vm8, %vm1086_vm11  ;;  %v7168_v0 = vld [vmem:[#allocation34_spill] sm:$0xff] }
 0x37f   :  { %v5724_v51 = vmul.f32 0.03125, %v796_v37  ;;  %v1130_v3 = vmul.f32 %v1078_v10, %v7156_v32  ;;  %4156 = vrsqrt.f32 %v5708_v11  ;;  %v1082_v39 = vmul.f32 0.5, %v1081_v9  ;;  %v1511_v40 = vpop.xlane.xlu2 %1510 }
 0x380   :  { %v1091_v50 = vmul.f32 %v5718_v5, %v1090_v13  ;;  %v1167_v35 = vadd.f32 %v5746_v7, %v1148_v19  ;;  %v1735_v27 = vsel %vm5738_vm9, %v5650_v41, %v1731_v12  ;;  %v926_v9 = vmax.f32 %v910_v21, 0.0 }
 0x381   :  { %v893_v10 = vmul.f32 %v5724_v51, %v5724_v51  ;;  %v844_v52 = vpop.xlane.xlu1 %843  ;;  %v1083_v18 = vsub.f32 1.5, %v1082_v39  ;;  %v1149_v59 = vmul.f32 %v5715_v57, %v1130_v3  ;;  %v7160_v12 = vsub.f32 %v4884_v38, %v5403_v46 }
 0x382   :  { %v5749_v37 = vpop.eup %4154  ;;  %v877_v15 = vmul.f32 0.03125, %v844_v52  ;;  %v1092_v32 = vmul.f32 0.5, %v1091_v50  ;;  %v5759_v45 = vadd.f32 1e-05, %v926_v9  ;;  %vm1096_vm13 = vweird.f32 %v5718_v5 }
 0x383   :  { %v1747_v13 = vmul.f32 %v5749_v37, %v5681_v62  ;;  %v1084_v19 = vmul.f32 %v5685_v2, %v1083_v18  ;;  %v1796_v39 = vmul.f32 %v1735_v27, %v7160_v12  ;;  %v1168_v8 = vadd.f32 %v5746_v7, %v1149_v59  ;;  %vm5793_vm0 = vmor %vm1095_vm10, %vm1096_vm13 }
 0x384   :  { %v909_v22 = vsub.f32 %v877_v15, %v893_v10  ;;  %v1093_v21 = vsub.f32 1.5, %v1092_v32  ;;  %4158 = vrsqrt.f32 %v5759_v45  ;;  %v1544_v38 = vmul.f32 0.03125, %v1511_v40 }
 0x385   :  { %v4157_v41 = vpop.eup %4156  ;;  %v1748_v50 = vmul.f32 %v5749_v37, %v1747_v13  ;;  %v1088_v46 = vsel %vm5771_vm12, %v5685_v2, %v1084_v19  ;;  %v1183_v27 = vmax.f32 %v1167_v35, 0.0  ;;  %v1184_v15 = vmax.f32 %v1168_v8, 0.0 }
 0x386   :  { %v1463_v52 = vpop.xlane.xlu0 %1462  ;;  %v1757_v43 = vmul.f32 %v4157_v41, %v5708_v11  ;;  %v1094_v59 = vmul.f32 %v5718_v5, %v1093_v21  ;;  %v925_v18 = vmax.f32 %v909_v22, 0.0  ;;  %vm1753_vm14 = vweird.f32 %v5749_v37 }
 0x387   :  { %v1749_v10 = vmul.f32 0.5, %v1748_v50  ;;  %v5782_v9 = vmul.f32 0.03125, %v1463_v52  ;;  %vm1763_vm15 = vweird.f32 %v4157_v41  ;;  %v1815_v40 = vmul.f32 %v5627_v17, %v1796_v39 }
 0x388   :  { %v1758_v20 = vmul.f32 %v4157_v41, %v1757_v43  ;;  %v7163_v12 = vsub.f32 %v7150_v36, %v5583_v26  ;;  %v5797_v35 = vadd.f32 1e-05, %v925_v18  ;;  %v1098_v39 = vsel %vm5793_vm0, %v5718_v5, %v1094_v59  ;;  %v7166_v36 = vld [vmem:[#allocation32_spill] sm:$0xff] }
 0x389   :  { %v1750_v32 = vsub.f32 1.5, %v1749_v10  ;;  %v1465_v13 = vpop.xlane.xlu1 %1464  ;;  %v1560_v19 = vmul.f32 %v5782_v9, %v5782_v9  ;;  %v5806_v21 = vadd.f32 %v1183_v27, %v7166_v36  ;;  %v5809_v50 = vadd.f32 %v1184_v15, %v7168_v0 }
 0x38a   :  { %v1131_v2 = vmul.f32 %v1088_v46, %v7163_v12  ;;  %v1759_v8 = vmul.f32 0.5, %v1758_v20  ;;  %v4159_v52 = vpop.eup %4158  ;;  %4160 = vrsqrt.f32 %v5797_v35  ;;  %v5812_v46 = vmul.f32 0.03125, %v1465_v13 }
 0x38b   :  { %v1751_v26 = vmul.f32 %v5749_v37, %v1750_v32  ;;  %7167 = vst [vmem:[#allocation46_spill] sm:$0xff] %v5806_v21  ;;  %v1576_v43 = vsub.f32 %v1544_v38, %v1560_v19  ;;  %vm1752_vm1 = vweird.f32 %v5681_v62  ;;  %vm1762_vm2 = vweird.f32 %v5708_v11 }
 0x38c   :  { %7169 = vst [vmem:[#allocation47_spill] sm:$0xff] %v5809_v50  ;;  %v1760_v3 = vsub.f32 1.5, %v1759_v8  ;;  %v1110_v5 = vmul.f32 %v4159_v52, %v5759_v45  ;;  %v1900_v59 = vpack.c.bf16 %v5809_v50, %v5806_v21  ;;  %v7170_v27 = vsub.f32 %v7137_v24, %v5560_v61  ;;  %vm5824_vm3 = vmor %vm1752_vm1, %vm1753_vm14 }
 0x38d   :  { %v1592_v62 = vmax.f32 %v1576_v43, 0.0  ;;  %v1561_v11 = vmul.f32 %v5812_v46, %v5812_v46  ;;  %v1755_v15 = vsel %vm5824_vm3, %v5749_v37, %v1751_v26  ;;  %vm1764_vm4 = vmor %vm1762_vm2, %vm1763_vm15  ;;  %v1834_v61 = vadd.f32 %v5662_v4, %v1815_v40 }
 0x38e   :  { %v1513_v10 = vpop.xlane.xlu0 %1512  ;;  %v1132_v20 = vmul.f32 %v1098_v39, %v7170_v27  ;;  %v1761_v18 = vmul.f32 %v4157_v41, %v1760_v3  ;;  %v1111_v32 = vmul.f32 %v4159_v52, %v1110_v5  ;;  %1984 = vmatmul.bf16.gmra.mxu2 %v1900_v59  ;;  %v1835_v24 = vadd.f32 %v5662_v4, %v1816_v6  ;;  %v7175_v5 = vld [vmem:[#allocation33_spill] sm:$0xff] }
 0x38f   :  { %v1150_v13 = vmul.f32 %v5715_v57, %v1131_v2  ;;  %v5837_v22 = vadd.f32 1e-05, %v1592_v62  ;;  %v1545_v8 = vmul.f32 0.03125, %v1513_v10  ;;  %v7173_v19 = vsub.f32 %v7139_v23, %v5596_v56  ;;  %v7177_v23 = vld [vmem:[#allocation35_spill] sm:$0xff] }
 0x390   :  { %v1765_v12 = vsel %vm1764_vm4, %v4157_v41, %v1761_v18  ;;  %v1112_v36 = vmul.f32 0.5, %v1111_v32  ;;  %v1850_v37 = vmax.f32 %v1834_v61, 0.0  ;;  %v1851_v26 = vmax.f32 %v1835_v24, 0.0  ;;  %v4161_v0 = vpop.eup %4160  ;;  %v7179_v32 = vld [vmem:[#allocation53_spill] sm:$0xff] }
 0x391   :  { %v1799_v39 = vmul.f32 %v1765_v12, %v7173_v19  ;;  %v7174_v3 = vsub.f32 %v7157_v58, %v5615_v60  ;;  %4162 = vrsqrt.f32 %v5837_v22  ;;  %v1577_v6 = vsub.f32 %v1545_v8, %v1561_v11 }
 0x392   :  { %v1151_v41 = vmul.f32 %v5715_v57, %v1132_v20  ;;  %v1113_v2 = vsub.f32 1.5, %v1112_v36  ;;  %vm1116_vm5 = vweird.f32 %v4159_v52  ;;  %v1100_v43 = vmul.f32 %v4161_v0, %v5797_v35 }
 0x393   :  { %v1798_v40 = vmul.f32 %v1755_v15, %v7174_v3  ;;  %v5849_v56 = vadd.f32 %v1850_v37, %v7175_v5  ;;  %v5852_v59 = vadd.f32 %v1851_v26, %v7177_v23  ;;  %v1593_v10 = vmax.f32 %v1577_v6, 0.0  ;;  %v7180_v37 = vld [vmem:[#allocation38_spill] sm:$0xff] }
 0x394   :  { %v1169_v27 = vadd.f32 %v5746_v7, %v1150_v13  ;;  %v1170_v60 = vadd.f32 %v5746_v7, %v1151_v41  ;;  %v1114_v58 = vmul.f32 %v4159_v52, %v1113_v2  ;;  %vm1115_vm6 = vweird.f32 %v5759_v45  ;;  %v7184_v41 = vld [vmem:[#allocation54_spill] sm:$0xff] }
 0x395   :  { %7176 = vst [vmem:[#allocation24_spill] sm:$0xff] %v5849_v56  ;;  %v1101_v38 = vmul.f32 %v4161_v0, %v1100_v43  ;;  %v1818_v20 = vmul.f32 %v5627_v17, %v1799_v39  ;;  %v1817_v18 = vmul.f32 %v5627_v17, %v1798_v40  ;;  %vm1117_vm7 = vmor %vm1115_vm6, %vm1116_vm5  ;;  %v2550_v62 = vpack.c.bf16 %v5852_v59, %v5849_v56 }
 0x396   :  { %7178 = vst [vmem:[#allocation26_spill] sm:$0xff] %v5852_v59  ;;  %v1625_v11 = vadd.f32 1e-05, %v1593_v10  ;;  %v1186_v15 = vmax.f32 %v1170_v60, 0.0  ;;  %v942_v61 = vsub.f32 %v7179_v32, %v5683_v49  ;;  %v1118_v24 = vsel %vm1117_vm7, %v4159_v52, %v1114_v58  ;;  %v7182_v52 = vld [vmem:[#allocation36_spill] sm:$0xff] }
 0x397   :  { %v1102_v13 = vmul.f32 0.5, %v1101_v38  ;;  %v1185_v12 = vmax.f32 %v1169_v27, 0.0  ;;  %v4163_v8 = vpop.eup %4162  ;;  %vm1106_vm8 = vweird.f32 %v4161_v0  ;;  %2634 = vmatmul.bf16.gmra.mxu0 %v2550_v62  ;;  %v1837_v45 = vadd.f32 %v5662_v4, %v1818_v20 }
 0x398   :  { %4164 = vrsqrt.f32 %v1625_v11  ;;  %v1134_v19 = vmul.f32 %v1118_v24, %v942_v61  ;;  %v1767_v36 = vmul.f32 %v4163_v8, %v5837_v22  ;;  %v5866_v26 = vadd.f32 %v1186_v15, %v7180_v37  ;;  %v7187_v24 = vld [vmem:[#allocation37_spill] sm:$0xff] }
 0x399   :  { %v1103_v39 = vsub.f32 1.5, %v1102_v13  ;;  %v1836_v3 = vadd.f32 %v5662_v4, %v1817_v18  ;;  %vm1105_vm9 = vweird.f32 %v5797_v35  ;;  %v5871_v6 = vadd.f32 %v1185_v12, %v7182_v52  ;;  %v7185_v18 = vld [vmem:[#allocation39_spill] sm:$0xff] }
 0x39a   :  { %7181 = vst [vmem:[#allocation49_spill] sm:$0xff] %v5866_v26  ;;  %v1768_v49 = vmul.f32 %v4163_v8, %v1767_v36  ;;  %v941_v2 = vsub.f32 %v7184_v41, %v5724_v51  ;;  %vm1107_vm10 = vmor %vm1105_vm9, %vm1106_vm8  ;;  %v1853_v43 = vmax.f32 %v1837_v45, 0.0  ;;  %v1153_v27 = vmul.f32 %v5715_v57, %v1134_v19 }
 0x39b   :  { %v1104_v40 = vmul.f32 %v4161_v0, %v1103_v39  ;;  %7183 = vst [vmem:[#allocation50_spill] sm:$0xff] %v5871_v6  ;;  %v1901_v10 = vpack.c.bf16 %v5866_v26, %v5871_v6  ;;  %v1852_v38 = vmax.f32 %v1836_v3, 0.0  ;;  %vm1773_vm11 = vweird.f32 %v4163_v8 }
 0x39c   :  { %v1769_v23 = vmul.f32 0.5, %v1768_v49  ;;  %v5879_v62 = vadd.f32 %v1853_v43, %v7185_v18  ;;  %vm1772_vm12 = vweird.f32 %v5837_v22  ;;  %v1172_v32 = vadd.f32 %v5746_v7, %v1153_v27  ;;  %v7191_v49 = vld [vmem:[#allocation42_spill] sm:$0xff]  ;;  %v7195_v27 = vld [vmem:[#allocation43_spill] sm:$0xff] }
 0x39d   :  { %v1108_v5 = vsel %vm1107_vm10, %v4161_v0, %v1104_v40  ;;  %v1608_v61 = vsub.f32 %v5021_v30, %v5782_v9  ;;  %vm1774_vm13 = vmor %vm1772_vm12, %vm1773_vm11  ;;  %v5887_v13 = vadd.f32 %v1852_v38, %v7187_v24  ;;  %vm1782_vm15 = vweird.f32 %v1625_v11  ;;  %v7189_v30 = vld [vmem:[#allocation40_spill] sm:$0xff] }
 0x39e   :  { %v4165_v60 = vpop.eup %4164  ;;  %v1133_v58 = vmul.f32 %v1108_v5, %v941_v2  ;;  %v1770_v35 = vsub.f32 1.5, %v1769_v23  ;;  %1989 = vmatmul.bf16.gmra.mxu2 %v1901_v10  ;;  %7186 = vst [vmem:[#allocation51_spill] sm:$0xff] %v5879_v62  ;;  %v1188_v37 = vmax.f32 %v1172_v32, 0.0 }
 0x39f   :  { %v1777_v20 = vmul.f32 %v4165_v60, %v1625_v11  ;;  %7188 = vst [vmem:[#allocation31_spill] sm:$0xff] %v5887_v13  ;;  %vm1783_vm14 = vweird.f32 %v4165_v60 }
 0x3a0   :  { %v1152_v51 = vmul.f32 %v5715_v57, %v1133_v58  ;;  %v1771_v15 = vmul.f32 %v4163_v8, %v1770_v35  ;;  %v2551_v57 = vpack.c.bf16 %v5879_v62, %v5887_v13  ;;  %vm1784_vm0 = vmor %vm1782_vm15, %vm1783_vm14  ;;  %v5899_v52 = vadd.f32 %v1188_v37, %v7191_v49  ;;  %v5914_v35 = vpop.f32.mrf.mxu0 }
 0x3a1   :  { %v1778_v0 = vmul.f32 %v4165_v60, %v1777_v20 }
 0x3a2   :  { %v1171_v12 = vadd.f32 %v5746_v7, %v1152_v51  ;;  %v1775_v45 = vsel %vm1774_vm13, %v4163_v8, %v1771_v15  ;;  %v1609_v7 = vsub.f32 %v5096_v48, %v5812_v46  ;;  %7192 = vst [vmem:[#allocation28_spill] sm:$0xff] %v5899_v52  ;;  %v7193_v48 = vld [vmem:[#allocation41_spill] sm:$0xff] }
 0x3a3   :  { %v1779_v19 = vmul.f32 0.5, %v1778_v0  ;;  %v1800_v39 = vmul.f32 %v1775_v45, %v1608_v61 }
 0x3a4   :  { %v1187_v36 = vmax.f32 %v1171_v12, 0.0 }
 0x3a5   :  { %v1780_v22 = vsub.f32 1.5, %v1779_v19  ;;  %v1819_v3 = vmul.f32 %v5627_v17, %v1800_v39 }
 0x3a6   :  { %v5894_v9 = vadd.f32 %v1187_v36, %v7189_v30 }
 0x3a7   :  { %v1781_v40 = vmul.f32 %v4165_v60, %v1780_v22  ;;  %2639 = vmatmul.bf16.gmra.mxu0 %v2551_v57  ;;  %v1838_v2 = vadd.f32 %v5662_v4, %v1819_v3 }
 0x3a8   :  { %7190 = vst [vmem:[#allocation30_spill] sm:$0xff] %v5894_v9  ;;  %v1902_v43 = vpack.c.bf16 %v5899_v52, %v5894_v9 }
 0x3a9   :  { %v1785_v8 = vsel %vm1784_vm0, %v4165_v60, %v1781_v40  ;;  %v1854_v23 = vmax.f32 %v1838_v2, 0.0 }
 0x3aa   :  { %v1801_v41 = vmul.f32 %v1785_v8, %v1609_v7  ;;  %v1960_v38 = vpop.f32.mrf.mxu2 }
 0x3ab   :  { %v5907_v46 = vadd.f32 %v1854_v23, %v7193_v48  ;;  %v4235_v48 = vld [vmem:[#allocation3 + $0x80] sm:$0xff] }
 0x3ac   :  { %v1820_v11 = vmul.f32 %v5627_v17, %v1801_v41  ;;  %v2612_v17 = vpop.f32.mrf.mxu0 }
 0x3ad   :  { %7194 = vst [vmem:[#allocation48_spill] sm:$0xff] %v5907_v46 }
 0x3ae   :  { %v1839_v5 = vadd.f32 %v5662_v4, %v1820_v11  ;;  %1994 = vmatmul.bf16.gmra.mxu2 %v1902_v43 }
 0x3b0   :  { %v1855_v10 = vmax.f32 %v1839_v5, 0.0 }
 0x3b2   :  { %v5910_v60 = vadd.f32 %v1855_v10, %v7195_v27  ;;  %v1962_v20 = vpop.f32.mrf.mxu2  ;;  %v4234_v10 = vld [vmem:[#allocation3] sm:$0xff]  ;;  %v4236_v27 = vld [vmem:[#allocation3 + $0x8] sm:$0xff] }
 0x3b4   :  { %7196 = vst [vmem:[#allocation29_spill] sm:$0xff] %v5910_v60  ;;  %v2552_v58 = vpack.c.bf16 %v5910_v60, %v5907_v46  ;;  %v2615_v4 = vpop.f32.mrf.mxu0 }
 0x3b7   :  { %2644 = vmatmul.bf16.gmra.mxu0 %v2552_v58  ;;  %v4237_v58 = vld [vmem:[#allocation3 + $0x88] sm:$0xff] }
 0x3bc   :  { %v2617_v15 = vpop.f32.mrf.mxu0 }
 0x3be   :  { %v1965_v18 = vpop.f32.mrf.mxu2 }
 0x3c4   :  { %v2620_v32 = vpop.f32.mrf.mxu0 }
 0x3c6   :  { %v1967_v51 = vpop.f32.mrf.mxu2 }
 0x3cc   :  { %v2622_v24 = vpop.f32.mrf.mxu0 }
 0x3d6   :  { %v2625_v45 = vpop.f32.mrf.mxu0 }
 0x3d9   :  { %v1970_v0 = vpop.f32.mrf.mxu2 }
 0x3de   :  { %v2627_v39 = vpop.f32.mrf.mxu0 }
 0x3e1   :  { %v1972_v61 = vpop.f32.mrf.mxu2 }
 0x3ec   :  { %v1975_v12 = vpop.f32.mrf.mxu2 }
 0x3f4   :  { %v1977_v19 = vpop.f32.mrf.mxu2 }
 0x3fb   :  { %v2630_v36 = vpop.f32.mrf.mxu0 }
 0x3fc   :  { %v1980_v57 = vpop.f32.mrf.mxu2 }
 0x403   :  { %v2632_v37 = vpop.f32.mrf.mxu0 }
 0x404   :  { %v1982_v22 = vpop.f32.mrf.mxu2 }
 0x411   :  { %v1985_v3 = vpop.f32.mrf.mxu2 }
 0x414   :  { %v2635_v40 = vpop.f32.mrf.mxu0 }
 0x419   :  { %v1987_v30 = vpop.f32.mrf.mxu2 }
 0x41c   :  { %v2637_v7 = vpop.f32.mrf.mxu0 }
 0x421   :  { %v1990_v8 = vpop.f32.mrf.mxu2 }
 0x424   :  { %v2640_v49 = vpop.f32.mrf.mxu0 }
 0x429   :  { %v1992_v41 = vpop.f32.mrf.mxu2 }
 0x42c   :  { %v2642_v2 = vpop.f32.mrf.mxu0 }
 0x431   :  { %v1995_v43 = vpop.f32.mrf.mxu2 }
 0x434   :  { %v2645_v11 = vpop.f32.mrf.mxu0 }
 0x439   :  { %v1997_v5 = vpop.f32.mrf.mxu2 }
 0x43a   :  { %2003 = vmatpush.msrb.mxu3 %v1997_v5 }
 0x43c   :  { %2004 = vmatpush.msrb.mxu3 %v1995_v43  ;;  %v2647_v23 = vpop.f32.mrf.mxu0  ;;  %v5917_v43 = vld [vmem:[#allocation11 + $0x3] ss:$0 sm:$0xff] }
 0x43d   :  { %2653 = vmatpush.msra.mxu1 %v2647_v23 }
 0x43e   :  { %2005 = vmatpush.msrb.mxu3 %v1992_v41  ;;  %v4264_v41 = vld [vmem:[#allocation3 + $0x78] sm:$0xff] }
 0x43f   :  { %2654 = vmatpush.msra.mxu1 %v2645_v11 }
 0x440   :  { %2006 = vmatpush.msrb.mxu3 %v1990_v8  ;;  %v4262_v8 = vld [vmem:[#allocation3 + $0x70] sm:$0xff] }
 0x441   :  { %2655 = vmatpush.msra.mxu1 %v2642_v2  ;;  %v4265_v2 = vld [vmem:[#allocation3 + $0xf8] sm:$0xff] }
 0x442   :  { %2007 = vmatpush.msrb.mxu3 %v1987_v30  ;;  %v4260_v30 = vld [vmem:[#allocation3 + $0x68] sm:$0xff] }
 0x443   :  { %2656 = vmatpush.msra.mxu1 %v2640_v49  ;;  %v4263_v49 = vld [vmem:[#allocation3 + $0xf0] sm:$0xff] }
 0x444   :  { %2008 = vmatpush.msrb.mxu3 %v1985_v3  ;;  %v4258_v3 = vld [vmem:[#allocation3 + $0x60] sm:$0xff] }
 0x445   :  { %2657 = vmatpush.msra.mxu1 %v2637_v7  ;;  %v4261_v7 = vld [vmem:[#allocation3 + $0xe8] sm:$0xff] }
 0x446   :  { %2009 = vmatpush.msrb.mxu3 %v1982_v22  ;;  %v4256_v22 = vld [vmem:[#allocation3 + $0x58] sm:$0xff] }
 0x447   :  { %2658 = vmatpush.msra.mxu1 %v2635_v40  ;;  %v4259_v40 = vld [vmem:[#allocation3 + $0xe0] sm:$0xff] }
 0x448   :  { %2010 = vmatpush.msrb.mxu3 %v1980_v57  ;;  %v4254_v57 = vld [vmem:[#allocation3 + $0x50] sm:$0xff] }
 0x449   :  { %2659 = vmatpush.msra.mxu1 %v2632_v37  ;;  %v4257_v37 = vld [vmem:[#allocation3 + $0xd8] sm:$0xff] }
 0x44a   :  { %2011 = vmatpush.msrb.mxu3 %v1977_v19  ;;  %v4252_v19 = vld [vmem:[#allocation3 + $0x48] sm:$0xff] }
 0x44b   :  { %2660 = vmatpush.msra.mxu1 %v2630_v36  ;;  %v4255_v36 = vld [vmem:[#allocation3 + $0xd0] sm:$0xff] }
 0x44c   :  { %2012 = vmatpush.msrb.mxu3 %v1975_v12  ;;  %v4250_v12 = vld [vmem:[#allocation3 + $0x40] sm:$0xff] }
 0x44d   :  { %2661 = vmatpush.msra.mxu1 %v2627_v39  ;;  %v4253_v39 = vld [vmem:[#allocation3 + $0xc8] sm:$0xff] }
 0x44e   :  { %2013 = vmatpush.msrb.mxu3 %v1972_v61  ;;  %v4248_v61 = vld [vmem:[#allocation3 + $0x38] sm:$0xff] }
 0x44f   :  { %2662 = vmatpush.msra.mxu1 %v2625_v45  ;;  %v4251_v45 = vld [vmem:[#allocation3 + $0xc0] sm:$0xff] }
 0x450   :  { %2014 = vmatpush.msrb.mxu3 %v1970_v0  ;;  %v4238_v0 = vld [vmem:[#allocation3 + $0x10] sm:$0xff] }
 0x451   :  { %2663 = vmatpush.msra.mxu1 %v2622_v24  ;;  %v4249_v24 = vld [vmem:[#allocation3 + $0xb8] sm:$0xff] }
 0x452   :  { %2015 = vmatpush.msrb.mxu3 %v1967_v51  ;;  %v4239_v51 = vld [vmem:[#allocation3 + $0x90] sm:$0xff] }
 0x453   :  { %2664 = vmatpush.msra.mxu1 %v2620_v32  ;;  %v4247_v32 = vld [vmem:[#allocation3 + $0xb0] sm:$0xff] }
 0x454   :  { %2016 = vmatpush.msrb.mxu3 %v1965_v18  ;;  %v4240_v18 = vld [vmem:[#allocation3 + $0x18] sm:$0xff] }
 0x455   :  { %2665 = vmatpush.msra.mxu1 %v2617_v15  ;;  %v4246_v15 = vld [vmem:[#allocation3 + $0x30] sm:$0xff] }
 0x456   :  { %2017 = vmatpush.msrb.mxu3 %v1962_v20  ;;  %v4241_v20 = vld [vmem:[#allocation3 + $0x98] sm:$0xff] }
 0x457   :  { %2666 = vmatpush.msra.mxu1 %v2615_v4  ;;  %v4244_v4 = vld [vmem:[#allocation3 + $0x28] sm:$0xff] }
 0x458   :  { %2018 = vmatpush.msrb.mxu3 %v1960_v38  ;;  %v4242_v38 = vld [vmem:[#allocation3 + $0x20] sm:$0xff] }
 0x459   :  { %2667 = vmatpush.msra.mxu1 %v2612_v17  ;;  %2019 = vmatmul.f32.vlgmr.msrb.gmra.mxu3 %v4234_v10  ;;  %v4243_v17 = vld [vmem:[#allocation3 + $0xa0] sm:$0xff] }
 0x45b   :  { %2668 = vmatpush.msra.mxu1 %v5914_v35  ;;  %v4245_v35 = vld [vmem:[#allocation3 + $0xa8] sm:$0xff] }
 0x45c   :  { %2669 = vmatmul.f32.vlgmr.msra.gmra.mxu1 %v4235_v48 }
 0x461   :  { %2022 = vmatmul.f32.gmra.mxu3 %v4236_v27 }
 0x464   :  { %2672 = vmatmul.f32.gmra.mxu1 %v4237_v58 }
 0x469   :  { %2025 = vmatmul.f32.gmra.mxu3 %v4238_v0 }
 0x46c   :  { %2675 = vmatmul.f32.gmra.mxu1 %v4239_v51 }
 0x471   :  { %2028 = vmatmul.f32.gmra.mxu3 %v4240_v18  ;;  %v5933_v18 = vld [vmem:[#allocation11 + $0x1] ss:$0 sm:$0xff] }
 0x474   :  { %2678 = vmatmul.f32.gmra.mxu1 %v4241_v20 }
 0x479   :  { %2031 = vmatmul.f32.gmra.mxu3 %v4242_v38 }
 0x47c   :  { %2681 = vmatmul.f32.gmra.mxu1 %v4243_v17 }
 0x481   :  { %2034 = vmatmul.f32.gmra.mxu3 %v4244_v4 }
 0x484   :  { %2684 = vmatmul.f32.gmra.mxu1 %v4245_v35 }
 0x489   :  { %2037 = vmatmul.f32.gmra.mxu3 %v4246_v15 }
 0x48c   :  { %2687 = vmatmul.f32.gmra.mxu1 %v4247_v32 }
 0x491   :  { %2040 = vmatmul.f32.gmra.mxu3 %v4248_v61 }
 0x494   :  { %2690 = vmatmul.f32.gmra.mxu1 %v4249_v24 }
 0x499   :  { %2043 = vmatmul.f32.gmra.mxu3 %v4250_v12 }
 0x49c   :  { %2693 = vmatmul.f32.gmra.mxu1 %v4251_v45 }
 0x4a1   :  { %2046 = vmatmul.f32.gmra.mxu3 %v4252_v19 }
 0x4a4   :  { %2696 = vmatmul.f32.gmra.mxu1 %v4253_v39 }
 0x4a9   :  { %2049 = vmatmul.f32.gmra.mxu3 %v4254_v57 }
 0x4ac   :  { %2699 = vmatmul.f32.gmra.mxu1 %v4255_v36 }
 0x4b1   :  { %2052 = vmatmul.f32.gmra.mxu3 %v4256_v22 }
 0x4b4   :  { %2702 = vmatmul.f32.gmra.mxu1 %v4257_v37 }
 0x4b9   :  { %2055 = vmatmul.f32.gmra.mxu3 %v4258_v3 }
 0x4bc   :  { %2705 = vmatmul.f32.gmra.mxu1 %v4259_v40 }
 0x4c1   :  { %2058 = vmatmul.f32.gmra.mxu3 %v4260_v30 }
 0x4c4   :  { %2708 = vmatmul.f32.gmra.mxu1 %v4261_v7 }
 0x4c9   :  { %2061 = vmatmul.f32.gmra.mxu3 %v4262_v8 }
 0x4cc   :  { %2711 = vmatmul.f32.gmra.mxu1 %v4263_v49 }
 0x4d1   :  { %2064 = vmatmul.f32.gmra.mxu3 %v4264_v41 }
 0x4d4   :  { %2714 = vmatmul.f32.gmra.mxu1 %v4265_v2 }
 0x4d9   :  { %v2670_v11 = vpop.f32.mrf.mxu1 }
 0x4da   :  { %v2671_v5 = vadd.f32 %v5917_v43, %v2670_v11 }
 0x4dc   :  { %v5921_v23 = vmul.f32 %v4752_v34, %v2671_v5  ;;  %v2020_v51 = vpop.f32.mrf.mxu3 }
 0x4dd   :  { %v2021_v4 = vadd.f32 %v5933_v18, %v2020_v51 }
 0x4de   :  { %2734 = vadd.xlane.f32.xlu2 %v5921_v23  ;;  %v2766_v10 = vmul.f32 %v5921_v23, %v5921_v23 }
 0x4df   :  { %v5944_v15 = vmul.f32 %v4752_v34, %v2021_v4 }
 0x4e0   :  { %2782 = vadd.xlane.f32.xlu1 %v2766_v10 }
 0x4e1   :  { %v2673_v48 = vpop.f32.mrf.mxu1  ;;  %v2116_v45 = vmul.f32 %v5944_v15, %v5944_v15 }
 0x4e2   :  { %v2674_v27 = vadd.f32 %v5917_v43, %v2673_v48 }
 0x4e4   :  { %v5928_v58 = vmul.f32 %v4752_v34, %v2674_v27  ;;  %v2023_v61 = vpop.f32.mrf.mxu3 }
 0x4e5   :  { %v2024_v19 = vadd.f32 %v5933_v18, %v2023_v61 }
 0x4e6   :  { %2736 = vadd.xlane.f32.xlu0 %v5928_v58  ;;  %v2767_v0 = vmul.f32 %v5928_v58, %v5928_v58 }
 0x4e7   :  { %v5956_v36 = vmul.f32 %v4752_v34, %v2024_v19 }
 0x4e8   :  { %2784 = vadd.xlane.f32.xlu2 %v2767_v0 }
 0x4e9   :  { %v2676_v20 = vpop.f32.mrf.mxu1  ;;  %v2117_v49 = vmul.f32 %v5956_v36, %v5956_v36 }
 0x4ea   :  { %v2677_v38 = vadd.f32 %v5917_v43, %v2676_v20 }
 0x4ec   :  { %v5937_v17 = vmul.f32 %v4752_v34, %v2677_v38  ;;  %v2026_v57 = vpop.f32.mrf.mxu3 }
 0x4ed   :  { %v2027_v40 = vadd.f32 %v5933_v18, %v2026_v57 }
 0x4ee   :  { %2738 = vadd.xlane.f32.xlu1 %v5937_v17  ;;  %v2768_v35 = vmul.f32 %v5937_v17, %v5937_v17 }
 0x4ef   :  { %v5972_v41 = vmul.f32 %v4752_v34, %v2027_v40 }
 0x4f0   :  { %2786 = vadd.xlane.f32.xlu0 %v2768_v35 }
 0x4f1   :  { %v2679_v32 = vpop.f32.mrf.mxu1  ;;  %v2118_v5 = vmul.f32 %v5972_v41, %v5972_v41 }
 0x4f2   :  { %v2680_v24 = vadd.f32 %v5917_v43, %v2679_v32 }
 0x4f4   :  { %v5948_v12 = vmul.f32 %v4752_v34, %v2680_v24  ;;  %v2029_v7 = vpop.f32.mrf.mxu3 }
 0x4f5   :  { %v2030_v0 = vadd.f32 %v5933_v18, %v2029_v7 }
 0x4f6   :  { %2740 = vadd.xlane.f32.xlu2 %v5948_v12  ;;  %2084 = vadd.xlane.f32.xlu1 %v5944_v15  ;;  %v2769_v37 = vmul.f32 %v5948_v12, %v5948_v12 }
 0x4f7   :  { %v5987_v20 = vmul.f32 %v4752_v34, %v2030_v0 }
 0x4f8   :  { %2132 = vadd.xlane.f32.xlu0 %v2116_v45 }
 0x4f9   :  { %v2682_v39 = vpop.f32.mrf.mxu1  ;;  %v2119_v35 = vmul.f32 %v5987_v20, %v5987_v20 }
 0x4fa   :  { %v2683_v22 = vadd.f32 %v5917_v43, %v2682_v39 }
 0x4fc   :  { %v5962_v3 = vmul.f32 %v4752_v34, %v2683_v22  ;;  %v2032_v48 = vpop.f32.mrf.mxu3 }
 0x4fd   :  { %v2033_v61 = vadd.f32 %v5933_v18, %v2032_v48 }
 0x4fe   :  { %2086 = vadd.xlane.f32.xlu2 %v5956_v36  ;;  %2788 = vadd.xlane.f32.xlu1 %v2769_v37  ;;  %v2770_v8 = vmul.f32 %v5962_v3, %v5962_v3 }
 0x4ff   :  { %v5999_v45 = vmul.f32 %v4752_v34, %v2033_v61 }
 0x500   :  { %2742 = vadd.xlane.f32.xlu0 %v5962_v3 }
 0x501   :  { %v2685_v30 = vpop.f32.mrf.mxu1 }
 0x502   :  { %v2686_v2 = vadd.f32 %v5917_v43, %v2685_v30  ;;  %v2120_v30 = vmul.f32 %v5999_v45, %v5999_v45 }
 0x504   :  { %v5977_v11 = vmul.f32 %v4752_v34, %v2686_v2  ;;  %v2035_v4 = vpop.f32.mrf.mxu3 }
 0x505   :  { %v2036_v22 = vadd.f32 %v5933_v18, %v2035_v4 }
 0x506   :  { %2790 = vadd.xlane.f32.xlu2 %v2770_v8  ;;  %2134 = vadd.xlane.f32.xlu1 %v2117_v49  ;;  %v2771_v27 = vmul.f32 %v5977_v11, %v5977_v11 }
 0x507   :  { %v6014_v7 = vmul.f32 %v4752_v34, %v2036_v22 }
 0x508   :  { %2088 = vadd.xlane.f32.xlu0 %v5972_v41 }
 0x509   :  { %v2688_v10 = vpop.f32.mrf.mxu1 }
 0x50a   :  { %v2689_v51 = vadd.f32 %v5917_v43, %v2688_v10 }
 0x50c   :  { %v5990_v38 = vmul.f32 %v4752_v34, %v2689_v51  ;;  %v2038_v39 = vpop.f32.mrf.mxu3 }
 0x50e   :  { %2136 = vadd.xlane.f32.xlu2 %v2118_v5  ;;  %2744 = vadd.xlane.f32.xlu1 %v5977_v11  ;;  %v2772_v19 = vmul.f32 %v5990_v38, %v5990_v38  ;;  %v2121_v5 = vmul.f32 %v6014_v7, %v6014_v7 }
 0x510   :  { %2792 = vadd.xlane.f32.xlu0 %v2771_v27  ;;  %v2039_v27 = vadd.f32 %v5933_v18, %v2038_v39 }
 0x511   :  { %v2691_v32 = vpop.f32.mrf.mxu1 }
 0x512   :  { %v2692_v24 = vadd.f32 %v5917_v43, %v2691_v32  ;;  %v6029_v4 = vmul.f32 %v4752_v34, %v2039_v27 }
 0x514   :  { %v6004_v57 = vmul.f32 %v4752_v34, %v2692_v24  ;;  %v2041_v49 = vpop.f32.mrf.mxu3  ;;  %v2122_v32 = vmul.f32 %v6029_v4, %v6029_v4 }
 0x515   :  { %v2042_v24 = vadd.f32 %v5933_v18, %v2041_v49 }
 0x516   :  { %2746 = vadd.xlane.f32.xlu2 %v5990_v38  ;;  %2090 = vadd.xlane.f32.xlu1 %v5987_v20  ;;  %v2773_v40 = vmul.f32 %v6004_v57, %v6004_v57 }
 0x517   :  { %v6041_v22 = vmul.f32 %v4752_v34, %v2042_v24 }
 0x518   :  { %2138 = vadd.xlane.f32.xlu0 %v2119_v35 }
 0x519   :  { %v2694_v37 = vpop.f32.mrf.mxu1  ;;  %7197 = vst [vmem:[#allocation52_spill] sm:$0xff] %v6041_v22 }
 0x51a   :  { %v2695_v8 = vadd.f32 %v5917_v43, %v2694_v37 }
 0x51c   :  { %v6019_v2 = vmul.f32 %v4752_v34, %v2695_v8  ;;  %v2044_v51 = vpop.f32.mrf.mxu3 }
 0x51e   :  { %2092 = vadd.xlane.f32.xlu2 %v5999_v45  ;;  %2794 = vadd.xlane.f32.xlu1 %v2772_v19  ;;  %v2774_v48 = vmul.f32 %v6019_v2, %v6019_v2 }
 0x520   :  { %2748 = vadd.xlane.f32.xlu0 %v6004_v57 }
 0x521   :  { %v2697_v10 = vpop.f32.mrf.mxu1 }
 0x522   :  { %v2698_v0 = vadd.f32 %v5917_v43, %v2697_v10 }
 0x524   :  { %v6032_v35 = vmul.f32 %v4752_v34, %v2698_v0  ;;  %v2047_v39 = vpop.f32.mrf.mxu3 }
 0x525   :  { %v2048_v27 = vadd.f32 %v5933_v18, %v2047_v39 }
 0x526   :  { %2796 = vadd.xlane.f32.xlu2 %v2773_v40  ;;  %2140 = vadd.xlane.f32.xlu1 %v2120_v30  ;;  %v2775_v37 = vmul.f32 %v6032_v35, %v6032_v35  ;;  %v2045_v30 = vadd.f32 %v5933_v18, %v2044_v51 }
 0x527   :  { %v6062_v51 = vmul.f32 %v4752_v34, %v2048_v27 }
 0x528   :  { %2094 = vadd.xlane.f32.xlu0 %v6014_v7 }
 0x529   :  { %v2700_v61 = vpop.f32.mrf.mxu1  ;;  %7200 = vst [vmem:[#allocation33_spill] sm:$0xff] %v6062_v51 }
 0x52a   :  { %v2701_v19 = vadd.f32 %v5917_v43, %v2700_v61 }
 0x52c   :  { %v6046_v40 = vmul.f32 %v4752_v34, %v2701_v19  ;;  %v2050_v10 = vpop.f32.mrf.mxu3  ;;  %v2125_v19 = vmul.f32 %v6062_v51, %v6062_v51 }
 0x52e   :  { %2142 = vadd.xlane.f32.xlu2 %v2121_v5  ;;  %2750 = vadd.xlane.f32.xlu1 %v6019_v2  ;;  %7198 = vst [vmem:[#allocation32_spill] sm:$0xff] %v6046_v40  ;;  %v2776_v49 = vmul.f32 %v6046_v40, %v6046_v40  ;;  %v2123_v5 = vmul.f32 %v6041_v22, %v6041_v22 }
 0x530   :  { %2798 = vadd.xlane.f32.xlu0 %v2774_v48  ;;  %v6056_v48 = vmul.f32 %v4752_v34, %v2045_v30 }
 0x531   :  { %v2703_v8 = vpop.f32.mrf.mxu1 }
 0x532   :  { %7199 = vst [vmem:[#allocation34_spill] sm:$0xff] %v6056_v48  ;;  %v2704_v0 = vadd.f32 %v5917_v43, %v2703_v8  ;;  %v2124_v61 = vmul.f32 %v6056_v48, %v6056_v48  ;;  %v2051_v8 = vadd.f32 %v5933_v18, %v2050_v10 }
 0x534   :  { %v2053_v39 = vpop.f32.mrf.mxu3 }
 0x536   :  { %2752 = vadd.xlane.f32.xlu2 %v6032_v35  ;;  %2096 = vadd.xlane.f32.xlu1 %v6029_v4 }
 0x538   :  { %2144 = vadd.xlane.f32.xlu0 %v2122_v32  ;;  %v6065_v32 = vmul.f32 %v4752_v34, %v2704_v0 }
 0x539   :  { %v2706_v24 = vpop.f32.mrf.mxu1 }
 0x53a   :  { %7201 = vst [vmem:[#allocation35_spill] sm:$0xff] %v6065_v32  ;;  %v2777_v10 = vmul.f32 %v6065_v32, %v6065_v32 }
 0x53c   :  { %v2056_v52 = vpop.f32.mrf.mxu3 }
 0x53e   :  { %2098 = vadd.xlane.f32.xlu2 %v6041_v22  ;;  %2800 = vadd.xlane.f32.xlu1 %v2775_v37  ;;  %v2707_v37 = vadd.f32 %v5917_v43, %v2706_v24 }
 0x540   :  { %2754 = vadd.xlane.f32.xlu0 %v6046_v40 }
 0x546   :  { %2802 = vadd.xlane.f32.xlu2 %v2776_v49  ;;  %2146 = vadd.xlane.f32.xlu1 %v2123_v5  ;;  %v6075_v49 = vmul.f32 %v4752_v34, %v2707_v37 }
 0x548   :  { %2100 = vadd.xlane.f32.xlu0 %v6056_v48  ;;  %7202 = vst [vmem:[#allocation53_spill] sm:$0xff] %v6075_v49 }
 0x54e   :  { %2148 = vadd.xlane.f32.xlu2 %v2124_v61  ;;  %2756 = vadd.xlane.f32.xlu1 %v6065_v32  ;;  %v6082_v61 = vmul.f32 %v4752_v34, %v2051_v8 }
 0x550   :  { %2150 = vadd.xlane.f32.xlu0 %v2125_v19  ;;  %7203 = vst [vmem:[#allocation38_spill] sm:$0xff] %v6082_v61  ;;  %v2054_v19 = vadd.f32 %v5933_v18, %v2053_v39  ;;  %v2126_v8 = vmul.f32 %v6082_v61, %v6082_v61 }
 0x551   :  { %v2735_v30 = vpop.xlane.xlu2 %2734 }
 0x552   :  { %v6077_v5 = vmul.f32 0.03125, %v2735_v30 }
 0x553   :  { %v2783_v27 = vpop.xlane.xlu1 %2782 }
 0x554   :  { %v2846_v0 = vmul.f32 %v6077_v5, %v6077_v5  ;;  %v2830_v60 = vmul.f32 0.03125, %v2783_v27 }
 0x556   :  { %v2862_v46 = vsub.f32 %v2830_v60, %v2846_v0  ;;  %2758 = vadd.xlane.f32.xlu2 %v6075_v49  ;;  %2102 = vadd.xlane.f32.xlu1 %v6062_v51  ;;  %v6094_v60 = vmul.f32 %v4752_v34, %v2054_v19  ;;  %v4068_v51 = vld [vmem:[#allocation14 + $0x68] sm:$0xff] }
 0x558   :  { %v2878_v24 = vmax.f32 %v2862_v46, 0.0  ;;  %2804 = vadd.xlane.f32.xlu0 %v2777_v10  ;;  %7204 = vst [vmem:[#allocation36_spill] sm:$0xff] %v6094_v60  ;;  %v2709_v46 = vpop.f32.mrf.mxu1  ;;  %v2059_v10 = vpop.f32.mrf.mxu3 }
 0x559   :  { %v2737_v37 = vpop.xlane.xlu0 %2736 }
 0x55a   :  { %v2910_v30 = vadd.f32 1e-05, %v2878_v24  ;;  %v6089_v9 = vmul.f32 0.03125, %v2737_v37  ;;  %v4070_v24 = vld [vmem:[#allocation14 + $0x78] sm:$0xff]  ;;  %v2710_v37 = vadd.f32 %v5917_v43, %v2709_v46 }
 0x55b   :  { %v2785_v27 = vpop.xlane.xlu2 %2784  ;;  %3513 = vmatpush.bf16.msra.mxu3 %v4070_v24  ;;  %v2057_v24 = vadd.f32 %v5933_v18, %v2056_v52 }
 0x55c   :  { %4166 = vrsqrt.f32 %v2910_v30  ;;  %v2847_v0 = vmul.f32 %v6089_v9, %v6089_v9  ;;  %v2831_v26 = vmul.f32 0.03125, %v2785_v27  ;;  %v2127_v27 = vmul.f32 %v6094_v60, %v6094_v60 }
 0x55d   :  { %vm2932_vm2 = vweird.f32 %v2910_v30 }
 0x55e   :  { %2104 = vadd.xlane.f32.xlu2 %v6082_v61  ;;  %2152 = vadd.xlane.f32.xlu1 %v2126_v8  ;;  %v2863_v39 = vsub.f32 %v2831_v26, %v2847_v0  ;;  %v4069_v8 = vld [vmem:[#allocation14 + $0x70] sm:$0xff]  ;;  %v6110_v0 = vmul.f32 %v4752_v34, %v2710_v37 }
 0x55f   :  { %3514 = vmatpush.bf16.msra.mxu3 %v4069_v8  ;;  %v6119_v8 = vmul.f32 %v4752_v34, %v2057_v24 }
 0x560   :  { %2106 = vadd.xlane.f32.xlu0 %v6094_v60  ;;  %v2879_v62 = vmax.f32 %v2863_v39, 0.0  ;;  %7205 = vst [vmem:[#allocation54_spill] sm:$0xff] %v6110_v0  ;;  %v2778_v39 = vmul.f32 %v6075_v49, %v6075_v49  ;;  %v2060_v60 = vadd.f32 %v5933_v18, %v2059_v10  ;;  %v2062_v61 = vpop.f32.mrf.mxu3 }
 0x561   :  { %v2739_v6 = vpop.xlane.xlu1 %2738  ;;  %7206 = vst [vmem:[#allocation39_spill] sm:$0xff] %v6119_v8 }
 0x562   :  { %v4167_v19 = vpop.eup %4166  ;;  %v6101_v13 = vmul.f32 0.03125, %v2739_v6  ;;  %v6105_v21 = vadd.f32 1e-05, %v2879_v62 }
 0x563   :  { %v2927_v50 = vmul.f32 %v4167_v19, %v2910_v30  ;;  %v2787_v59 = vpop.xlane.xlu0 %2786  ;;  %vm2933_vm1 = vweird.f32 %v4167_v19  ;;  %3515 = vmatpush.bf16.msra.mxu3 %v4068_v51  ;;  %v6135_v51 = vld [vmem:[%s6985_s6 + $0x3] ss:$0 sm:$0xff] }
 0x564   :  { %v2848_v26 = vmul.f32 %v6101_v13, %v6101_v13  ;;  %v2832_v46 = vmul.f32 0.03125, %v2787_v59  ;;  %4168 = vrsqrt.f32 %v6105_v21  ;;  %vm2934_vm3 = vmor %vm2932_vm2, %vm2933_vm1  ;;  %vm2942_vm5 = vweird.f32 %v6105_v21 }
 0x565   :  { %v2928_v6 = vmul.f32 %v4167_v19, %v2927_v50 }
 0x566   :  { %v2864_v62 = vsub.f32 %v2832_v46, %v2848_v26  ;;  %2154 = vadd.xlane.f32.xlu2 %v2127_v27  ;;  %2806 = vadd.xlane.f32.xlu1 %v2778_v39  ;;  %v6124_v27 = vmul.f32 %v4752_v34, %v2060_v60 }
 0x567   :  { %v2929_v56 = vmul.f32 0.5, %v2928_v6  ;;  %v2894_v6 = vsub.f32 %v5921_v23, %v6077_v5 }
 0x568   :  { %v2880_v37 = vmax.f32 %v2864_v62, 0.0  ;;  %2760 = vadd.xlane.f32.xlu0 %v6110_v0  ;;  %7207 = vst [vmem:[#allocation37_spill] sm:$0xff] %v6124_v27  ;;  %v6143_v62 = vld [vmem:[#allocation13 + $0x3] ss:$0 sm:$0xff] }
 0x569   :  { %v2930_v59 = vsub.f32 1.5, %v2929_v56  ;;  %v2741_v49 = vpop.xlane.xlu2 %2740  ;;  %v2085_v50 = vpop.xlane.xlu1 %2084  ;;  %v4067_v56 = vld [vmem:[#allocation14 + $0x60] sm:$0xff] }
 0x56a   :  { %v6121_v52 = vadd.f32 1e-05, %v2880_v37  ;;  %v6126_v10 = vmul.f32 0.03125, %v2085_v50  ;;  %v6128_v26 = vpop.eup %4168  ;;  %3516 = vmatpush.bf16.msra.mxu3 %v4067_v56  ;;  %v6150_v50 = vmul.f32 0.03125, %v2741_v49  ;;  %v2779_v49 = vmul.f32 %v6110_v0, %v6110_v0 }
 0x56b   :  { %v2931_v46 = vmul.f32 %v4167_v19, %v2930_v59  ;;  %v2133_v39 = vpop.xlane.xlu0 %2132  ;;  %v2937_v60 = vmul.f32 %v6128_v26, %v6105_v21  ;;  %v2128_v59 = vmul.f32 %v6119_v8, %v6119_v8  ;;  %vm2943_vm4 = vweird.f32 %v6128_v26 }
 0x56c   :  { %4170 = vrsqrt.f32 %v6121_v52  ;;  %v2196_v30 = vmul.f32 %v6126_v10, %v6126_v10  ;;  %v2180_v37 = vmul.f32 0.03125, %v2133_v39  ;;  %v2895_v39 = vsub.f32 %v5928_v58, %v6089_v9  ;;  %vm2944_vm6 = vmor %vm2942_vm5, %vm2943_vm4 }
 0x56d   :  { %v2935_v24 = vsel %vm2934_vm3, %v4167_v19, %v2931_v46  ;;  %v2938_v5 = vmul.f32 %v6128_v26, %v2937_v60  ;;  %v2063_v19 = vadd.f32 %v5933_v18, %v2062_v61  ;;  %v4066_v46 = vld [vmem:[#allocation14 + $0x58] sm:$0xff]  ;;  %v2712_v60 = vpop.f32.mrf.mxu1  ;;  %v2129_v61 = vmul.f32 %v6124_v27, %v6124_v27 }
 0x56e   :  { %v3086_v23 = vmul.f32 %v2935_v24, %v2894_v6  ;;  %2110 = vadd.xlane.f32.xlu2 %v6124_v27  ;;  %2108 = vadd.xlane.f32.xlu1 %v6119_v8  ;;  %v2212_v32 = vsub.f32 %v2180_v37, %v2196_v30  ;;  %v2065_v6 = vpop.f32.mrf.mxu3  ;;  %v2849_v24 = vmul.f32 %v6150_v50, %v6150_v50  ;;  %v4065_v27 = vld [vmem:[#allocation14 + $0x50] sm:$0xff]  ;;  %vm2952_vm8 = vweird.f32 %v6121_v52 }
 0x56f   :  { %v2939_v25 = vmul.f32 0.5, %v2938_v5  ;;  %3517 = vmatpush.bf16.msra.mxu3 %v4066_v46  ;;  %v6170_v37 = vmul.f32 %v4752_v34, %v2063_v19  ;;  %v2713_v22 = vadd.f32 %v5917_v43, %v2712_v60 }
 0x570   :  { %v3105_v56 = vmul.f32 %v6135_v51, %v3086_v23  ;;  %2156 = vadd.xlane.f32.xlu0 %v2128_v59  ;;  %v2228_v9 = vmax.f32 %v2212_v32, 0.0 }
 0x571   :  { %v2087_v14 = vpop.xlane.xlu2 %2086  ;;  %v2789_v8 = vpop.xlane.xlu1 %2788  ;;  %v2940_v5 = vsub.f32 1.5, %v2939_v25  ;;  %v2066_v25 = vadd.f32 %v5933_v18, %v2065_v6 }
 0x572   :  { %v6162_v23 = vpop.eup %4170  ;;  %v3124_v30 = vadd.f32 %v6143_v62, %v3105_v56  ;;  %v2833_v59 = vmul.f32 0.03125, %v2789_v8  ;;  %v6173_v40 = vadd.f32 1e-05, %v2228_v9  ;;  %v6177_v21 = vmul.f32 0.03125, %v2087_v14  ;;  %v4064_v9 = vld [vmem:[#allocation14 + $0x48] sm:$0xff] }
 0x573   :  { %v2947_v58 = vmul.f32 %v6162_v23, %v6121_v52  ;;  %v2743_v0 = vpop.xlane.xlu0 %2742  ;;  %v2941_v48 = vmul.f32 %v6128_v26, %v2940_v5  ;;  %3518 = vmatpush.bf16.msra.mxu3 %v4065_v27  ;;  %vm2953_vm7 = vweird.f32 %v6162_v23 }
 0x574   :  { %v3140_v46 = vmax.f32 %v3124_v30, 0.0  ;;  %v2865_v56 = vsub.f32 %v2833_v59, %v2849_v24  ;;  %4172 = vrsqrt.f32 %v6173_v40  ;;  %v6183_v30 = vmul.f32 0.03125, %v2743_v0  ;;  %vm2954_vm9 = vmor %vm2952_vm8, %vm2953_vm7 }
 0x575   :  { %v2948_v32 = vmul.f32 %v6162_v23, %v2947_v58  ;;  %v2945_v19 = vsel %vm2944_vm6, %v6128_v26, %v2941_v48  ;;  %v2197_v24 = vmul.f32 %v6177_v21, %v6177_v21  ;;  %v2130_v59 = vmul.f32 %v6170_v37, %v6170_v37 }
 0x576   :  { %v3156_v8 = vadd.f32 %v3140_v46, %v5085_v16  ;;  %2808 = vadd.xlane.f32.xlu2 %v2779_v49  ;;  %2158 = vadd.xlane.f32.xlu1 %v2129_v61  ;;  %v3087_v18 = vmul.f32 %v2945_v19, %v2895_v39  ;;  %v2881_v5 = vmax.f32 %v2865_v56, 0.0  ;;  %v2850_v27 = vmul.f32 %v6183_v30, %v6183_v30  ;;  %v2715_v46 = vpop.f32.mrf.mxu1 }
 0x577   :  { %v2949_v6 = vmul.f32 0.5, %v2948_v32  ;;  %v6191_v16 = vmul.f32 %v4752_v34, %v2066_v25  ;;  %3519 = vmatpush.bf16.msra.mxu3 %v4064_v9  ;;  %v6198_v49 = vmul.f32 %v4752_v34, %v2713_v22  ;;  %v2896_v22 = vsub.f32 %v5937_v17, %v6101_v13 }
 0x578   :  { %v3204_v14 = vpack.c.bf16 %v3156_v8, %v3156_v8  ;;  %2112 = vadd.xlane.f32.xlu0 %v6170_v37  ;;  %v3106_v48 = vmul.f32 %v6135_v51, %v3087_v18  ;;  %v6195_v26 = vadd.f32 1e-05, %v2881_v5  ;;  %v4063_v8 = vld [vmem:[#allocation14 + $0x40] sm:$0xff]  ;;  %vm2282_vm11 = vweird.f32 %v6173_v40 }
 0x579   :  { %v2950_v0 = vsub.f32 1.5, %v2949_v6  ;;  %v2791_v60 = vpop.xlane.xlu2 %2790  ;;  %v2135_v39 = vpop.xlane.xlu1 %2134  ;;  %v2131_v5 = vmul.f32 %v6191_v16, %v6191_v16 }
 0x57a   :  { %3220 = vst [vmem:[#allocation2 + $0x4] sm:$0xf] %v3204_v14  ;;  %v2834_v61 = vmul.f32 0.03125, %v2791_v60  ;;  %v2181_v58 = vmul.f32 0.03125, %v2135_v39  ;;  %v3125_v25 = vadd.f32 %v6143_v62, %v3106_v48  ;;  %4174 = vrsqrt.f32 %v6195_v26  ;;  %v6206_v19 = vpop.eup %4172 }
 0x57b   :  { %v2951_v32 = vmul.f32 %v6162_v23, %v2950_v0  ;;  %v2089_v56 = vpop.xlane.xlu0 %2088  ;;  %v2277_v14 = vmul.f32 %v6206_v19, %v6173_v40  ;;  %v2716_v48 = vadd.f32 %v5917_v43, %v2715_v46  ;;  %3520 = vmatpush.bf16.msra.mxu3 %v4063_v8  ;;  %v4062_v0 = vld [vmem:[#allocation14 + $0x38] sm:$0xff]  ;;  %vm2283_vm10 = vweird.f32 %v6206_v19 }
 0x57c   :  { %v2866_v18 = vsub.f32 %v2834_v61, %v2850_v27  ;;  %v2213_v6 = vsub.f32 %v2181_v58, %v2197_v24  ;;  %v3141_v9 = vmax.f32 %v3125_v25, 0.0  ;;  %v7208_v24 = vld [vmem:[#allocation55_spill] sm:$0xff]  ;;  %3464 = vmatpush.bf16.msra.mxu2 %v4062_v0  ;;  %v6226_v43 = vmul.f32 0.03125, %v2089_v56  ;;  %vm2284_vm12 = vmor %vm2282_vm11, %vm2283_vm10 }
 0x57d   :  { %v2955_v52 = vsel %vm2954_vm9, %v6162_v23, %v2951_v32  ;;  %v2278_v39 = vmul.f32 %v6206_v19, %v2277_v14  ;;  %v6231_v32 = vmul.f32 %v4752_v34, %v2716_v48  ;;  %vm2962_vm14 = vweird.f32 %v6195_v26 }
 0x57e   :  { %v3088_v60 = vmul.f32 %v2955_v52, %v2896_v22  ;;  %v2882_v13 = vmax.f32 %v2866_v18, 0.0  ;;  %v2229_v17 = vmax.f32 %v2213_v6, 0.0  ;;  %2160 = vadd.xlane.f32.xlu2 %v2130_v59  ;;  %2762 = vadd.xlane.f32.xlu1 %v6198_v49  ;;  %v3157_v27 = vadd.f32 %v3141_v9, %v7208_v24  ;;  %v4061_v18 = vld [vmem:[#allocation14 + $0x30] sm:$0xff] }
 0x57f   :  { %v2279_v59 = vmul.f32 0.5, %v2278_v39  ;;  %v2198_v56 = vmul.f32 %v6226_v43, %v6226_v43 }
 0x580   :  { %v3107_v23 = vmul.f32 %v6135_v51, %v3088_v60  ;;  %v6222_v61 = vadd.f32 1e-05, %v2882_v13  ;;  %v6224_v58 = vadd.f32 1e-05, %v2229_v17  ;;  %2162 = vadd.xlane.f32.xlu0 %v2131_v5  ;;  %v6228_v46 = vpop.eup %4174  ;;  %v3205_v25 = vpack.c.bf16 %v3157_v27, %v3157_v27  ;;  %3465 = vmatpush.bf16.msra.mxu2 %v4061_v18  ;;  %v6254_v27 = vld [vmem:[%s6985_s6 + $0x1] ss:$0 sm:$0xff] }
 0x581   :  { %v2137_v8 = vpop.xlane.xlu2 %2136  ;;  %v2745_v22 = vpop.xlane.xlu1 %2744  ;;  %v2957_v9 = vmul.f32 %v6228_v46, %v6195_v26  ;;  %v2244_v5 = vsub.f32 %v5944_v15, %v6126_v10  ;;  %v2280_v52 = vsub.f32 1.5, %v2279_v59  ;;  %v2780_v15 = vmul.f32 %v6198_v49, %v6198_v49  ;;  %v4060_v10 = vld [vmem:[#allocation14 + $0x28] sm:$0xff] }
 0x582   :  { %v3126_v6 = vadd.f32 %v6143_v62, %v3107_v23  ;;  %4176 = vrsqrt.f32 %v6222_v61  ;;  %3221 = vst [vmem:[#allocation2 + $0xc] sm:$0xf] %v3205_v25  ;;  %v2182_v0 = vmul.f32 0.03125, %v2137_v8  ;;  %v6244_v60 = vmul.f32 0.03125, %v2745_v22  ;;  %v6268_v22 = vld [vmem:[#allocation13 + $0x1] ss:$0 sm:$0xff] }
 0x583   :  { %4178 = vrsqrt.f32 %v6224_v58  ;;  %v2793_v34 = vpop.xlane.xlu0 %2792  ;;  %v2958_v48 = vmul.f32 %v6228_v46, %v2957_v9  ;;  %v2281_v13 = vmul.f32 %v6206_v19, %v2280_v52  ;;  %vm2963_vm13 = vweird.f32 %v6228_v46 }
 0x584   :  { %v3142_v14 = vmax.f32 %v3126_v6, 0.0  ;;  %v2835_v17 = vmul.f32 0.03125, %v2793_v34  ;;  %v2214_v23 = vsub.f32 %v2182_v0, %v2198_v56  ;;  %v2851_v40 = vmul.f32 %v6244_v60, %v6244_v60  ;;  %3466 = vmatpush.bf16.msra.mxu2 %v4060_v10  ;;  %vm2964_vm15 = vmor %vm2962_vm14, %vm2963_vm13 }
 0x585   :  { %v2959_v39 = vmul.f32 0.5, %v2958_v48  ;;  %v2285_v25 = vsel %vm2284_vm12, %v6206_v19, %v2281_v13  ;;  %v2245_v52 = vsub.f32 %v5956_v36, %v6177_v21  ;;  %v2781_v13 = vmul.f32 %v6231_v32, %v6231_v32 }
 0x586   :  { %v3158_v24 = vadd.f32 %v3142_v14, %v5207_v33  ;;  %2764 = vadd.xlane.f32.xlu2 %v6231_v32  ;;  %2114 = vadd.xlane.f32.xlu1 %v6191_v16  ;;  %v2897_v33 = vsub.f32 %v5948_v12, %v6150_v50  ;;  %v2436_v18 = vmul.f32 %v2285_v25, %v2244_v5  ;;  %v2230_v9 = vmax.f32 %v2214_v23, 0.0  ;;  %v4059_v14 = vld [vmem:[#allocation14 + $0x20] sm:$0xff] }
 0x587   :  { %v2960_v6 = vsub.f32 1.5, %v2959_v39  ;;  %v2867_v50 = vsub.f32 %v2835_v17, %v2851_v40  ;;  %v2898_v26 = vsub.f32 %v5962_v3, %v6183_v30  ;;  %vm2972_vm0 = vweird.f32 %v6222_v61  ;;  %v4058_v3 = vld [vmem:[#allocation14 + $0x18] sm:$0xff] }
 0x588   :  { %v6266_v59 = vpop.eup %4176  ;;  %v3206_v8 = vpack.c.bf16 %v3158_v24, %v3158_v24  ;;  %2810 = vadd.xlane.f32.xlu0 %v2780_v15  ;;  %v2455_v5 = vmul.f32 %v6254_v27, %v2436_v18  ;;  %v6288_v15 = vadd.f32 1e-05, %v2230_v9  ;;  %3467 = vmatpush.bf16.msra.mxu2 %v4059_v14  ;;  %vm2292_vm3 = vweird.f32 %v6224_v58 }
 0x589   :  { %v6270_v56 = vpop.eup %4178  ;;  %v2967_v12 = vmul.f32 %v6266_v59, %v6222_v61  ;;  %v2747_v19 = vpop.xlane.xlu2 %2746  ;;  %v2961_v48 = vmul.f32 %v6228_v46, %v2960_v6  ;;  %v2883_v10 = vmax.f32 %v2867_v50, 0.0  ;;  %vm2973_vm1 = vweird.f32 %v6266_v59  ;;  %v3851_v50 = vld [vmem:[#allocation2 + $0x8] sm:$0xf0] }
 0x58a   :  { %v2091_v34 = vpop.xlane.xlu1 %2090  ;;  %3222 = vst [vmem:[#allocation2 + $0x14] sm:$0xf] %v3206_v8  ;;  %v2287_v0 = vmul.f32 %v6270_v56, %v6224_v58  ;;  %v2474_v39 = vadd.f32 %v6268_v22, %v2455_v5  ;;  %4180 = vrsqrt.f32 %v6288_v15  ;;  %vm2293_vm2 = vweird.f32 %v6270_v56  ;;  %vm2974_vm4 = vmor %vm2972_vm0, %vm2973_vm1 }
 0x58b   :  { %v2968_v17 = vmul.f32 %v6266_v59, %v2967_v12  ;;  %v2139_v24 = vpop.xlane.xlu0 %2138  ;;  %v2965_v23 = vsel %vm2964_vm15, %v6228_v46, %v2961_v48  ;;  %v6293_v25 = vmul.f32 0.03125, %v2091_v34  ;;  %v6298_v9 = vadd.f32 1e-05, %v2883_v10  ;;  %vm2294_vm5 = vmor %vm2292_vm3, %vm2293_vm2 }
 0x58c   :  { %v2288_v40 = vmul.f32 %v6270_v56, %v2287_v0  ;;  %v3089_v8 = vmul.f32 %v2965_v23, %v2897_v33  ;;  %v2490_v30 = vmax.f32 %v2474_v39, 0.0  ;;  %3468 = vmatpush.bf16.msra.mxu2 %v4058_v3  ;;  %v6306_v5 = vmul.f32 0.03125, %v2747_v19  ;;  %v4057_v23 = vld [vmem:[#allocation14 + $0x10] sm:$0xff] }
 0x58d   :  { %v2969_v18 = vmul.f32 0.5, %v2968_v17  ;;  %v2199_v33 = vmul.f32 %v6293_v25, %v6293_v25  ;;  %4182 = vrsqrt.f32 %v6298_v9  ;;  %v4039_v17 = vld [vmem:[#allocation2 + $0x4] sm:$0xf]  ;;  %vm2302_vm6 = vweird.f32 %v6288_v15 }
 0x58e   :  { %v2289_v6 = vmul.f32 0.5, %v2288_v40  ;;  %2812 = vadd.xlane.f32.xlu1 %v2781_v13  ;;  %v3108_v46 = vmul.f32 %v6135_v51, %v3089_v8  ;;  %v2506_v34 = vadd.f32 %v2490_v30, %v5168_v31  ;;  %v2183_v13 = vmul.f32 0.03125, %v2139_v24 }
 0x58f   :  { %v2970_v12 = vsub.f32 1.5, %v2969_v18  ;;  %v2852_v19 = vmul.f32 %v6306_v5, %v6306_v5  ;;  %v3854_v8 = vor.u32 %v4039_v17, %v3851_v50  ;;  %vm2982_vm10 = vweird.f32 %v6298_v9 }
 0x590   :  { %v2290_v14 = vsub.f32 1.5, %v2289_v6  ;;  %v3127_v48 = vadd.f32 %v6143_v62, %v3108_v46  ;;  %v3172_v40 = vpack.c.bf16 %v2506_v34, %v2506_v34  ;;  %v6318_v18 = vpop.eup %4180  ;;  %v2215_v3 = vsub.f32 %v2183_v13, %v2199_v33  ;;  %3469 = vmatpush.bf16.msra.mxu2 %v4057_v23 }
 0x591   :  { %v2971_v0 = vmul.f32 %v6266_v59, %v2970_v12  ;;  %v2093_v10 = vpop.xlane.xlu2 %2092  ;;  %v2297_v12 = vmul.f32 %v6318_v18, %v6288_v15  ;;  %3521 = vmatmul.bf16.vlgmr.msra.gmra.mxu3 %v3854_v8  ;;  %v4055_v8 = vld [vmem:[#allocation14] sm:$0xff]  ;;  %vm2303_vm7 = vweird.f32 %v6318_v18  ;;  %v2899_v15 = vsub.f32 %v5977_v11, %v6244_v60 }
 0x592   :  { %v2795_v39 = vpop.xlane.xlu1 %2794  ;;  %v2291_v31 = vmul.f32 %v6270_v56, %v2290_v14  ;;  %v3143_v58 = vmax.f32 %v3127_v48, 0.0  ;;  %3188 = vst [vmem:[#allocation2] sm:$0xf] %v3172_v40  ;;  %v2231_v34 = vmax.f32 %v2215_v3, 0.0  ;;  %v4056_v14 = vld [vmem:[#allocation14 + $0x8] sm:$0xff]  ;;  %v6345_v23 = vmul.f32 0.03125, %v2093_v10  ;;  %vm2304_vm8 = vmor %vm2302_vm6, %vm2303_vm7 }
 0x593   :  { %v2975_v24 = vsel %vm2974_vm4, %v6266_v59, %v2971_v0  ;;  %v2836_v30 = vmul.f32 0.03125, %v2795_v39  ;;  %v2749_v6 = vpop.xlane.xlu0 %2748  ;;  %v6330_v33 = vpop.eup %4182 }
 0x594   :  { %v3090_v61 = vmul.f32 %v2975_v24, %v2898_v26  ;;  %v2295_v46 = vsel %vm2294_vm5, %v6270_v56, %v2291_v31  ;;  %v3159_v50 = vadd.f32 %v3143_v58, %v5215_v55  ;;  %v2246_v26 = vsub.f32 %v5972_v41, %v6226_v43  ;;  %3470 = vmatpush.bf16.msra.mxu2 %v4056_v14 }
 0x595   :  { %v2437_v59 = vmul.f32 %v2295_v46, %v2245_v52  ;;  %v2298_v56 = vmul.f32 %v6318_v18, %v2297_v12  ;;  %v2868_v0 = vsub.f32 %v2836_v30, %v2852_v19  ;;  %v2977_v55 = vmul.f32 %v6330_v33, %v6298_v9 }
 0x596   :  { %v3109_v48 = vmul.f32 %v6135_v51, %v3090_v61  ;;  %v3207_v13 = vpack.c.bf16 %v3159_v50, %v3159_v50  ;;  %v6341_v52 = vadd.f32 1e-05, %v2231_v34  ;;  %v6347_v40 = vmul.f32 0.03125, %v2749_v6 }
 0x597   :  { %v2456_v17 = vmul.f32 %v6254_v27, %v2437_v59  ;;  %v2299_v21 = vmul.f32 0.5, %v2298_v56  ;;  %v2884_v39 = vmax.f32 %v2868_v0, 0.0  ;;  %v2978_v43 = vmul.f32 %v6330_v33, %v2977_v55 }
 0x598   :  { %v3128_v36 = vadd.f32 %v6143_v62, %v3109_v48  ;;  %3223 = vst [vmem:[#allocation2 + $0x1c] sm:$0xf] %v3207_v13  ;;  %4184 = vrsqrt.f32 %v6341_v52  ;;  %v2853_v46 = vmul.f32 %v6347_v40, %v6347_v40  ;;  %3471 = vmatpush.bf16.msra.mxu2 %v4055_v8  ;;  %v2200_v50 = vmul.f32 %v6345_v23, %v6345_v23 }
 0x599   :  { %v2475_v41 = vadd.f32 %v6268_v22, %v2456_v17  ;;  %v2797_v31 = vpop.xlane.xlu2 %2796  ;;  %v2300_v24 = vsub.f32 1.5, %v2299_v21  ;;  %v2979_v30 = vmul.f32 0.5, %v2978_v43  ;;  %v6351_v61 = vadd.f32 1e-05, %v2884_v39 }
 0x59a   :  { %v2141_v19 = vpop.xlane.xlu1 %2140  ;;  %v3144_v58 = vmax.f32 %v3128_v36, 0.0  ;;  %v2837_v59 = vmul.f32 0.03125, %v2797_v31  ;;  %vm2983_vm9 = vweird.f32 %v6330_v33  ;;  %vm2312_vm12 = vweird.f32 %v6341_v52 }
 0x59b   :  { %v2491_v3 = vmax.f32 %v2475_v41, 0.0  ;;  %v2095_v10 = vpop.xlane.xlu0 %2094  ;;  %v2301_v12 = vmul.f32 %v6318_v18, %v2300_v24  ;;  %v2980_v14 = vsub.f32 1.5, %v2979_v30  ;;  %4186 = vrsqrt.f32 %v6351_v61  ;;  %vm2984_vm11 = vmor %vm2982_vm10, %vm2983_vm9 }
 0x59c   :  { %v3160_v6 = vadd.f32 %v3144_v58, %v5329_v44  ;;  %v2869_v44 = vsub.f32 %v2837_v59, %v2853_v46  ;;  %v2184_v0 = vmul.f32 0.03125, %v2141_v19  ;;  %v6371_v39 = vmul.f32 0.03125, %v2095_v10 }
 0x59d   :  { %v2507_v34 = vadd.f32 %v2491_v3, %v5181_v42  ;;  %v2305_v56 = vsel %vm2304_vm8, %v6318_v18, %v2301_v12  ;;  %v2981_v55 = vmul.f32 %v6330_v33, %v2980_v14  ;;  %v2900_v24 = vsub.f32 %v5990_v38, %v6306_v5 }
 0x59e   :  { %v3208_v48 = vpack.c.bf16 %v3160_v6, %v3160_v6  ;;  %v2438_v17 = vmul.f32 %v2305_v56, %v2246_v26  ;;  %v6367_v42 = vpop.eup %4184  ;;  %v2885_v36 = vmax.f32 %v2869_v44, 0.0  ;;  %v2216_v21 = vsub.f32 %v2184_v0, %v2200_v50 }
 0x59f   :  { %v3173_v13 = vpack.c.bf16 %v2507_v34, %v2507_v34  ;;  %v2985_v26 = vsel %vm2984_vm11, %v6330_v33, %v2981_v55  ;;  %v2307_v41 = vmul.f32 %v6367_v42, %v6341_v52  ;;  %v2201_v11 = vmul.f32 %v6371_v39, %v6371_v39 }
 0x5a0   :  { %3224 = vst [vmem:[#allocation2 + $0x24] sm:$0xf] %v3208_v48  ;;  %v2457_v18 = vmul.f32 %v6254_v27, %v2438_v17  ;;  %v3091_v31 = vmul.f32 %v2985_v26, %v2899_v15  ;;  %v6377_v19 = vadd.f32 1e-05, %v2885_v36  ;;  %v2232_v8 = vmax.f32 %v2216_v21, 0.0 }
 0x5a1   :  { %3189 = vst [vmem:[#allocation2 + $0x8] sm:$0xf] %v3173_v13  ;;  %v2143_v9 = vpop.xlane.xlu2 %2142  ;;  %v6381_v60 = vpop.eup %4186  ;;  %v2308_v33 = vmul.f32 %v6367_v42, %v2307_v41  ;;  %v2247_v10 = vsub.f32 %v5987_v20, %v6293_v25  ;;  %v3859_v48 = vld [vmem:[#allocation2 + $0x18] sm:$0xf0]  ;;  %vm2313_vm13 = vweird.f32 %v6367_v42  ;;  %v4041_v13 = vld [vmem:[#allocation2 + $0x14] sm:$0xf]  ;;  %vm2992_vm0 = vweird.f32 %v6351_v61 }
 0x5a2   :  { %v2751_v43 = vpop.xlane.xlu1 %2750  ;;  %v2476_v58 = vadd.f32 %v6268_v22, %v2457_v18  ;;  %v2185_v3 = vmul.f32 0.03125, %v2143_v9  ;;  %v3110_v46 = vmul.f32 %v6135_v51, %v3091_v31  ;;  %v2987_v6 = vmul.f32 %v6381_v60, %v6351_v61  ;;  %vm2314_vm15 = vmor %vm2312_vm12, %vm2313_vm13 }
 0x5a3   :  { %v2799_v30 = vpop.xlane.xlu0 %2798  ;;  %4188 = vrsqrt.f32 %v6377_v19  ;;  %v2309_v50 = vmul.f32 0.5, %v2308_v33  ;;  %v6394_v59 = vadd.f32 1e-05, %v2232_v8  ;;  %v6398_v14 = vmul.f32 0.03125, %v2751_v43 }
 0x5a4   :  { %v2492_v12 = vmax.f32 %v2476_v58, 0.0  ;;  %v3129_v38 = vadd.f32 %v6143_v62, %v3110_v46  ;;  %v2988_v5 = vmul.f32 %v6381_v60, %v2987_v6  ;;  %v2217_v34 = vsub.f32 %v2185_v3, %v2201_v11 }
 0x5a5   :  { %v2310_v25 = vsub.f32 1.5, %v2309_v50  ;;  %4190 = vrsqrt.f32 %v6394_v59  ;;  %vm2993_vm14 = vweird.f32 %v6381_v60  ;;  %v2854_v15 = vmul.f32 %v6398_v14, %v6398_v14 }
 0x5a6   :  { %v2508_v20 = vadd.f32 %v2492_v12, %v5287_v53  ;;  %v3145_v56 = vmax.f32 %v3129_v38, 0.0  ;;  %v2989_v44 = vmul.f32 0.5, %v2988_v5  ;;  %v2233_v0 = vmax.f32 %v2217_v34, 0.0  ;;  %vm2994_vm1 = vmor %vm2992_vm0, %vm2993_vm14 }
 0x5a7   :  { %v2311_v55 = vmul.f32 %v6367_v42, %v2310_v25  ;;  %v3862_v36 = vor.u32 %v4041_v13, %v3859_v48  ;;  %v2838_v43 = vmul.f32 0.03125, %v2799_v30  ;;  %v2248_v8 = vsub.f32 %v5999_v45, %v6345_v23 }
 0x5a8   :  { %v3174_v17 = vpack.c.bf16 %v2508_v20, %v2508_v20  ;;  %v3161_v26 = vadd.f32 %v3145_v56, %v5332_v54  ;;  %v2990_v41 = vsub.f32 1.5, %v2989_v44  ;;  %v6414_v9 = vadd.f32 1e-05, %v2233_v0  ;;  %v4040_v6 = vld [vmem:[#allocation2 + $0x4] sm:$0xf0] }
 0x5a9   :  { %v2753_v21 = vpop.xlane.xlu2 %2752  ;;  %v6407_v18 = vpop.eup %4188  ;;  %v2315_v31 = vsel %vm2314_vm15, %v6367_v42, %v2311_v55  ;;  %3526 = vmatmul.bf16.gmra.mxu3 %v3862_v36  ;;  %v2901_v42 = vsub.f32 %v6004_v57, %v6347_v40  ;;  %v2249_v30 = vsub.f32 %v6014_v7, %v6371_v39  ;;  %v2870_v46 = vsub.f32 %v2838_v43, %v2854_v15  ;;  %v3849_v40 = vld [vmem:[#allocation2] sm:$0xf] }
 0x5aa   :  { %v2097_v53 = vpop.xlane.xlu1 %2096  ;;  %3190 = vst [vmem:[#allocation2 + $0x10] sm:$0xf] %v3174_v17  ;;  %v2997_v54 = vmul.f32 %v6407_v18, %v6377_v19  ;;  %v3209_v58 = vpack.c.bf16 %v3161_v26, %v3161_v26  ;;  %v2439_v52 = vmul.f32 %v2315_v31, %v2247_v10  ;;  %v2991_v33 = vmul.f32 %v6381_v60, %v2990_v41 }
 0x5ab   :  { %v2145_v11 = vpop.xlane.xlu0 %2144  ;;  %4192 = vrsqrt.f32 %v6414_v9  ;;  %v6424_v3 = vpop.eup %4190  ;;  %vm3002_vm2 = vweird.f32 %v6377_v19  ;;  %vm3003_vm3 = vweird.f32 %v6407_v18  ;;  %v2886_v57 = vmax.f32 %v2870_v46, 0.0 }
 0x5ac   :  { %v2998_v61 = vmul.f32 %v6407_v18, %v2997_v54  ;;  %3225 = vst [vmem:[#allocation2 + $0x2c] sm:$0xf] %v3209_v58  ;;  %v2458_v10 = vmul.f32 %v6254_v27, %v2439_v52  ;;  %v2995_v12 = vsel %vm2994_vm1, %v6381_v60, %v2991_v33  ;;  %v2317_v50 = vmul.f32 %v6424_v3, %v6394_v59  ;;  %vm3004_vm5 = vmor %vm3002_vm2, %vm3003_vm3 }
 0x5ad   :  { %v3092_v38 = vmul.f32 %v2995_v12, %v2900_v24  ;;  %v6441_v20 = vmul.f32 0.03125, %v2097_v53  ;;  %v3850_v25 = vor.u32 %v4040_v6, %v3849_v40  ;;  %v6444_v44 = vadd.f32 1e-05, %v2886_v57  ;;  %v4043_v40 = vld [vmem:[#allocation2 + $0x24] sm:$0xf] }
 0x5ae   :  { %v2999_v5 = vmul.f32 0.5, %v2998_v61  ;;  %v2477_v34 = vadd.f32 %v6268_v22, %v2458_v10  ;;  %v2318_v48 = vmul.f32 %v6424_v3, %v2317_v50  ;;  %v2186_v0 = vmul.f32 0.03125, %v2145_v11 }
 0x5af   :  { %v3111_v60 = vmul.f32 %v6135_v51, %v3092_v38  ;;  %vm2322_vm4 = vweird.f32 %v6394_v59  ;;  %v2202_v36 = vmul.f32 %v6441_v20, %v6441_v20  ;;  %3472 = vmatmul.bf16.vlgmr.msra.gmra.mxu2 %v3850_v25  ;;  %v6455_v43 = vmul.f32 0.03125, %v2753_v21 }
 0x5b0   :  { %v3000_v56 = vsub.f32 1.5, %v2999_v5  ;;  %v2493_v55 = vmax.f32 %v2477_v34, 0.0  ;;  %v2319_v15 = vmul.f32 0.5, %v2318_v48  ;;  %vm2323_vm6 = vweird.f32 %v6424_v3 }
 0x5b1   :  { %v2099_v13 = vpop.xlane.xlu2 %2098  ;;  %v6446_v17 = vpop.eup %4192  ;;  %v3130_v53 = vadd.f32 %v6143_v62, %v3111_v60  ;;  %4194 = vrsqrt.f32 %v6444_v44  ;;  %v2218_v21 = vsub.f32 %v2186_v0, %v2202_v36  ;;  %v2855_v6 = vmul.f32 %v6455_v43, %v6455_v43  ;;  %vm2324_vm7 = vmor %vm2322_vm4, %vm2323_vm6 }
 0x5b2   :  { %v2801_v24 = vpop.xlane.xlu1 %2800  ;;  %v3001_v26 = vmul.f32 %v6407_v18, %v3000_v56  ;;  %v2327_v41 = vmul.f32 %v6446_v17, %v6414_v9  ;;  %v2509_v54 = vadd.f32 %v2493_v55, %v5280_v28  ;;  %v2320_v11 = vsub.f32 1.5, %v2319_v15 }
 0x5b3   :  { %v2755_v31 = vpop.xlane.xlu0 %2754  ;;  %v3146_v58 = vmax.f32 %v3130_v53, 0.0  ;;  %v2234_v12 = vmax.f32 %v2218_v21, 0.0  ;;  %v2839_v50 = vmul.f32 0.03125, %v2801_v24  ;;  %v3867_v38 = vld [vmem:[#allocation2 + $0x28] sm:$0xf0]  ;;  %vm2332_vm8 = vweird.f32 %v6414_v9 }
 0x5b4   :  { %v3005_v52 = vsel %vm3004_vm5, %v6407_v18, %v3001_v26  ;;  %v2328_v33 = vmul.f32 %v6446_v17, %v2327_v41  ;;  %v3175_v61 = vpack.c.bf16 %v2509_v54, %v2509_v54  ;;  %v2321_v28 = vmul.f32 %v6424_v3, %v2320_v11 }
 0x5b5   :  { %v3093_v46 = vmul.f32 %v3005_v52, %v2901_v42  ;;  %v3162_v19 = vadd.f32 %v3146_v58, %v5460_v47  ;;  %vm2333_vm9 = vweird.f32 %v6446_v17  ;;  %v6479_v57 = vadd.f32 1e-05, %v2234_v12 }
 0x5b6   :  { %v2329_v10 = vmul.f32 0.5, %v2328_v33  ;;  %3191 = vst [vmem:[#allocation2 + $0x18] sm:$0xf] %v3175_v61  ;;  %v2325_v5 = vsel %vm2324_vm7, %v6424_v3, %v2321_v28  ;;  %v6484_v3 = vmul.f32 0.03125, %v2099_v13  ;;  %v2871_v56 = vsub.f32 %v2839_v50, %v2855_v6  ;;  %vm2334_vm10 = vmor %vm2332_vm8, %vm2333_vm9 }
 0x5b7   :  { %v3112_v18 = vmul.f32 %v6135_v51, %v3093_v46  ;;  %v3210_v42 = vpack.c.bf16 %v3162_v19, %v3162_v19  ;;  %v2440_v47 = vmul.f32 %v2325_v5, %v2248_v8  ;;  %v6481_v25 = vpop.eup %4194  ;;  %v3870_v0 = vor.u32 %v4043_v40, %v3867_v38 }
 0x5b8   :  { %v2330_v59 = vsub.f32 1.5, %v2329_v10  ;;  %v3007_v23 = vmul.f32 %v6481_v25, %v6444_v44  ;;  %v6490_v8 = vmul.f32 0.03125, %v2755_v31  ;;  %4196 = vrsqrt.f32 %v6479_v57 }
 0x5b9   :  { %v2803_v34 = vpop.xlane.xlu2 %2802  ;;  %v3131_v60 = vadd.f32 %v6143_v62, %v3112_v18  ;;  %3226 = vst [vmem:[#allocation2 + $0x34] sm:$0xf] %v3210_v42  ;;  %v2459_v24 = vmul.f32 %v6254_v27, %v2440_v47  ;;  %v2203_v13 = vmul.f32 %v6484_v3, %v6484_v3  ;;  %v2887_v36 = vmax.f32 %v2871_v56, 0.0  ;;  %3531 = vmatmul.bf16.gmra.mxu3 %v3870_v0 }
 0x5ba   :  { %v2147_v48 = vpop.xlane.xlu1 %2146  ;;  %v2331_v45 = vmul.f32 %v6446_v17, %v2330_v59  ;;  %v3008_v41 = vmul.f32 %v6481_v25, %v3007_v23  ;;  %v2856_v31 = vmul.f32 %v6490_v8, %v6490_v8  ;;  %v2902_v11 = vsub.f32 %v6019_v2, %v6398_v14  ;;  %v3857_v2 = vld [vmem:[#allocation2 + $0x10] sm:$0xf] }
 0x5bb   :  { %v2101_v55 = vpop.xlane.xlu0 %2100  ;;  %v3147_v15 = vmax.f32 %v3131_v60, 0.0  ;;  %v2478_v53 = vadd.f32 %v6268_v22, %v2459_v24  ;;  %v6510_v58 = vadd.f32 1e-05, %v2887_v36  ;;  %v2840_v21 = vmul.f32 0.03125, %v2803_v34 }
 0x5bc   :  { %v2335_v26 = vsel %vm2334_vm10, %v6446_v17, %v2331_v45  ;;  %v3009_v33 = vmul.f32 0.5, %v3008_v41  ;;  %v2187_v17 = vmul.f32 0.03125, %v2147_v48  ;;  %vm3013_vm11 = vweird.f32 %v6481_v25 }
 0x5bd   :  { %v3163_v54 = vadd.f32 %v3147_v15, %v5476_v1  ;;  %v2441_v9 = vmul.f32 %v2335_v26, %v2249_v30  ;;  %v2494_v52 = vmax.f32 %v2478_v53, 0.0  ;;  %v4042_v61 = vld [vmem:[#allocation2 + $0x14] sm:$0xf0]  ;;  %4198 = vrsqrt.f32 %v6510_v58  ;;  %v7209_v26 = vld [vmem:[#allocation52_spill] sm:$0xff] }
 0x5be   :  { %v3010_v7 = vsub.f32 1.5, %v3009_v33  ;;  %v2872_v39 = vsub.f32 %v2840_v21, %v2856_v31  ;;  %v2219_v30 = vsub.f32 %v2187_v17, %v2203_v13  ;;  %v6516_v19 = vpop.eup %4196  ;;  %vm3012_vm12 = vweird.f32 %v6444_v44  ;;  %v7210_v21 = vld [vmem:[#allocation32_spill] sm:$0xff] }
 0x5bf   :  { %v3211_v46 = vpack.c.bf16 %v3163_v54, %v3163_v54  ;;  %v2460_v28 = vmul.f32 %v6254_v27, %v2441_v9  ;;  %v2510_v1 = vadd.f32 %v2494_v52, %v5430_v63  ;;  %v6520_v12 = vmul.f32 0.03125, %v2101_v55  ;;  %vm3014_vm13 = vmor %vm3012_vm12, %vm3013_vm11 }
 0x5c0   :  { %v3858_v50 = vor.u32 %v4042_v61, %v3857_v2  ;;  %v3011_v18 = vmul.f32 %v6481_v25, %v3010_v7  ;;  %v2337_v63 = vmul.f32 %v6516_v19, %v6479_v57  ;;  %v2888_v59 = vmax.f32 %v2872_v39, 0.0  ;;  %v4045_v61 = vld [vmem:[#allocation2 + $0x34] sm:$0xf] }
 0x5c1   :  { %v2149_v14 = vpop.xlane.xlu2 %2148  ;;  %3227 = vst [vmem:[#allocation2 + $0x3c] sm:$0xf] %v3211_v46  ;;  %v2479_v10 = vadd.f32 %v6268_v22, %v2460_v28  ;;  %v3176_v38 = vpack.c.bf16 %v2510_v1, %v2510_v1  ;;  %v2235_v40 = vmax.f32 %v2219_v30, 0.0  ;;  %v2204_v44 = vmul.f32 %v6520_v12, %v6520_v12  ;;  %v7211_v30 = vld [vmem:[#allocation34_spill] sm:$0xff] }
 0x5c2   :  { %v2757_v6 = vpop.xlane.xlu1 %2756  ;;  %v2188_v5 = vmul.f32 0.03125, %v2149_v14  ;;  %3477 = vmatmul.bf16.gmra.mxu2 %v3858_v50  ;;  %v3015_v34 = vsel %vm3014_vm13, %v6481_v25, %v3011_v18  ;;  %v2903_v48 = vsub.f32 %v6032_v35, %v6455_v43  ;;  %v2338_v60 = vmul.f32 %v6516_v19, %v2337_v63 }
 0x5c3   :  { %v2151_v42 = vpop.xlane.xlu0 %2150  ;;  %v2495_v47 = vmax.f32 %v2479_v10, 0.0  ;;  %3192 = vst [vmem:[#allocation2 + $0x20] sm:$0xf] %v3176_v38  ;;  %v6533_v56 = vpop.eup %4198  ;;  %v3094_v24 = vmul.f32 %v3015_v34, %v2902_v11  ;;  %v6536_v45 = vadd.f32 1e-05, %v2888_v59  ;;  %v2250_v55 = vsub.f32 %v6029_v4, %v6441_v20  ;;  %v7213_v34 = vld [vmem:[#allocation35_spill] sm:$0xff] }
 0x5c4   :  { %v6538_v23 = vadd.f32 1e-05, %v2235_v40  ;;  %v2339_v15 = vmul.f32 0.5, %v2338_v60  ;;  %v3017_v25 = vmul.f32 %v6533_v56, %v6510_v58  ;;  %v2220_v13 = vsub.f32 %v2188_v5, %v2204_v44 }
 0x5c5   :  { %v2511_v0 = vadd.f32 %v2495_v47, %v5451_v29  ;;  %v3113_v53 = vmul.f32 %v6135_v51, %v3094_v24  ;;  %v2251_v41 = vsub.f32 %v7209_v26, %v6484_v3  ;;  %4200 = vrsqrt.f32 %v6536_v45 }
 0x5c6   :  { %v2340_v29 = vsub.f32 1.5, %v2339_v15  ;;  %vm2343_vm14 = vweird.f32 %v6516_v19  ;;  %v3018_v31 = vmul.f32 %v6533_v56, %v3017_v25  ;;  %4202 = vrsqrt.f32 %v6538_v23 }
 0x5c7   :  { %v3177_v36 = vpack.c.bf16 %v2511_v0, %v2511_v0  ;;  %v3132_v9 = vadd.f32 %v6143_v62, %v3113_v53  ;;  %vm2342_vm15 = vweird.f32 %v6479_v57  ;;  %v2236_v51 = vmax.f32 %v2220_v13, 0.0 }
 0x5c8   :  { %v3875_v54 = vld [vmem:[#allocation2 + $0x38] sm:$0xf0]  ;;  %v6553_v11 = vmul.f32 0.03125, %v2757_v6  ;;  %v2341_v52 = vmul.f32 %v6516_v19, %v2340_v29  ;;  %v3019_v33 = vmul.f32 0.5, %v3018_v31  ;;  %vm3022_vm0 = vweird.f32 %v6510_v58  ;;  %vm2344_vm1 = vmor %vm2342_vm15, %vm2343_vm14  ;;  %v7212_v6 = vld [vmem:[#allocation45_spill] sm:$0xff] }
 0x5c9   :  { %v2759_v4 = vpop.xlane.xlu2 %2758  ;;  %3193 = vst [vmem:[#allocation2 + $0x28] sm:$0xf] %v3177_v36  ;;  %v2904_v17 = vsub.f32 %v7210_v21, %v6490_v8  ;;  %v3148_v28 = vmax.f32 %v3132_v9, 0.0  ;;  %v6561_v62 = vadd.f32 1e-05, %v2236_v51  ;;  %v3878_v1 = vor.u32 %v4045_v61, %v3875_v54  ;;  %v7214_v61 = vld [vmem:[#allocation22_spill] sm:$0xff] }
 0x5ca   :  { %v2103_v20 = vpop.xlane.xlu1 %2102  ;;  %v2345_v7 = vsel %vm2344_vm1, %v6516_v19, %v2341_v52  ;;  %v3020_v39 = vsub.f32 1.5, %v3019_v33  ;;  %vm3023_vm2 = vweird.f32 %v6533_v56  ;;  %v2252_v2 = vsub.f32 %v7211_v30, %v6520_v12  ;;  %v6609_v54 = vld [vmem:[%s6985_s6 + $0x3] ss:$0 sm:$0xff]  ;;  %v7218_v12 = vld [vmem:[#allocation23_spill] sm:$0xff] }
 0x5cb   :  { %v2805_v46 = vpop.xlane.xlu0 %2804  ;;  %v6563_v57 = vmul.f32 0.03125, %v2103_v20  ;;  %v6569_v14 = vpop.eup %4200  ;;  %v3164_v10 = vadd.f32 %v3148_v28, %v7212_v6  ;;  %v2442_v50 = vmul.f32 %v2345_v7, %v2250_v55  ;;  %4204 = vrsqrt.f32 %v6561_v62  ;;  %3536 = vmatmul.bf16.gmra.mxu3 %v3878_v1  ;;  %vm3024_vm4 = vmor %vm3022_vm0, %vm3023_vm2  ;;  %v6619_v28 = vld [vmem:[#allocation13 + $0x3] ss:$0 sm:$0xff] }
 0x5cc   :  { %v2857_v38 = vmul.f32 %v6553_v11, %v6553_v11  ;;  %v6575_v18 = vpop.eup %4202  ;;  %v3021_v19 = vmul.f32 %v6533_v56, %v3020_v39  ;;  %v3027_v63 = vmul.f32 %v6569_v14, %v6536_v45  ;;  %vm3032_vm3 = vweird.f32 %v6536_v45 }
 0x5cd   :  { %v2189_v5 = vmul.f32 0.03125, %v2151_v42  ;;  %v2205_v47 = vmul.f32 %v6563_v57, %v6563_v57  ;;  %v3212_v59 = vpack.c.bf16 %v3164_v10, %v3164_v10  ;;  %v2461_v40 = vmul.f32 %v6254_v27, %v2442_v50 }
 0x5ce   :  { %v2347_v44 = vmul.f32 %v6575_v18, %v6538_v23  ;;  %vm2352_vm5 = vweird.f32 %v6538_v23  ;;  %v2905_v60 = vsub.f32 %v7213_v34, %v6553_v11  ;;  %v3025_v42 = vsel %vm3024_vm4, %v6533_v56, %v3021_v19 }
 0x5cf   :  { %v3028_v0 = vmul.f32 %v6569_v14, %v3027_v63  ;;  %v6595_v24 = vmul.f32 0.03125, %v2759_v4  ;;  %v2221_v55 = vsub.f32 %v2189_v5, %v2205_v47  ;;  %3228 = vst [vmem:[#allocation2 + $0x44] sm:$0xf] %v3212_v59  ;;  %v2480_v58 = vadd.f32 %v6268_v22, %v2461_v40 }
 0x5d0   :  { %v3095_v13 = vmul.f32 %v3025_v42, %v2903_v48  ;;  %v2348_v36 = vmul.f32 %v6575_v18, %v2347_v44  ;;  %v2841_v53 = vmul.f32 0.03125, %v2805_v46  ;;  %vm3033_vm6 = vweird.f32 %v6569_v14  ;;  %v4044_v44 = vld [vmem:[#allocation2 + $0x24] sm:$0xf0] }
 0x5d1   :  { %v2105_v15 = vpop.xlane.xlu2 %2104  ;;  %v3029_v29 = vmul.f32 0.5, %v3028_v0  ;;  %vm2353_vm7 = vweird.f32 %v6575_v18  ;;  %v2237_v56 = vmax.f32 %v2221_v55, 0.0  ;;  %v6604_v4 = vpop.eup %4204  ;;  %v2496_v20 = vmax.f32 %v2480_v58, 0.0  ;;  %vm3034_vm9 = vmor %vm3032_vm3, %vm3033_vm6  ;;  %v7215_v0 = vld [vmem:[#allocation25_spill] sm:$0xff] }
 0x5d2   :  { %v2153_v25 = vpop.xlane.xlu1 %2152  ;;  %v3114_v35 = vmul.f32 %v6609_v54, %v3095_v13  ;;  %v2349_v43 = vmul.f32 0.5, %v2348_v36  ;;  %v2873_v48 = vsub.f32 %v2841_v53, %v2857_v38  ;;  %v2357_v51 = vmul.f32 %v6604_v4, %v6561_v62  ;;  %vm2354_vm10 = vmor %vm2352_vm5, %vm2353_vm7  ;;  %v3865_v13 = vld [vmem:[#allocation2 + $0x20] sm:$0xf] }
 0x5d3   :  { %v2107_v31 = vpop.xlane.xlu0 %2106  ;;  %v3030_v9 = vsub.f32 1.5, %v3029_v29  ;;  %v6614_v52 = vadd.f32 1e-05, %v2237_v56  ;;  %v6616_v33 = vmul.f32 0.03125, %v2105_v15  ;;  %v2512_v46 = vadd.f32 %v2496_v20, %v7214_v61 }
 0x5d4   :  { %v3133_v1 = vadd.f32 %v6619_v28, %v3114_v35  ;;  %v2350_v7 = vsub.f32 1.5, %v2349_v43  ;;  %v2889_v39 = vmax.f32 %v2873_v48, 0.0  ;;  %v2358_v10 = vmul.f32 %v6604_v4, %v2357_v51 }
 0x5d5   :  { %v3031_v6 = vmul.f32 %v6569_v14, %v3030_v9  ;;  %vm2362_vm8 = vweird.f32 %v6561_v62  ;;  %4206 = vrsqrt.f32 %v6614_v52  ;;  %v3178_v50 = vpack.c.bf16 %v2512_v46, %v2512_v46 }
 0x5d6   :  { %v3149_v38 = vmax.f32 %v3133_v1, 0.0  ;;  %v2351_v19 = vmul.f32 %v6575_v18, %v2350_v7  ;;  %v6631_v63 = vadd.f32 1e-05, %v2889_v39  ;;  %v2359_v47 = vmul.f32 0.5, %v2358_v10  ;;  %v7216_v39 = vld [vmem:[#allocation33_spill] sm:$0xff] }
 0x5d7   :  { %v3035_v5 = vsel %vm3034_vm9, %v6569_v14, %v3031_v6  ;;  %v2206_v59 = vmul.f32 %v6616_v33, %v6616_v33  ;;  %v2190_v40 = vmul.f32 0.03125, %v2153_v25  ;;  %3194 = vst [vmem:[#allocation2 + $0x30] sm:$0xf] %v3178_v50  ;;  %vm2363_vm11 = vweird.f32 %v6604_v4 }
 0x5d8   :  { %v3165_v55 = vadd.f32 %v3149_v38, %v7215_v0  ;;  %v3096_v14 = vmul.f32 %v3035_v5, %v2904_v17  ;;  %v2355_v15 = vsel %vm2354_vm10, %v6575_v18, %v2351_v19  ;;  %4208 = vrsqrt.f32 %v6631_v63  ;;  %vm2364_vm12 = vmor %vm2362_vm8, %vm2363_vm11  ;;  %v7217_v38 = vld [vmem:[#allocation24_spill] sm:$0xff] }
 0x5d9   :  { %v2155_v42 = vpop.xlane.xlu2 %2154  ;;  %v2443_v23 = vmul.f32 %v2355_v15, %v2251_v41  ;;  %v2360_v58 = vsub.f32 1.5, %v2359_v47  ;;  %v2222_v25 = vsub.f32 %v2190_v40, %v2206_v59  ;;  %v3866_v8 = vor.u32 %v4044_v44, %v3865_v13 }
 0x5da   :  { %v2807_v45 = vpop.xlane.xlu1 %2806  ;;  %v3213_v53 = vpack.c.bf16 %v3165_v55, %v3165_v55  ;;  %v3115_v29 = vmul.f32 %v6609_v54, %v3096_v14  ;;  %v6653_v21 = vmul.f32 0.03125, %v2107_v31  ;;  %v2191_v26 = vmul.f32 0.03125, %v2155_v42 }
 0x5db   :  { %v6650_v36 = vpop.xlane.xlu0 %2760  ;;  %v4207_v17 = vpop.eup %4206  ;;  %v2462_v18 = vmul.f32 %v6254_v27, %v2443_v23  ;;  %v2361_v56 = vmul.f32 %v6604_v4, %v2360_v58  ;;  %v2238_v3 = vmax.f32 %v2222_v25, 0.0  ;;  %3482 = vmatmul.bf16.gmra.mxu2 %v3866_v8  ;;  %v2858_v48 = vmul.f32 %v6595_v24, %v6595_v24  ;;  %v7219_v25 = vld [vmem:[#allocation38_spill] sm:$0xff]  ;;  %v7220_v8 = vld [vmem:[#allocation44_spill] sm:$0xff] }
 0x5dc   :  { %3229 = vst [vmem:[#allocation2 + $0x4c] sm:$0xf] %v3213_v53  ;;  %v3134_v41 = vadd.f32 %v6619_v28, %v3115_v29  ;;  %v2367_v20 = vmul.f32 %v4207_v17, %v6614_v52  ;;  %v2207_v31 = vmul.f32 %v6653_v21, %v6653_v21  ;;  %v2253_v6 = vsub.f32 %v7216_v39, %v6563_v57 }
 0x5dd   :  { %v2481_v35 = vadd.f32 %v6268_v22, %v2462_v18  ;;  %v2365_v43 = vsel %vm2364_vm12, %v6604_v4, %v2361_v56  ;;  %v6669_v9 = vadd.f32 1e-05, %v2238_v3  ;;  %vm2372_vm13 = vweird.f32 %v6614_v52 }
 0x5de   :  { %v6671_v51 = vpop.eup %4208  ;;  %v3150_v61 = vmax.f32 %v3134_v41, 0.0  ;;  %v2444_v62 = vmul.f32 %v2365_v43, %v2252_v2  ;;  %v2368_v46 = vmul.f32 %v4207_v17, %v2367_v20  ;;  %v2223_v1 = vsub.f32 %v2191_v26, %v2207_v31  ;;  %v7221_v26 = vld [vmem:[#allocation36_spill] sm:$0xff]  ;;  %v4047_v43 = vld [vmem:[#allocation2 + $0x44] sm:$0xf] }
 0x5df   :  { %v2497_v7 = vmax.f32 %v2481_v35, 0.0  ;;  %v3037_v4 = vmul.f32 %v6671_v51, %v6631_v63  ;;  %4210 = vrsqrt.f32 %v6669_v9  ;;  %v2842_v57 = vmul.f32 0.03125, %v2807_v45 }
 0x5e0   :  { %v3166_v19 = vadd.f32 %v3150_v61, %v7217_v38  ;;  %v2463_v5 = vmul.f32 %v6254_v27, %v2444_v62  ;;  %v2369_v47 = vmul.f32 0.5, %v2368_v46  ;;  %v2239_v59 = vmax.f32 %v2223_v1, 0.0 }
 0x5e1   :  { %v2111_v10 = vpop.xlane.xlu2 %2110  ;;  %v2513_v30 = vadd.f32 %v2497_v7, %v7218_v12  ;;  %v3038_v2 = vmul.f32 %v6671_v51, %v3037_v4  ;;  %vm2373_vm14 = vweird.f32 %v4207_v17  ;;  %v2874_v27 = vsub.f32 %v2842_v57, %v2858_v48  ;;  %v6719_v7 = vld [vmem:[%s6985_s6 + $0x1] ss:$0 sm:$0xff] }
 0x5e2   :  { %v2109_v50 = vpop.xlane.xlu1 %2108  ;;  %v3214_v44 = vpack.c.bf16 %v3166_v19, %v3166_v19  ;;  %v2482_v42 = vadd.f32 %v6268_v22, %v2463_v5  ;;  %v2370_v0 = vsub.f32 1.5, %v2369_v47  ;;  %v6687_v15 = vadd.f32 1e-05, %v2239_v59  ;;  %vm2374_vm0 = vmor %vm2372_vm13, %vm2373_vm14  ;;  %v6734_v19 = vld [vmem:[#allocation13 + $0x1] ss:$0 sm:$0xff] }
 0x5e3   :  { %v2157_v40 = vpop.xlane.xlu0 %2156  ;;  %v3179_v55 = vpack.c.bf16 %v2513_v30, %v2513_v30  ;;  %v3039_v14 = vmul.f32 0.5, %v3038_v2  ;;  %vm3042_vm15 = vweird.f32 %v6631_v63  ;;  %v2254_v13 = vsub.f32 %v7219_v25, %v6616_v33  ;;  %v3883_v29 = vld [vmem:[#allocation2 + $0x48] sm:$0xf0] }
 0x5e4   :  { %3230 = vst [vmem:[#allocation2 + $0x54] sm:$0xf] %v3214_v44  ;;  %v2498_v23 = vmax.f32 %v2482_v42, 0.0  ;;  %v2371_v58 = vmul.f32 %v4207_v17, %v2370_v0  ;;  %vm3043_vm1 = vweird.f32 %v6671_v51  ;;  %4212 = vrsqrt.f32 %v6687_v15  ;;  %v3873_v42 = vld [vmem:[#allocation2 + $0x30] sm:$0xf] }
 0x5e5   :  { %v6692_v45 = vpop.eup %4210  ;;  %3195 = vst [vmem:[#allocation2 + $0x38] sm:$0xf] %v3179_v55  ;;  %v3040_v22 = vsub.f32 1.5, %v3039_v14  ;;  %v2890_v53 = vmax.f32 %v2874_v27, 0.0  ;;  %v2255_v41 = vsub.f32 %v7221_v26, %v6653_v21  ;;  %v6707_v35 = vmul.f32 0.03125, %v6650_v36  ;;  %vm3044_vm2 = vmor %vm3042_vm15, %vm3043_vm1  ;;  %v7226_v21 = vld [vmem:[#allocation54_spill] sm:$0xff] }
 0x5e6   :  { %v2514_v18 = vadd.f32 %v2498_v23, %v7220_v8  ;;  %v2375_v56 = vsel %vm2374_vm0, %v4207_v17, %v2371_v58  ;;  %v2377_v3 = vmul.f32 %v6692_v45, %v6669_v9  ;;  %v6714_v46 = vmul.f32 0.03125, %v2109_v50  ;;  %v7222_v23 = vld [vmem:[#allocation27_spill] sm:$0xff] }
 0x5e7   :  { %v2445_v20 = vmul.f32 %v2375_v56, %v2253_v6  ;;  %v3041_v52 = vmul.f32 %v6671_v51, %v3040_v22  ;;  %v6704_v31 = vadd.f32 1e-05, %v2890_v53  ;;  %v3886_v1 = vor.u32 %v4047_v43, %v3883_v29 }
 0x5e8   :  { %v3180_v62 = vpack.c.bf16 %v2514_v18, %v2514_v18  ;;  %v2378_v17 = vmul.f32 %v6692_v45, %v2377_v3  ;;  %v6724_v6 = vmul.f32 0.03125, %v2111_v10  ;;  %vm2382_vm3 = vweird.f32 %v6669_v9 }
 0x5e9   :  { %v2809_v48 = vpop.xlane.xlu2 %2808  ;;  %v2464_v36 = vmul.f32 %v6719_v7, %v2445_v20  ;;  %v3045_v39 = vsel %vm3044_vm2, %v6671_v51, %v3041_v52  ;;  %4214 = vrsqrt.f32 %v6704_v31  ;;  %v2859_v50 = vmul.f32 %v6707_v35, %v6707_v35  ;;  %3541 = vmatmul.bf16.gmra.mxu3 %v3886_v1 }
 0x5ea   :  { %v2159_v61 = vpop.xlane.xlu1 %2158  ;;  %3196 = vst [vmem:[#allocation2 + $0x40] sm:$0xf] %v3180_v62  ;;  %v3097_v63 = vmul.f32 %v3045_v39, %v2905_v60  ;;  %v2379_v4 = vmul.f32 0.5, %v2378_v17  ;;  %v6732_v38 = vpop.eup %4212  ;;  %v2209_v10 = vmul.f32 %v6724_v6, %v6724_v6  ;;  %v2208_v11 = vmul.f32 %v6714_v46, %v6714_v46 }
 0x5eb   :  { %v2483_v51 = vadd.f32 %v6734_v19, %v2464_v36  ;;  %v2192_v34 = vmul.f32 0.03125, %v2157_v40  ;;  %v2113_v60 = vpop.xlane.xlu0 %2112  ;;  %vm2383_vm4 = vweird.f32 %v6692_v45  ;;  %v2387_v12 = vmul.f32 %v6732_v38, %v6687_v15 }
 0x5ec   :  { %v3116_v5 = vmul.f32 %v6609_v54, %v3097_v63  ;;  %v2380_v47 = vsub.f32 1.5, %v2379_v4  ;;  %v4046_v30 = vld [vmem:[#allocation2 + $0x34] sm:$0xf0]  ;;  %v2843_v57 = vmul.f32 0.03125, %v2809_v48  ;;  %v2193_v44 = vmul.f32 0.03125, %v2159_v61  ;;  %vm2384_vm5 = vmor %vm2382_vm3, %vm2383_vm4  ;;  %v7223_v61 = vld [vmem:[#allocation26_spill] sm:$0xff] }
 0x5ed   :  { %v2499_v2 = vmax.f32 %v2483_v51, 0.0  ;;  %v2224_v59 = vsub.f32 %v2192_v34, %v2208_v11  ;;  %v2388_v40 = vmul.f32 %v6732_v38, %v2387_v12  ;;  %v3874_v14 = vor.u32 %v4046_v30, %v3873_v42  ;;  %v7224_v12 = vld [vmem:[#allocation53_spill] sm:$0xff] }
 0x5ee   :  { %v3135_v0 = vadd.f32 %v6619_v28, %v3116_v5  ;;  %v2381_v55 = vmul.f32 %v6692_v45, %v2380_v47  ;;  %v2875_v53 = vsub.f32 %v2843_v57, %v2859_v50  ;;  %v2225_v29 = vsub.f32 %v2193_v44, %v2209_v10 }
 0x5ef   :  { %v6748_v27 = vpop.eup %4214  ;;  %v2515_v58 = vadd.f32 %v2499_v2, %v7222_v23  ;;  %v2240_v22 = vmax.f32 %v2224_v59, 0.0  ;;  %v2389_v20 = vmul.f32 0.5, %v2388_v40  ;;  %3487 = vmatmul.bf16.gmra.mxu2 %v3874_v14  ;;  %vm2393_vm6 = vweird.f32 %v6732_v38  ;;  %v7225_v59 = vld [vmem:[#allocation46_spill] sm:$0xff] }
 0x5f0   :  { %v3151_v56 = vmax.f32 %v3135_v0, 0.0  ;;  %v2385_v3 = vsel %vm2384_vm5, %v6692_v45, %v2381_v55  ;;  %v3047_v52 = vmul.f32 %v6748_v27, %v6704_v31  ;;  %v2891_v45 = vmax.f32 %v2875_v53, 0.0 }
 0x5f1   :  { %v2161_v8 = vpop.xlane.xlu2 %2160  ;;  %v3181_v43 = vpack.c.bf16 %v2515_v58, %v2515_v58  ;;  %v2446_v48 = vmul.f32 %v2385_v3, %v2254_v13  ;;  %v6760_v9 = vadd.f32 1e-05, %v2240_v22  ;;  %v2390_v17 = vsub.f32 1.5, %v2389_v20 }
 0x5f2   :  { %v2763_v18 = vpop.xlane.xlu1 %2762  ;;  %v3167_v62 = vadd.f32 %v3151_v56, %v7223_v61  ;;  %v3048_v1 = vmul.f32 %v6748_v27, %v3047_v52  ;;  %vm2392_vm7 = vweird.f32 %v6687_v15  ;;  %v2241_v39 = vmax.f32 %v2225_v29, 0.0 }
 0x5f3   :  { %3197 = vst [vmem:[#allocation2 + $0x48] sm:$0xf] %v3181_v43  ;;  %v2465_v36 = vmul.f32 %v6719_v7, %v2446_v48  ;;  %4216 = vrsqrt.f32 %v6760_v9  ;;  %v2391_v25 = vmul.f32 %v6732_v38, %v2390_v17  ;;  %v6768_v63 = vadd.f32 1e-05, %v2891_v45  ;;  %vm2394_vm8 = vmor %vm2392_vm7, %vm2393_vm6  ;;  %v2163_v15 = vpop.xlane.xlu0 %2162 }
 0x5f4   :  { %v3215_v33 = vpack.c.bf16 %v3167_v62, %v3167_v62  ;;  %v3049_v13 = vmul.f32 0.5, %v3048_v1  ;;  %vm3053_vm9 = vweird.f32 %v6748_v27  ;;  %v6774_v50 = vadd.f32 1e-05, %v2241_v39  ;;  %v7228_v62 = vld [vmem:[#allocation47_spill] sm:$0xff] }
 0x5f5   :  { %v2484_v4 = vadd.f32 %v6734_v19, %v2465_v36  ;;  %v6776_v51 = vmul.f32 0.03125, %v2113_v60  ;;  %v2395_v10 = vsel %vm2394_vm8, %v6732_v38, %v2391_v25  ;;  %4218 = vrsqrt.f32 %v6768_v63 }
 0x5f6   :  { %3231 = vst [vmem:[#allocation2 + $0x5c] sm:$0xf] %v3215_v33  ;;  %v3050_v11 = vsub.f32 1.5, %v3049_v13  ;;  %v2194_v34 = vmul.f32 0.03125, %v2161_v8  ;;  %v2447_v47 = vmul.f32 %v2395_v10, %v2255_v41  ;;  %4220 = vrsqrt.f32 %v6774_v50 }
 0x5f7   :  { %v2500_v5 = vmax.f32 %v2484_v4, 0.0  ;;  %v2906_v30 = vsub.f32 %v7224_v12, %v6595_v24  ;;  %vm3052_vm10 = vweird.f32 %v6704_v31  ;;  %v2210_v38 = vmul.f32 %v6776_v51, %v6776_v51  ;;  %v7227_v24 = vld [vmem:[#allocation39_spill] sm:$0xff]  ;;  %v3881_v4 = vld [vmem:[#allocation2 + $0x40] sm:$0xf] }
 0x5f8   :  { %v3051_v60 = vmul.f32 %v6748_v27, %v3050_v11  ;;  %v2466_v44 = vmul.f32 %v6719_v7, %v2447_v47  ;;  %vm3054_vm11 = vmor %vm3052_vm10, %vm3053_vm9  ;;  %v2907_v26 = vsub.f32 %v7226_v21, %v6707_v35  ;;  %v2256_v41 = vsub.f32 %v7227_v24, %v6714_v46  ;;  %v4049_v24 = vld [vmem:[#allocation2 + $0x54] sm:$0xf] }
 0x5f9   :  { %v6790_v2 = vpop.eup %4216  ;;  %v2516_v57 = vadd.f32 %v2500_v5, %v7225_v59  ;;  %v2765_v42 = vpop.xlane.xlu2 %2764  ;;  %v2226_v40 = vsub.f32 %v2194_v34, %v2210_v38  ;;  %v6803_v14 = vmul.f32 0.03125, %v2763_v18  ;;  %vm2402_vm12 = vweird.f32 %v6760_v9  ;;  %v7229_v38 = vld [vmem:[#allocation31_spill] sm:$0xff] }
 0x5fa   :  { %v2115_v31 = vpop.xlane.xlu1 %2114  ;;  %v3055_v0 = vsel %vm3054_vm11, %v6748_v27, %v3051_v60  ;;  %v2397_v55 = vmul.f32 %v6790_v2, %v6760_v9  ;;  %v2485_v58 = vadd.f32 %v6734_v19, %v2466_v44  ;;  %v6810_v8 = vmul.f32 0.03125, %v2163_v15  ;;  %v4048_v33 = vld [vmem:[#allocation2 + $0x44] sm:$0xf0] }
 0x5fb   :  { %v3182_v23 = vpack.c.bf16 %v2516_v57, %v2516_v57  ;;  %v3098_v22 = vmul.f32 %v3055_v0, %v2906_v30  ;;  %v6807_v53 = vpop.eup %4218  ;;  %v2242_v29 = vmax.f32 %v2226_v40, 0.0  ;;  %v6812_v27 = vmul.f32 0.03125, %v2765_v42  ;;  %v2811_v39 = vpop.xlane.xlu0 %2810 }
 0x5fc   :  { %v2398_v46 = vmul.f32 %v6790_v2, %v2397_v55  ;;  %v6814_v56 = vpop.eup %4220  ;;  %v2501_v18 = vmax.f32 %v2485_v58, 0.0  ;;  %vm2403_vm13 = vweird.f32 %v6790_v2  ;;  %v3057_v20 = vmul.f32 %v6807_v53, %v6768_v63 }
 0x5fd   :  { %3198 = vst [vmem:[#allocation2 + $0x50] sm:$0xf] %v3182_v23  ;;  %v3117_v3 = vmul.f32 %v6609_v54, %v3098_v22  ;;  %vm3062_vm14 = vweird.f32 %v6768_v63  ;;  %v2407_v43 = vmul.f32 %v6814_v56, %v6774_v50  ;;  %v6823_v48 = vadd.f32 1e-05, %v2242_v29  ;;  %v3891_v5 = vld [vmem:[#allocation2 + $0x58] sm:$0xf0]  ;;  %vm2404_vm0 = vmor %vm2402_vm12, %vm2403_vm13 }
 0x5fe   :  { %v2399_v52 = vmul.f32 0.5, %v2398_v46  ;;  %v2860_v61 = vmul.f32 %v6803_v14, %v6803_v14  ;;  %v2517_v17 = vadd.f32 %v2501_v18, %v7228_v62  ;;  %v3058_v45 = vmul.f32 %v6807_v53, %v3057_v20 }
 0x5ff   :  { %v3136_v1 = vadd.f32 %v6619_v28, %v3117_v3  ;;  %v2861_v36 = vmul.f32 %v6812_v27, %v6812_v27  ;;  %vm3063_vm15 = vweird.f32 %v6807_v53  ;;  %v2408_v13 = vmul.f32 %v6814_v56, %v2407_v43 }
 0x600   :  { %v2400_v25 = vsub.f32 1.5, %v2399_v52  ;;  %4222 = vrsqrt.f32 %v6823_v48  ;;  %v3183_v15 = vpack.c.bf16 %v2517_v17, %v2517_v17  ;;  %v3059_v11 = vmul.f32 0.5, %v3058_v45  ;;  %vm3064_vm2 = vmor %vm3062_vm14, %vm3063_vm15 }
 0x601   :  { %v3152_v10 = vmax.f32 %v3136_v1, 0.0  ;;  %v6835_v34 = vmul.f32 0.03125, %v2115_v31  ;;  %v2409_v12 = vmul.f32 0.5, %v2408_v13  ;;  %v2844_v30 = vmul.f32 0.03125, %v2811_v39 }
 0x602   :  { %v2401_v47 = vmul.f32 %v6790_v2, %v2400_v25  ;;  %v3882_v60 = vor.u32 %v4048_v33, %v3881_v4  ;;  %3199 = vst [vmem:[#allocation2 + $0x58] sm:$0xf] %v3183_v15  ;;  %v3060_v57 = vsub.f32 1.5, %v3059_v11  ;;  %vm2413_vm1 = vweird.f32 %v6814_v56  ;;  %v2813_v42 = vpop.xlane.xlu1 %2812  ;;  %v7231_v33 = vld [vmem:[#allocation50_spill] sm:$0xff] }
 0x603   :  { %v3168_v59 = vadd.f32 %v3152_v10, %v7229_v38  ;;  %v2211_v44 = vmul.f32 %v6835_v34, %v6835_v34  ;;  %v2410_v0 = vsub.f32 1.5, %v2409_v12  ;;  %v2876_v55 = vsub.f32 %v2844_v30, %v2860_v61  ;;  %v7232_v30 = vld [vmem:[#allocation51_spill] sm:$0xff] }
 0x604   :  { %v2405_v31 = vsel %vm2404_vm0, %v6790_v2, %v2401_v47  ;;  %3492 = vmatmul.bf16.gmra.mxu2 %v3882_v60  ;;  %v3894_v40 = vor.u32 %v4049_v24, %v3891_v5  ;;  %v3061_v22 = vmul.f32 %v6807_v53, %v3060_v57  ;;  %vm2412_vm3 = vweird.f32 %v6774_v50  ;;  %v3889_v24 = vld [vmem:[#allocation2 + $0x50] sm:$0xf] }
 0x605   :  { %v3216_v23 = vpack.c.bf16 %v3168_v59, %v3168_v59  ;;  %v2448_v58 = vmul.f32 %v2405_v31, %v2256_v41  ;;  %v2227_v9 = vsub.f32 %v6810_v8, %v2211_v44  ;;  %v2411_v29 = vmul.f32 %v6814_v56, %v2410_v0  ;;  %v7230_v41 = vld [vmem:[#allocation37_spill] sm:$0xff]  ;;  %vm2414_vm4 = vmor %vm2412_vm3, %vm2413_vm1 }
 0x606   :  { %v4223_v46 = vpop.eup %4222  ;;  %v2892_v2 = vmax.f32 %v2876_v55, 0.0  ;;  %3546 = vmatmul.bf16.gmra.mxu3 %v3894_v40  ;;  %v2845_v18 = vmul.f32 0.03125, %v2813_v42  ;;  %v2257_v3 = vsub.f32 %v7230_v41, %v6724_v6  ;;  %v3065_v8 = vsel %vm3064_vm2, %v6807_v53, %v3061_v22  ;;  %v7233_v59 = vld [vmem:[#allocation49_spill] sm:$0xff] }
 0x607   :  { %3232 = vst [vmem:[#allocation2 + $0x64] sm:$0xf] %v3216_v23  ;;  %v2467_v20 = vmul.f32 %v6719_v7, %v2448_v58  ;;  %v2417_v63 = vmul.f32 %v4223_v46, %v6823_v48  ;;  %v3099_v50 = vmul.f32 %v3065_v8, %v2907_v26  ;;  %v2415_v52 = vsel %vm2414_vm4, %v6814_v56, %v2411_v29 }
 0x608   :  { %v2243_v43 = vmax.f32 %v2227_v9, 0.0  ;;  %v6866_v61 = vadd.f32 1e-05, %v2892_v2  ;;  %v2449_v62 = vmul.f32 %v2415_v52, %v2257_v3  ;;  %v2877_v1 = vsub.f32 %v2845_v18, %v2861_v36 }
 0x609   :  { %v2486_v6 = vadd.f32 %v6734_v19, %v2467_v20  ;;  %v2418_v17 = vmul.f32 %v4223_v46, %v2417_v63  ;;  %v3118_v53 = vmul.f32 %v6609_v54, %v3099_v50  ;;  %vm2423_vm5 = vweird.f32 %v4223_v46  ;;  %v4050_v47 = vld [vmem:[#allocation2 + $0x54] sm:$0xf0]  ;;  %v7234_v63 = vld [vmem:[#allocation30_spill] sm:$0xff] }
 0x60a   :  { %v6870_v45 = vadd.f32 1e-05, %v2243_v43  ;;  %4224 = vrsqrt.f32 %v6866_v61  ;;  %v2468_v35 = vmul.f32 %v6719_v7, %v2449_v62  ;;  %v2893_v26 = vmax.f32 %v2877_v1, 0.0 }
 0x60b   :  { %v2502_v39 = vmax.f32 %v2486_v6, 0.0  ;;  %v2419_v21 = vmul.f32 0.5, %v2418_v17  ;;  %v3137_v56 = vadd.f32 %v6619_v28, %v3118_v53  ;;  %vm2422_vm6 = vweird.f32 %v6823_v48 }
 0x60c   :  { %4226 = vrsqrt.f32 %v6870_v45  ;;  %v2487_v36 = vadd.f32 %v6734_v19, %v2468_v35  ;;  %v6878_v4 = vadd.f32 1e-05, %v2893_v26  ;;  %v2258_v38 = vsub.f32 %v6170_v37, %v6776_v51  ;;  %vm2424_vm7 = vmor %vm2422_vm6, %vm2423_vm5 }
 0x60d   :  { %v2518_v25 = vadd.f32 %v2502_v39, %v7231_v33  ;;  %v2420_v13 = vsub.f32 1.5, %v2419_v21  ;;  %v3153_v15 = vmax.f32 %v3137_v56, 0.0  ;;  %v3890_v55 = vor.u32 %v4050_v47, %v3889_v24  ;;  %v7235_v47 = vld [vmem:[#allocation48_spill] sm:$0xff] }
 0x60e   :  { %v2503_v11 = vmax.f32 %v2487_v36, 0.0  ;;  %4228 = vrsqrt.f32 %v6878_v4  ;;  %vm3072_vm10 = vweird.f32 %v6866_v61  ;;  %v2908_v52 = vsub.f32 %v6198_v49, %v6803_v14  ;;  %v4051_v1 = vld [vmem:[#allocation2 + $0x64] sm:$0xf] }
 0x60f   :  { %v3184_v10 = vpack.c.bf16 %v2518_v25, %v2518_v25  ;;  %v2421_v5 = vmul.f32 %v4223_v46, %v2420_v13  ;;  %v3169_v60 = vadd.f32 %v3153_v15, %v7232_v30  ;;  %v2259_v43 = vsub.f32 %v6191_v16, %v6835_v34 }
 0x610   :  { %v4225_v12 = vpop.eup %4224  ;;  %v2519_v57 = vadd.f32 %v2503_v11, %v7233_v59  ;;  %vm2432_vm12 = vweird.f32 %v6870_v45  ;;  %vm3082_vm15 = vweird.f32 %v6878_v4  ;;  %v2909_v34 = vsub.f32 %v6231_v32, %v6812_v27  ;;  %v7236_v27 = vld [vmem:[#allocation28_spill] sm:$0xff]  ;;  %v7237_v59 = vld [vmem:[#allocation29_spill] sm:$0xff] }
 0x611   :  { %3200 = vst [vmem:[#allocation2 + $0x60] sm:$0xf] %v3184_v10  ;;  %v2425_v44 = vsel %vm2424_vm7, %v4223_v46, %v2421_v5  ;;  %v3067_v48 = vmul.f32 %v4225_v12, %v6866_v61  ;;  %v3217_v31 = vpack.c.bf16 %v3169_v60, %v3169_v60  ;;  %vm3073_vm8 = vweird.f32 %v4225_v12 }
 0x612   :  { %v4227_v42 = vpop.eup %4226  ;;  %v2450_v0 = vmul.f32 %v2425_v44, %v2258_v38  ;;  %v3185_v40 = vpack.c.bf16 %v2519_v57, %v2519_v57  ;;  %vm3074_vm11 = vmor %vm3072_vm10, %vm3073_vm8  ;;  %v6913_v44 = vld [vmem:[#allocation16] ss:$0 sm:$0xff] }
 0x613   :  { %v2427_v23 = vmul.f32 %v4227_v42, %v6870_v45  ;;  %v3068_v58 = vmul.f32 %v4225_v12, %v3067_v48  ;;  %3233 = vst [vmem:[#allocation2 + $0x6c] sm:$0xf] %v3217_v31  ;;  %vm2433_vm9 = vweird.f32 %v4227_v42 }
 0x614   :  { %v2469_v37 = vmul.f32 %v6719_v7, %v2450_v0  ;;  %3497 = vmatmul.bf16.gmra.mxu2 %v3890_v55  ;;  %v4229_v51 = vpop.eup %4228  ;;  %3201 = vst [vmem:[#allocation2 + $0x68] sm:$0xf] %v3185_v40  ;;  %vm2434_vm14 = vmor %vm2432_vm12, %vm2433_vm9 }
 0x615   :  { %v2428_v22 = vmul.f32 %v4227_v42, %v2427_v23  ;;  %v3069_v9 = vmul.f32 0.5, %v3068_v58  ;;  %v3077_v29 = vmul.f32 %v4229_v51, %v6878_v4  ;;  %vm3083_vm13 = vweird.f32 %v4229_v51 }
 0x616   :  { %v2488_v46 = vadd.f32 %v6734_v19, %v2469_v37  ;;  %vm3084_vm0 = vmor %vm3082_vm15, %vm3083_vm13 }
 0x617   :  { %v2429_v2 = vmul.f32 0.5, %v2428_v22  ;;  %v3070_v18 = vsub.f32 1.5, %v3069_v9  ;;  %v3078_v3 = vmul.f32 %v4229_v51, %v3077_v29 }
 0x618   :  { %v2504_v41 = vmax.f32 %v2488_v46, 0.0  ;;  %v3897_v13 = vld [vmem:[#allocation2 + $0x60] sm:$0xf] }
 0x619   :  { %v2430_v20 = vsub.f32 1.5, %v2429_v2  ;;  %v3071_v8 = vmul.f32 %v4225_v12, %v3070_v18  ;;  %v3079_v6 = vmul.f32 0.5, %v3078_v3 }
 0x61a   :  { %v2520_v50 = vadd.f32 %v2504_v41, %v7234_v63  ;;  %v3899_v53 = vld [vmem:[#allocation2 + $0x68] sm:$0xf0] }
 0x61b   :  { %v2431_v62 = vmul.f32 %v4227_v42, %v2430_v20  ;;  %v3075_v17 = vsel %vm3074_vm11, %v4225_v12, %v3071_v8  ;;  %v3080_v35 = vsub.f32 1.5, %v3079_v6  ;;  %v3902_v21 = vor.u32 %v4051_v1, %v3899_v53  ;;  %v4052_v45 = vld [vmem:[#allocation2 + $0x64] sm:$0xf0] }
 0x61c   :  { %v3186_v39 = vpack.c.bf16 %v2520_v50, %v2520_v50  ;;  %v3100_v61 = vmul.f32 %v3075_v17, %v2908_v52  ;;  %v3898_v11 = vor.u32 %v4052_v45, %v3897_v13 }
 0x61d   :  { %v2435_v26 = vsel %vm2434_vm14, %v4227_v42, %v2431_v62  ;;  %v3081_v14 = vmul.f32 %v4229_v51, %v3080_v35  ;;  %3551 = vmatmul.bf16.gmra.mxu3 %v3902_v21  ;;  %v3522_v42 = vpop.f32.mrf.mxu3 }
 0x61e   :  { %3202 = vst [vmem:[#allocation2 + $0x70] sm:$0xf] %v3186_v39  ;;  %v2451_v49 = vmul.f32 %v2435_v26, %v2259_v43  ;;  %v3119_v16 = vmul.f32 %v6609_v54, %v3100_v61 }
 0x61f   :  { %v3085_v25 = vsel %vm3084_vm0, %v4229_v51, %v3081_v14 }
 0x620   :  { %v2470_v56 = vmul.f32 %v6719_v7, %v2451_v49  ;;  %v3138_v33 = vadd.f32 %v6619_v28, %v3119_v16  ;;  %v3101_v36 = vmul.f32 %v3085_v25, %v2909_v34 }
 0x622   :  { %v2489_v15 = vadd.f32 %v6734_v19, %v2470_v56  ;;  %v3154_v10 = vmax.f32 %v3138_v33, 0.0  ;;  %v3120_v4 = vmul.f32 %v6609_v54, %v3101_v36 }
 0x624   :  { %v2505_v5 = vmax.f32 %v2489_v15, 0.0  ;;  %v3170_v12 = vadd.f32 %v3154_v10, %v7235_v47  ;;  %3502 = vmatmul.bf16.gmra.mxu2 %v3898_v11  ;;  %v3139_v32 = vadd.f32 %v6619_v28, %v3120_v4 }
 0x625   :  { %v3905_v54 = vld [vmem:[#allocation2 + $0x70] sm:$0xf]  ;;  %v3524_v51 = vpop.f32.mrf.mxu3 }
 0x626   :  { %v2521_v30 = vadd.f32 %v2505_v5, %v7236_v27  ;;  %v3218_v7 = vpack.c.bf16 %v3170_v12, %v3170_v12  ;;  %v3155_v60 = vmax.f32 %v3139_v32, 0.0 }
 0x628   :  { %v3187_v38 = vpack.c.bf16 %v2521_v30, %v2521_v30  ;;  %3234 = vst [vmem:[#allocation2 + $0x74] sm:$0xf] %v3218_v7  ;;  %v3171_v57 = vadd.f32 %v3155_v60, %v7237_v59 }
 0x62a   :  { %3203 = vst [vmem:[#allocation2 + $0x78] sm:$0xf] %v3187_v38  ;;  %v3219_v19 = vpack.c.bf16 %v3171_v57, %v3171_v57 }
 0x62c   :  { %3235 = vst [vmem:[#allocation2 + $0x7c] sm:$0xf] %v3219_v19 }
 0x62d   :  { %v3527_v9 = vpop.f32.mrf.mxu3 }
 0x62f   :  { %v4053_v0 = vld [vmem:[#allocation2 + $0x74] sm:$0xf] }
 0x631   :  { %v4054_v48 = vld [vmem:[#allocation2 + $0x74] sm:$0xf0] }
 0x632   :  { %v3906_v24 = vor.u32 %v4054_v48, %v3905_v54  ;;  %v3473_v31 = vpop.f32.mrf.mxu2 }
 0x633   :  { %v3474_v28 = vadd.f32 %v6913_v44, %v3473_v31  ;;  %v3907_v55 = vld [vmem:[#allocation2 + $0x78] sm:$0xf0] }
 0x634   :  { %3507 = vmatmul.bf16.gmra.mxu2 %v3906_v24  ;;  %v3910_v40 = vor.u32 %v4053_v0, %v3907_v55 }
 0x635   :  { %v3523_v23 = vadd.f32 %v3522_v42, %v3474_v28  ;;  %v3529_v3 = vpop.f32.mrf.mxu3 }
 0x636   :  { %3556 = vmatmul.bf16.gmra.mxu3 %v3910_v40 }
 0x637   :  { %3562 = vst [vmem:[%s6989_s10] sm:$0xff] %v3523_v23 }
 0x63a   :  { %v3475_v58 = vpop.f32.mrf.mxu2 }
 0x63b   :  { %v3476_v37 = vadd.f32 %v6913_v44, %v3475_v58 }
 0x63d   :  { %v3525_v22 = vadd.f32 %v3524_v51, %v3476_v37  ;;  %v3532_v8 = vpop.f32.mrf.mxu3 }
 0x63f   :  { %3563 = vst [vmem:[%s6989_s10 + $0x8] sm:$0xff] %v3525_v22 }
 0x645   :  { %v3478_v46 = vpop.f32.mrf.mxu2  ;;  %v3534_v62 = vpop.f32.mrf.mxu3 }
 0x646   :  { %v3479_v29 = vadd.f32 %v6913_v44, %v3478_v46 }
 0x648   :  { %v3528_v2 = vadd.f32 %v3527_v9, %v3479_v29 }
 0x64a   :  { %3564 = vst [vmem:[%s6989_s10 + $0x10] sm:$0xff] %v3528_v2 }
 0x64d   :  { %v3480_v18 = vpop.f32.mrf.mxu2 }
 0x64e   :  { %v3481_v41 = vadd.f32 %v6913_v44, %v3480_v18  ;;  %v3537_v1 = vpop.f32.mrf.mxu3 }
 0x650   :  { %v3530_v20 = vadd.f32 %v3529_v3, %v3481_v41 }
 0x652   :  { %3565 = vst [vmem:[%s6989_s10 + $0x18] sm:$0xff] %v3530_v20 }
 0x656   :  { %v3539_v35 = vpop.f32.mrf.mxu3 }
 0x65e   :  { %v3483_v63 = vpop.f32.mrf.mxu2 }
 0x65f   :  { %v3484_v50 = vadd.f32 %v6913_v44, %v3483_v63 }
 0x661   :  { %v3533_v52 = vadd.f32 %v3532_v8, %v3484_v50 }
 0x663   :  { %3566 = vst [vmem:[%s6989_s10 + $0x20] sm:$0xff] %v3533_v52 }
 0x666   :  { %v3485_v43 = vpop.f32.mrf.mxu2 }
 0x667   :  { %v3486_v6 = vadd.f32 %v6913_v44, %v3485_v43 }
 0x669   :  { %v3535_v17 = vadd.f32 %v3534_v62, %v3486_v6 }
 0x66b   :  { %3567 = vst [vmem:[%s6989_s10 + $0x28] sm:$0xff] %v3535_v17 }
 0x66c   :  { %v3542_v16 = vpop.f32.mrf.mxu3 }
 0x672   :  { %v3488_v53 = vpop.f32.mrf.mxu2 }
 0x673   :  { %v3489_v39 = vadd.f32 %v6913_v44, %v3488_v53 }
 0x674   :  { %v3544_v56 = vpop.f32.mrf.mxu3 }
 0x675   :  { %v3538_v61 = vadd.f32 %v3537_v1, %v3489_v39 }
 0x677   :  { %3568 = vst [vmem:[%s6989_s10 + $0x30] sm:$0xff] %v3538_v61 }
 0x67a   :  { %v3490_v21 = vpop.f32.mrf.mxu2 }
 0x67b   :  { %v3491_v26 = vadd.f32 %v6913_v44, %v3490_v21 }
 0x67d   :  { %v3540_v49 = vadd.f32 %v3539_v35, %v3491_v26 }
 0x67f   :  { %3569 = vst [vmem:[%s6989_s10 + $0x38] sm:$0xff] %v3540_v49 }
 0x687   :  { %v3493_v14 = vpop.f32.mrf.mxu2 }
 0x688   :  { %v3494_v34 = vadd.f32 %v6913_v44, %v3493_v14 }
 0x689   :  { %v3547_v13 = vpop.f32.mrf.mxu3 }
 0x68a   :  { %v3543_v45 = vadd.f32 %v3542_v16, %v3494_v34 }
 0x68c   :  { %3570 = vst [vmem:[%s6989_s10 + $0x40] sm:$0xff] %v3543_v45 }
 0x68f   :  { %v3495_v33 = vpop.f32.mrf.mxu2 }
 0x690   :  { %v3496_v25 = vadd.f32 %v6913_v44, %v3495_v33 }
 0x691   :  { %v3549_v4 = vpop.f32.mrf.mxu3 }
 0x692   :  { %v3545_v36 = vadd.f32 %v3544_v56, %v3496_v25 }
 0x694   :  { %3571 = vst [vmem:[%s6989_s10 + $0x48] sm:$0xff] %v3545_v36 }
 0x697   :  { %v3498_v15 = vpop.f32.mrf.mxu2 }
 0x698   :  { %v3499_v10 = vadd.f32 %v6913_v44, %v3498_v15 }
 0x69a   :  { %v3548_v11 = vadd.f32 %v3547_v13, %v3499_v10 }
 0x69c   :  { %3572 = vst [vmem:[%s6989_s10 + $0x50] sm:$0xff] %v3548_v11 }
 0x69f   :  { %v3500_v5 = vpop.f32.mrf.mxu2 }
 0x6a0   :  { %v3501_v47 = vadd.f32 %v6913_v44, %v3500_v5  ;;  %v3552_v32 = vpop.f32.mrf.mxu3 }
 0x6a2   :  { %v3550_v12 = vadd.f32 %v3549_v4, %v3501_v47 }
 0x6a4   :  { %3573 = vst [vmem:[%s6989_s10 + $0x58] sm:$0xff] %v3550_v12 }
 0x6a7   :  { %v3503_v27 = vpop.f32.mrf.mxu2 }
 0x6a8   :  { %v3504_v30 = vadd.f32 %v6913_v44, %v3503_v27  ;;  %v3554_v59 = vpop.f32.mrf.mxu3 }
 0x6aa   :  { %v3553_v7 = vadd.f32 %v3552_v32, %v3504_v30 }
 0x6ac   :  { %3574 = vst [vmem:[%s6989_s10 + $0x60] sm:$0xff] %v3553_v7 }
 0x6af   :  { %v3505_v60 = vpop.f32.mrf.mxu2 }
 0x6b0   :  { %v3506_v38 = vadd.f32 %v6913_v44, %v3505_v60 }
 0x6b2   :  { %v3555_v57 = vadd.f32 %v3554_v59, %v3506_v38 }
 0x6b4   :  { %3575 = vst [vmem:[%s6989_s10 + $0x68] sm:$0xff] %v3555_v57 }
 0x6b7   :  { %v3508_v19 = vpop.f32.mrf.mxu2 }
 0x6b8   :  { %v3509_v54 = vadd.f32 %v6913_v44, %v3508_v19 }
 0x6b9   :  { %v3557_v48 = vpop.f32.mrf.mxu3 }
 0x6ba   :  { %v3558_v24 = vadd.f32 %v3557_v48, %v3509_v54 }
 0x6bc   :  { %3576 = vst [vmem:[%s6989_s10 + $0x70] sm:$0xff] %v3558_v24 }
 0x6bf   :  { %v3510_v42 = vpop.f32.mrf.mxu2 }
 0x6c0   :  { %v3511_v31 = vadd.f32 %v6913_v44, %v3510_v42 }
 0x6c1   :  { %v3559_v28 = vpop.f32.mrf.mxu3 }
 0x6c2   :  { %v3560_v0 = vadd.f32 %v3559_v28, %v3511_v31 }
 0x6c4   :  { %3577 = vst [vmem:[%s6989_s10 + $0x78] sm:$0xff] %v3560_v0 }
 0x6c5   :  { %3582 = vsyncpa [#allocation4], 1 }
 0x6c6   :  { %3583 = vsyncpa [#allocation6], 1 }
 0x6c7   :  { %3584 = vsyncpa [#allocation9], 1 }
 0x6c8   :  { %3585 = vsyncpa [#allocation12], 1 }
 0x6c9   :  { %3586 = vsyncpa [#allocation15], 1 }

</bundles_post_ra>
